<compile_context>
chip_gen: v7x
topology: tpu7x:2x2x1
jax: 0.10.0
libtpu: 0.0.40
codegen_flags: <defaults>
</compile_context>

<pallas_src>
import functools

import jax
import jax.numpy as jnp
from jax import lax
from jax.experimental import pallas as pl
from jax.experimental.pallas import tpu as pltpu


def _merge_block_kernel(x_ref, w_ref, b_ref, g_ref, bt_ref, o_ref, xs_ref,
                        *, H, W, Cin, Cout):
    eps = 1e-5
    Ho, Wo = H // 2, W // 2          # MaxPool2d(2,2) floors odd dims
    He, We = 2 * Ho, 2 * Wo

    # ---- In-kernel halo: zero padded scratch, drop the tile interior in ----
    xs_ref[...] = jnp.zeros_like(xs_ref)
    xs_ref[1:H + 1, 1:W + 1, :] = x_ref[0]
    xp = xs_ref[...]                                  # (H+2, W+2, Cin)

    # ---- im2col: build (H*W, 9*Cin) patch; K order (ky, kx, ci) matches ----
    # ---- the wrapper's w.reshape(9*Cin, Cout) (HWIO row-major).         ----
    taps = []
    for ky in range(3):
        for kx in range(3):
            taps.append(xp[ky:ky + H, kx:kx + W, :].reshape(H * W, Cin))
    patch = jnp.concatenate(taps, axis=-1)            # (H*W, 9*Cin)

    # ---- Single MXU matmul, native operand dtype, f32 accumulation ----
    acc = jnp.dot(patch, w_ref[...], preferred_element_type=jnp.float32)
    conv = acc.reshape(H, W, Cout) + b_ref[0].astype(jnp.float32)

    # ---- 2x2 max pool (stride 2) via pairwise maxima (VPU) ----
    conv = conv[:He, :We, :]
    cr = conv.reshape(Ho, 2, We, Cout)
    r = jnp.maximum(cr[:, 0], cr[:, 1])               # (Ho, We, Cout)
    rr = r.reshape(Ho, Wo, 2, Cout)
    p = jnp.maximum(rr[:, :, 0, :], rr[:, :, 1, :])   # (Ho, Wo, Cout)

    # ---- LayerNorm over channels (biased variance, eps=1e-5), f32 math ----
    mean = jnp.mean(p, axis=-1, keepdims=True)
    var = jnp.mean((p - mean) ** 2, axis=-1, keepdims=True)
    normed = (p - mean) * lax.rsqrt(var + eps)
    out = normed * g_ref[0].astype(jnp.float32) + bt_ref[0].astype(jnp.float32)

    # ---- Lane-dense store: last dim (Wo*Cout) is a multiple of 128 ----
    o_ref[0] = out.reshape(Ho, Wo * Cout).astype(o_ref.dtype)


def merge_block_nhwc(x, w, b, gamma, beta):
    """x: (B, H, W, Cin) NHWC; w: (3, 3, Cin, Cout) HWIO.
    Returns (B, H//2, W//2, Cout)."""
    B, H, W, Cin = x.shape
    Cout = w.shape[-1]
    Ho, Wo = H // 2, W // 2

    # Fused conv weight for the single im2col matmul (K order = ky, kx, ci).
    w2d = w.reshape(3 * 3 * Cin, Cout)

    kernel = functools.partial(_merge_block_kernel, H=H, W=W, Cin=Cin, Cout=Cout)

    out = pl.pallas_call(
        kernel,
        out_shape=jax.ShapeDtypeStruct((B, Ho, Wo * Cout), x.dtype),
        grid_spec=pltpu.PrefetchScalarGridSpec(
            num_scalar_prefetch=0,
            grid=(B,),
            in_specs=[
                pl.BlockSpec((1, H, W, Cin), lambda bi: (bi, 0, 0, 0)),
                pl.BlockSpec((3 * 3 * Cin, Cout), lambda bi: (0, 0)),
                pl.BlockSpec((1, Cout), lambda bi: (0, 0)),
                pl.BlockSpec((1, Cout), lambda bi: (0, 0)),
                pl.BlockSpec((1, Cout), lambda bi: (0, 0)),
            ],
            out_specs=pl.BlockSpec((1, Ho, Wo * Cout), lambda bi: (bi, 0, 0)),
            scratch_shapes=[pltpu.VMEM((H + 2, W + 2, Cin), x.dtype)],
        ),
        compiler_params=pltpu.CompilerParams(dimension_semantics=("parallel",)),
    )(x, w2d, b, gamma, beta)

    # Cheap metadata reshape back to NHWC outside the kernel.
    return out.reshape(B, Ho, Wo, Cout)


def merge_block(x, w, b, gamma, beta, hw=None):
    """Handles both the 4D (B,H,W,C) and 3D (B,H*W,C) PyTorch branches.

    For the 3D branch, `hw=(H, W)` may be given explicitly; otherwise a square
    map is inferred exactly like the PyTorch module (int(sqrt(HW)))."""
    if x.ndim == 4:
        return merge_block_nhwc(x, w, b, gamma, beta)
    B, HW, C = x.shape
    if hw is None:
        H = W = int(round(HW ** 0.5))
    else:
        H, W = hw
    y = merge_block_nhwc(x.reshape(B, H, W, C), w, b, gamma, beta)
    return y.reshape(B, y.shape[1] * y.shape[2], -1)


def _reference(x, w, b, gamma, beta):
    """Pure-JAX reference for validation."""
    conv = lax.conv_general_dilated(
        x, w, window_strides=(1, 1), padding="SAME",
        dimension_numbers=("NHWC", "HWIO", "NHWC"),
    ) + b[0]
    pool = lax.reduce_window(
        conv, -jnp.inf, lax.max,
        window_dimensions=(1, 2, 2, 1), window_strides=(1, 2, 2, 1), padding="VALID",
    )
    mean = jnp.mean(pool, axis=-1, keepdims=True)
    var = jnp.mean((pool - mean) ** 2, axis=-1, keepdims=True)
    return (pool - mean) * lax.rsqrt(var + 1e-5) * gamma[0] + beta[0]


if __name__ == "__main__":
    B, H, W, Cin, Cout = 2, 16, 16, 4, 32

    key = jax.random.PRNGKey(0)
    k_x, k_w, k_b = jax.random.split(key, 3)

    x = jax.random.normal(k_x, (B, H, W, Cin), dtype=jnp.float32)
    # Deterministic parameter init (synthetic, Kaiming-ish scale for conv).
    w = jax.random.normal(k_w, (3, 3, Cin, Cout), dtype=jnp.float32) * (1.0 / (3 * 3 * Cin) ** 0.5)
    b = jax.random.normal(k_b, (1, Cout), dtype=jnp.float32) * 0.01
    gamma = jnp.ones((1, Cout), dtype=jnp.float32)
    beta = jnp.zeros((1, Cout), dtype=jnp.float32)

    out = jax.block_until_ready(merge_block(x, w, b, gamma, beta))
    ref = _reference(x, w, b, gamma, beta)
    assert out.shape == (B, H // 2, W // 2, Cout), out.shape
    assert jnp.allclose(out, ref, rtol=1e-4, atol=1e-4), float(jnp.max(jnp.abs(out - ref)))

    # 3D-input branch (same weights, reshaped input) — matches the 4D result.
    out3 = jax.block_until_ready(merge_block(x.reshape(B, H * W, Cin), w, b, gamma, beta))
    assert out3.shape == (B, (H // 2) * (W // 2), Cout)
    assert jnp.allclose(out3, ref.reshape(B, -1, Cout), rtol=1e-4, atol=1e-4)

    print("KERNEL_OK")
</pallas_src>

<mosaic_0001>
module attributes {stable_mosaic.version = 11 : i64} {
  func.func @_merge_block_kernel(%arg0: i32, %arg1: memref<1x16x16x4xf32, #tpu.memory_space<vmem>>, %arg2: memref<36x32xf32, #tpu.memory_space<vmem>>, %arg3: memref<1x32xf32, #tpu.memory_space<vmem>>, %arg4: memref<1x32xf32, #tpu.memory_space<vmem>>, %arg5: memref<1x32xf32, #tpu.memory_space<vmem>>, %arg6: memref<1x8x256xf32, #tpu.memory_space<vmem>>, %arg7: memref<18x18x4xf32, #tpu.memory_space<vmem>>) attributes {dimension_semantics = [#tpu.dimension_semantics<parallel>], iteration_bounds = array<i64: 2>, scalar_prefetch = 0 : i64, scratch_operands = 1 : i64, tpu.core_type = #tpu.core_type<tc>, window_params = [{transform_indices = @transform_0, window_bounds = array<i64: 1, 16, 16, 4>}, {pipeline_mode = #tpu.pipeline_mode<synchronous>, transform_indices = @transform_1, window_bounds = array<i64: 36, 32>}, {pipeline_mode = #tpu.pipeline_mode<synchronous>, transform_indices = @transform_2, window_bounds = array<i64: 1, 32>}, {pipeline_mode = #tpu.pipeline_mode<synchronous>, transform_indices = @transform_3, window_bounds = array<i64: 1, 32>}, {pipeline_mode = #tpu.pipeline_mode<synchronous>, transform_indices = @transform_4, window_bounds = array<i64: 1, 32>}, {transform_indices = @transform_5, window_bounds = array<i64: 1, 8, 256>}]} {
    %cst = arith.constant 0.000000e+00 : f32
    %0 = vector.broadcast %cst : f32 to vector<18x18x4xf32>
    %c0 = arith.constant 0 : index
    %c0_0 = arith.constant 0 : index
    %c0_1 = arith.constant 0 : index
    %1 = vector.load %arg7[%c0, %c0_0, %c0_1] : memref<18x18x4xf32, #tpu.memory_space<vmem>>, vector<18x18x4xf32>
    tpu.vector_store %arg7[%c0, %c0_0, %c0_1], %0 {strides = array<i32>} : memref<18x18x4xf32, #tpu.memory_space<vmem>>, vector<18x18x4xf32>,
    %c0_2 = arith.constant 0 : index
    %c0_3 = arith.constant 0 : index
    %c0_4 = arith.constant 0 : index
    %c0_5 = arith.constant 0 : index
    %2 = vector.load %arg1[%c0_2, %c0_3, %c0_4, %c0_5] : memref<1x16x16x4xf32, #tpu.memory_space<vmem>>, vector<1x16x16x4xf32>
    %3 = vector.shape_cast %2 : vector<1x16x16x4xf32> to vector<16x16x4xf32>
    %c1 = arith.constant 1 : index
    %c1_6 = arith.constant 1 : index
    %c0_7 = arith.constant 0 : index
    %4 = vector.load %arg7[%c1, %c1_6, %c0_7] : memref<18x18x4xf32, #tpu.memory_space<vmem>>, vector<16x16x4xf32>
    tpu.vector_store %arg7[%c1, %c1_6, %c0_7], %3 {strides = array<i32>} : memref<18x18x4xf32, #tpu.memory_space<vmem>>, vector<16x16x4xf32>,
    %c0_8 = arith.constant 0 : index
    %c0_9 = arith.constant 0 : index
    %c0_10 = arith.constant 0 : index
    %5 = vector.load %arg7[%c0_8, %c0_9, %c0_10] : memref<18x18x4xf32, #tpu.memory_space<vmem>>, vector<18x18x4xf32>
    %6 = vector.extract_strided_slice %5 {offsets = [0, 0, 0], sizes = [16, 16, 4], strides = [1, 1, 1]} : vector<18x18x4xf32> to vector<16x16x4xf32>
    %7 = vector.shape_cast %6 : vector<16x16x4xf32> to vector<256x4xf32>
    %8 = vector.extract_strided_slice %5 {offsets = [0, 1, 0], sizes = [16, 16, 4], strides = [1, 1, 1]} : vector<18x18x4xf32> to vector<16x16x4xf32>
    %9 = vector.shape_cast %8 : vector<16x16x4xf32> to vector<256x4xf32>
    %10 = vector.extract_strided_slice %5 {offsets = [0, 2, 0], sizes = [16, 16, 4], strides = [1, 1, 1]} : vector<18x18x4xf32> to vector<16x16x4xf32>
    %11 = vector.shape_cast %10 : vector<16x16x4xf32> to vector<256x4xf32>
    %12 = vector.extract_strided_slice %5 {offsets = [1, 0, 0], sizes = [16, 16, 4], strides = [1, 1, 1]} : vector<18x18x4xf32> to vector<16x16x4xf32>
    %13 = vector.shape_cast %12 : vector<16x16x4xf32> to vector<256x4xf32>
    %14 = vector.extract_strided_slice %5 {offsets = [1, 1, 0], sizes = [16, 16, 4], strides = [1, 1, 1]} : vector<18x18x4xf32> to vector<16x16x4xf32>
    %15 = vector.shape_cast %14 : vector<16x16x4xf32> to vector<256x4xf32>
    %16 = vector.extract_strided_slice %5 {offsets = [1, 2, 0], sizes = [16, 16, 4], strides = [1, 1, 1]} : vector<18x18x4xf32> to vector<16x16x4xf32>
    %17 = vector.shape_cast %16 : vector<16x16x4xf32> to vector<256x4xf32>
    %18 = vector.extract_strided_slice %5 {offsets = [2, 0, 0], sizes = [16, 16, 4], strides = [1, 1, 1]} : vector<18x18x4xf32> to vector<16x16x4xf32>
    %19 = vector.shape_cast %18 : vector<16x16x4xf32> to vector<256x4xf32>
    %20 = vector.extract_strided_slice %5 {offsets = [2, 1, 0], sizes = [16, 16, 4], strides = [1, 1, 1]} : vector<18x18x4xf32> to vector<16x16x4xf32>
    %21 = vector.shape_cast %20 : vector<16x16x4xf32> to vector<256x4xf32>
    %22 = vector.extract_strided_slice %5 {offsets = [2, 2, 0], sizes = [16, 16, 4], strides = [1, 1, 1]} : vector<18x18x4xf32> to vector<16x16x4xf32>
    %23 = vector.shape_cast %22 : vector<16x16x4xf32> to vector<256x4xf32>
    %24 = tpu.concatenate %7, %9, %11, %13, %15, %17, %19, %21, %23 in 1 : vector<256x4xf32>, vector<256x4xf32>, vector<256x4xf32>, vector<256x4xf32>, vector<256x4xf32>, vector<256x4xf32>, vector<256x4xf32>, vector<256x4xf32>, vector<256x4xf32> -> vector<256x36xf32>
    %c0_11 = arith.constant 0 : index
    %c0_12 = arith.constant 0 : index
    %25 = vector.load %arg2[%c0_11, %c0_12] : memref<36x32xf32, #tpu.memory_space<vmem>>, vector<36x32xf32>
    %cst_13 = arith.constant dense<0.000000e+00> : vector<256x32xf32>
    %26 = tpu.matmul %24, %25, %cst_13 {dimension_numbers = #tpu.dot_dimension_numbers<[1], [0], [0], [1], [0, 0, 1, 1], [], []>} : vector<256x36xf32>, vector<36x32xf32>, vector<256x32xf32> -> vector<256x32xf32>
    %27 = vector.shape_cast %26 : vector<256x32xf32> to vector<16x16x32xf32>
    %c0_14 = arith.constant 0 : index
    %c0_15 = arith.constant 0 : index
    %28 = vector.load %arg3[%c0_14, %c0_15] : memref<1x32xf32, #tpu.memory_space<vmem>>, vector<1x32xf32>
    %29 = vector.shape_cast %28 : vector<1x32xf32> to vector<32xf32>
    %30 = vector.shape_cast %29 : vector<32xf32> to vector<1x1x32xf32>
    %31 = vector.broadcast %30 : vector<1x1x32xf32> to vector<16x16x32xf32>
    %32 = arith.addf %27, %31 : vector<16x16x32xf32>
    %33 = vector.shape_cast %32 : vector<16x16x32xf32> to vector<8x2x16x32xf32>
    %34 = vector.extract_strided_slice %33 {offsets = [0, 0, 0, 0], sizes = [8, 1, 16, 32], strides = [1, 1, 1, 1]} : vector<8x2x16x32xf32> to vector<8x1x16x32xf32>
    %35 = vector.shape_cast %34 : vector<8x1x16x32xf32> to vector<8x16x32xf32>
    %36 = vector.extract_strided_slice %33 {offsets = [0, 1, 0, 0], sizes = [8, 1, 16, 32], strides = [1, 1, 1, 1]} : vector<8x2x16x32xf32> to vector<8x1x16x32xf32>
    %37 = vector.shape_cast %36 : vector<8x1x16x32xf32> to vector<8x16x32xf32>
    %38 = arith.maximumf %35, %37 : vector<8x16x32xf32>
    %39 = vector.shape_cast %38 : vector<8x16x32xf32> to vector<8x8x2x32xf32>
    %40 = vector.extract_strided_slice %39 {offsets = [0, 0, 0, 0], sizes = [8, 8, 1, 32], strides = [1, 1, 1, 1]} : vector<8x8x2x32xf32> to vector<8x8x1x32xf32>
    %41 = vector.shape_cast %40 : vector<8x8x1x32xf32> to vector<8x8x32xf32>
    %42 = vector.extract_strided_slice %39 {offsets = [0, 0, 1, 0], sizes = [8, 8, 1, 32], strides = [1, 1, 1, 1]} : vector<8x8x2x32xf32> to vector<8x8x1x32xf32>
    %43 = vector.shape_cast %42 : vector<8x8x1x32xf32> to vector<8x8x32xf32>
    %44 = arith.maximumf %41, %43 : vector<8x8x32xf32>
    %cst_16 = arith.constant dense<0.000000e+00> : vector<8x8xf32>
    %45 = vector.multi_reduction <add>, %44, %cst_16 [2] : vector<8x8x32xf32> to vector<8x8xf32>
    %46 = vector.shape_cast %45 : vector<8x8xf32> to vector<8x8x1xf32>
    %cst_17 = arith.constant 3.200000e+01 : f32
    %47 = vector.broadcast %cst_17 : f32 to vector<8x8x1xf32>
    %48 = arith.divf %46, %47 : vector<8x8x1xf32>
    %49 = vector.broadcast %48 : vector<8x8x1xf32> to vector<8x8x32xf32>
    %50 = arith.subf %44, %49 : vector<8x8x32xf32>
    %51 = arith.mulf %50, %50 : vector<8x8x32xf32>
    %cst_18 = arith.constant dense<0.000000e+00> : vector<8x8xf32>
    %52 = vector.multi_reduction <add>, %51, %cst_18 [2] : vector<8x8x32xf32> to vector<8x8xf32>
    %53 = vector.shape_cast %52 : vector<8x8xf32> to vector<8x8x1xf32>
    %cst_19 = arith.constant 3.200000e+01 : f32
    %54 = vector.broadcast %cst_19 : f32 to vector<8x8x1xf32>
    %55 = arith.divf %53, %54 : vector<8x8x1xf32>
    %56 = vector.broadcast %48 : vector<8x8x1xf32> to vector<8x8x32xf32>
    %57 = arith.subf %44, %56 : vector<8x8x32xf32>
    %cst_20 = arith.constant 9.99999974E-6 : f32
    %58 = vector.broadcast %cst_20 : f32 to vector<8x8x1xf32>
    %59 = arith.addf %55, %58 : vector<8x8x1xf32>
    %60 = math.rsqrt %59 : vector<8x8x1xf32>
    %61 = vector.broadcast %60 : vector<8x8x1xf32> to vector<8x8x32xf32>
    %62 = arith.mulf %57, %61 : vector<8x8x32xf32>
    %c0_21 = arith.constant 0 : index
    %c0_22 = arith.constant 0 : index
    %63 = vector.load %arg4[%c0_21, %c0_22] : memref<1x32xf32, #tpu.memory_space<vmem>>, vector<1x32xf32>
    %64 = vector.shape_cast %63 : vector<1x32xf32> to vector<32xf32>
    %65 = vector.shape_cast %64 : vector<32xf32> to vector<1x1x32xf32>
    %66 = vector.broadcast %65 : vector<1x1x32xf32> to vector<8x8x32xf32>
    %67 = arith.mulf %62, %66 : vector<8x8x32xf32>
    %c0_23 = arith.constant 0 : index
    %c0_24 = arith.constant 0 : index
    %68 = vector.load %arg5[%c0_23, %c0_24] : memref<1x32xf32, #tpu.memory_space<vmem>>, vector<1x32xf32>
    %69 = vector.shape_cast %68 : vector<1x32xf32> to vector<32xf32>
    %70 = vector.shape_cast %69 : vector<32xf32> to vector<1x1x32xf32>
    %71 = vector.broadcast %70 : vector<1x1x32xf32> to vector<8x8x32xf32>
    %72 = arith.addf %67, %71 : vector<8x8x32xf32>
    %73 = vector.shape_cast %72 : vector<8x8x32xf32> to vector<8x256xf32>
    %c0_25 = arith.constant 0 : index
    %c0_26 = arith.constant 0 : index
    %c0_27 = arith.constant 0 : index
    %74 = vector.load %arg6[%c0_25, %c0_26, %c0_27] : memref<1x8x256xf32, #tpu.memory_space<vmem>>, vector<1x8x256xf32>
    %75 = vector.shape_cast %74 : vector<1x8x256xf32> to vector<8x256xf32>
    %76 = vector.shape_cast %73 : vector<8x256xf32> to vector<1x8x256xf32>
    tpu.vector_store %arg6[%c0_25, %c0_26, %c0_27], %76 {strides = array<i32>} : memref<1x8x256xf32, #tpu.memory_space<vmem>>, vector<1x8x256xf32>,
    return
  }
  func.func @transform_0(%arg0: i32) -> (i32, i32, i32, i32) {
    %c0_i32 = arith.constant 0 : i32
    %c0_i32_0 = arith.constant 0 : i32
    %c0_i32_1 = arith.constant 0 : i32
    %c0_i32_2 = arith.constant 0 : i32
    return %arg0, %c0_i32, %c0_i32_0, %c0_i32_1 : i32, i32, i32, i32
  }
  func.func @transform_1(%arg0: i32) -> (i32, i32) {
    %c0_i32 = arith.constant 0 : i32
    %c0_i32_0 = arith.constant 0 : i32
    %c0_i32_1 = arith.constant 0 : i32
    return %c0_i32, %c0_i32_0 : i32, i32
  }
  func.func @transform_2(%arg0: i32) -> (i32, i32) {
    %c0_i32 = arith.constant 0 : i32
    %c0_i32_0 = arith.constant 0 : i32
    %c0_i32_1 = arith.constant 0 : i32
    return %c0_i32, %c0_i32_0 : i32, i32
  }
  func.func @transform_3(%arg0: i32) -> (i32, i32) {
    %c0_i32 = arith.constant 0 : i32
    %c0_i32_0 = arith.constant 0 : i32
    %c0_i32_1 = arith.constant 0 : i32
    return %c0_i32, %c0_i32_0 : i32, i32
  }
  func.func @transform_4(%arg0: i32) -> (i32, i32) {
    %c0_i32 = arith.constant 0 : i32
    %c0_i32_0 = arith.constant 0 : i32
    %c0_i32_1 = arith.constant 0 : i32
    return %c0_i32, %c0_i32_0 : i32, i32
  }
  func.func @transform_5(%arg0: i32) -> (i32, i32, i32) {
    %c0_i32 = arith.constant 0 : i32
    %c0_i32_0 = arith.constant 0 : i32
    %c0_i32_1 = arith.constant 0 : i32
    return %arg0, %c0_i32, %c0_i32_0 : i32, i32, i32
  }
}

</mosaic_0001>

<bundles_post_ra>
// kernel: tpu_custom_call.1
= control target key start
LH: loop header
LB: loop body
LE: loop exit
PB: predicated region body
PF: predicated region fallthrough
CT: control target
= control target key end

     0   :  { %10 = vsyncpa [#allocation4], 0  ;;  %s8984_s0 = inlined_call_operand.vmem [shape: f32[2,16,16,4], index: 0, kind: input, shape index: {}]   ;;  %s8985_s1 = inlined_call_operand.vmem [shape: f32[36,32], index: 1, kind: input, shape index: {}]   ;;  %s8986_s2 = inlined_call_operand.vmem [shape: f32[1,32], index: 2, kind: input, shape index: {}]   ;;  %s8987_s3 = inlined_call_operand.vmem [shape: f32[1,32], index: 3, kind: input, shape index: {}]   ;;  %s8988_s4 = inlined_call_operand.vmem [shape: f32[1,32], index: 4, kind: input, shape index: {}]   ;;  %s8989_s5 = inlined_call_operand.hbm [shape: f32[2,8,256], index: 5, kind: output, shape index: {}]  }
   0x1   :  { %12 = vsyncpa [#allocation4 + $0x1], 0  ;;  %s5731_s18 = smov 0   ;;  %s5733_s19 = smov 0  }
   0x2   :  { %s5735_s20 = smov 0   ;;  %s5737_s21 = smov 0  }
   0x3 LB: > { %s5752_s22 = sadd.s32 4294967295, %s5681_s21   ;;  %s5297_s23 = sadd.s32 4294967294, %s5681_s21   ;;  %s5681_s21 = sphi %s5737_s21, %s9257_s21   ;;  %s5677_s20 = sphi %s5735_s20, %s9256_s20   ;;  %s5673_s19 = sphi %s5733_s19, %s9255_s19   ;;  %s5669_s18 = sphi %s5731_s18, %s9254_s18  }
   0x4   : > { %s5756_s24 = sadd.s32 1, %s5681_s21   ;;  %s135_s25 = sadd.s32 1, %s5677_s20 }
   0x5   : > { %s132_s26 = ssub.s32 %s5681_s21, %s5756_s24  ;;  %p145_p0 = scmp.ne.s32.totalorder %s5677_s20, %s5673_s19 }
   0x6   : > { %p133_p1 = scmp.eq.s32.totalorder %s132_s26, 0  ;;  %p146_p2 = scmp.eq.s32.totalorder %s5752_s22, 1 }
   0x7   : > { %p151_p3 = scmp.ne.s32.totalorder %s5673_s19, %s5669_s18  ;;  %p152_p4 = scmp.eq.s32.totalorder %s5297_s23, 1 }
   0x8   : > { %s5767_s27 = scalar_select %p133_p1, %s5677_s20, %s135_s25  }
   0x9   : > { %p5769_p5 = por %p146_p2, %p145_p0  ;;  %p5773_p6 = por %p152_p4, %p151_p3 }
   0xa   : > { %p5300_p7 = scmp.ge.s32.totalorder %s5681_s21, 1  ;;  %p190_p8 = scmp.lt.s32.totalorder %s5681_s21, 3 }
   0xc   : > { %p191_p9 = pnand %p5300_p7, %p190_p8 }
   0xe   : > { %194 = sbr.rel (%p191_p9) target bundleno = 1440 (0x5a0), region = 40 }
  0x15   : > { %vm223_vm0 = vcmask 31744   ;;  %vm226_vm1 = vcmask 25600   ;;  %v5683_v0 = vmov 0.0   ;;  %p218_p10 = scmp.lt.s32.totalorder %s5752_s22, 1  ;;  %vm446_vm2 = vcmask 1046528   ;;  %s5684_s10 = smov 4  }
  0x16   : > { %225 = vst.msk [vmem:[#allocation2 + $0x8] sm:$0xff] %vm223_vm0, %v5683_v0  ;;  %224 = vst.msk [vmem:[#allocation2] sm:$0xff] %vm223_vm0, %v5683_v0  ;;  %vm527_vm3 = vcmask 1045504   ;;  %s5685_s11 = smov 8   ;;  %s5686_s12 = smov 12   ;;  %vm1767_vm4 = vcmask 1043456  }
  0x17   : > { %227 = vst.msk [vmem:[#allocation2 + $0x10] sm:$0x3] %vm226_vm1, %v5683_v0  ;;  %230 = vst.msk [vmem:[#allocation2 + $0x28] sm:$0x3] %vm226_vm1, %v5683_v0  ;;  %s219_s30 = scalar_select %p218_p10, %s5752_s22, 1  ;;  %vm1434_vm5 = vcmask 64512  }
  0x18   : > { %228 = vst.msk [vmem:[#allocation2 + $0x18] sm:$0xff] %vm223_vm0, %v5683_v0  ;;  %229 = vst.msk [vmem:[#allocation2 + $0x20] sm:$0xff] %vm223_vm0, %v5683_v0  ;;  %s5687_s13 = smov 16   ;;  %s5688_s14 = smov 20   ;;  %vm1467_vm6 = vcmask 97280   ;;  %vm1500_vm7 = vcmask 130048  }
  0x19   : > { %231 = vst.msk [vmem:[#allocation2 + $0x30] sm:$0xff] %vm223_vm0, %v5683_v0  ;;  %232 = vst.msk [vmem:[#allocation2 + $0x38] sm:$0xff] %vm223_vm0, %v5683_v0  ;;  %s5417_s6 = sshll.u32 %s219_s30, 8  ;;  %s5689_s15 = smov 24   ;;  %vm1533_vm8 = vcmask 162816   ;;  %vm1566_vm9 = vcmask 195584  }
  0x1a   : > { %233 = vst.msk [vmem:[#allocation2 + $0x40] sm:$0x3] %vm226_vm1, %v5683_v0  ;;  %236 = vst.msk [vmem:[#allocation2 + $0x58] sm:$0x3] %vm226_vm1, %v5683_v0  ;;  %s5838_s9 = scalar_lea.vmem %s8984_s0, %s5417_s6  ;;  %s5690_s16 = smov 28   ;;  %vm1599_vm10 = vcmask 228352  }
  0x1b   : > { %234 = vst.msk [vmem:[#allocation2 + $0x48] sm:$0xff] %vm223_vm0, %v5683_v0  ;;  %235 = vst.msk [vmem:[#allocation2 + $0x50] sm:$0xff] %vm223_vm0, %v5683_v0  ;;  %v295_v1 = vld [vmem:[%s5838_s9 + $0x80] sm:$0xff]  ;;  %v293_v2 = vld [vmem:[%s5838_s9 + $0x70] sm:$0xff]  ;;  %s5691_s17 = smov 32   ;;  %vm1632_vm11 = vcmask 261120  }
  0x1c   : > { %237 = vst.msk [vmem:[#allocation2 + $0x60] sm:$0xff] %vm223_vm0, %v5683_v0  ;;  %238 = vst.msk [vmem:[#allocation2 + $0x68] sm:$0xff] %vm223_vm0, %v5683_v0  ;;  %v294_v3 = vld [vmem:[%s5838_s9 + $0x78] sm:$0xff]  ;;  %v279_v11 = vld [vmem:[%s5838_s9] sm:$0xff]  ;;  %vm1670_vm12 = vcmask 293888   ;;  %vm2979_vm13 = vcmask 1041409  }
  0x1d   : > { %239 = vst.msk [vmem:[#allocation2 + $0x70] sm:$0x3] %vm226_vm1, %v5683_v0  ;;  %242 = vst.msk [vmem:[#allocation2 + $0x88] sm:$0x3] %vm226_vm1, %v5683_v0  ;;  %v5843_v4 = vld [vmem:[#allocation2 + $0x8] sm:$0xff]  ;;  %v5845_v6 = vld [vmem:[#allocation2] sm:$0xff] }
  0x1e   : > { %240 = vst.msk [vmem:[#allocation2 + $0x78] sm:$0xff] %vm223_vm0, %v5683_v0  ;;  %241 = vst.msk [vmem:[#allocation2 + $0x80] sm:$0xff] %vm223_vm0, %v5683_v0  ;;  %v346_v5 = vld [vmem:[#allocation2 + $0x10] sm:$0x3]  ;;  %v448_v7 = vrot.slane %v5843_v4, 1  ;;  %v447_v9 = vrot.slane %v5845_v6, 1 }
  0x1f   : > { %243 = vst.msk [vmem:[#allocation2 + $0x90] sm:$0xff] %vm223_vm0, %v5683_v0  ;;  %244 = vst.msk [vmem:[#allocation2 + $0x98] sm:$0xff] %vm223_vm0, %v5683_v0  ;;  %v450_v8 = vrot.slane %v346_v5, 1  ;;  %v528_v10 = vrot.slane %v5845_v6, 2  ;;  %v296_v12 = vld [vmem:[%s5838_s9 + $0x88] sm:$0xff]  ;;  %v529_v13 = vrot.slane %v5843_v4, 2 }
  0x20   : > { %245 = vst.msk [vmem:[#allocation2 + $0xa0] sm:$0x3] %vm226_vm1, %v5683_v0  ;;  %248 = vst.msk [vmem:[#allocation2 + $0xb8] sm:$0x3] %vm226_vm1, %v5683_v0  ;;  %v280_v14 = vld [vmem:[%s5838_s9 + $0x8] sm:$0xff]  ;;  %v297_v15 = vld [vmem:[%s5838_s9 + $0x90] sm:$0xff]  ;;  %v449_v18 = vsel %vm446_vm2, %v447_v9, %v448_v7 }
  0x21   : > { %246 = vst.msk [vmem:[#allocation2 + $0xa8] sm:$0xff] %vm223_vm0, %v5683_v0  ;;  %247 = vst.msk [vmem:[#allocation2 + $0xb0] sm:$0xff] %vm223_vm0, %v5683_v0  ;;  %v281_v16 = vld [vmem:[%s5838_s9 + $0x10] sm:$0xff]  ;;  %v451_v17 = vsel %vm446_vm2, %v448_v7, %v450_v8  ;;  %v298_v19 = vld [vmem:[%s5838_s9 + $0x98] sm:$0xff]  ;;  %634 = vrot.lane.b32.xlu0 %v449_v18, %s5684_s10  ;;  %v530_v24 = vsel %vm527_vm3, %v528_v10, %v529_v13  ;;  %v531_v25 = vrot.slane %v346_v5, 2  ;;  %vm2981_vm14 = vcmask 1042434  }
  0x22   : > { %249 = vst.msk [vmem:[#allocation2 + $0xc0] sm:$0xff] %vm223_vm0, %v5683_v0  ;;  %250 = vst.msk [vmem:[#allocation2 + $0xc8] sm:$0xff] %vm223_vm0, %v5683_v0  ;;  %v282_v20 = vld [vmem:[%s5838_s9 + $0x18] sm:$0xff]  ;;  %v299_v21 = vld [vmem:[%s5838_s9 + $0xa0] sm:$0xff]  ;;  %636 = vrot.lane.b32.xlu1 %v451_v17, %s5684_s10  ;;  %vm2983_vm15 = vcmask 1043459   ;;  %s5698_s26 = smov 96  }
  0x23   : > { %251 = vst.msk [vmem:[#allocation2 + $0xd0] sm:$0x3] %vm226_vm1, %v5683_v0  ;;  %254 = vst.msk [vmem:[#allocation2 + $0xe8] sm:$0x3] %vm226_vm1, %v5683_v0  ;;  %v283_v22 = vld [vmem:[%s5838_s9 + $0x20] sm:$0xff]  ;;  %v300_v23 = vld [vmem:[%s5838_s9 + $0xa8] sm:$0xff]  ;;  %v532_v33 = vsel %vm527_vm3, %v529_v13, %v531_v25 }
  0x24   : > { %252 = vst.msk [vmem:[#allocation2 + $0xd8] sm:$0xff] %vm223_vm0, %v5683_v0  ;;  %253 = vst.msk [vmem:[#allocation2 + $0xe0] sm:$0xff] %vm223_vm0, %v5683_v0  ;;  %v284_v26 = vld [vmem:[%s5838_s9 + $0x28] sm:$0xff]  ;;  %v302_v9 = vld [vmem:[%s5838_s9 + $0xb8] sm:$0xff]  ;;  %s5699_s30 = smov 64   ;;  %s215_s6 = sand.u32 1, %s5673_s19  }
  0x25   : > { %255 = vst.msk [vmem:[#allocation2 + $0xf0] sm:$0xff] %vm223_vm0, %v5683_v0  ;;  %256 = vst.msk [vmem:[#allocation2 + $0xf8] sm:$0xff] %vm223_vm0, %v5683_v0  ;;  %730 = vrot.lane.b32.xlu0 %v530_v24, %s5685_s11  ;;  %v286_v10 = vld [vmem:[%s5838_s9 + $0x38] sm:$0xff]  ;;  %s5301_s7 = sshll.u32 %s215_s6, 4 }
  0x26   : > { %257 = vst.msk [vmem:[#allocation2 + $0x100] sm:$0x3] %vm226_vm1, %v5683_v0  ;;  %260 = vst.msk [vmem:[#allocation2 + $0x118] sm:$0x3] %vm226_vm1, %v5683_v0  ;;  %s217_s8 = scalar_lea.vmem [#allocation3], %s5301_s7 }
  0x27   : > { %258 = vst.msk [vmem:[#allocation2 + $0x108] sm:$0xff] %vm223_vm0, %v5683_v0  ;;  %259 = vst.msk [vmem:[#allocation2 + $0x110] sm:$0xff] %vm223_vm0, %v5683_v0  ;;  %s5238_s23 = sshll.u32 %s217_s8, 4  ;;  %s8943_s23 = int_to_ptr.vmem [resolvable:$true] %s5238_s23 }
  0x28   : > { %261 = vst.msk [vmem:[#allocation2 + $0x120] sm:$0xff] %vm223_vm0, %v5683_v0  ;;  %262 = vst.msk [vmem:[#allocation2 + $0x128] sm:$0xff] %vm223_vm0, %v5683_v0 }
  0x29   : > { %263 = vst.msk [vmem:[#allocation2 + $0x130] sm:$0x3] %vm226_vm1, %v5683_v0  ;;  %266 = vst.msk [vmem:[#allocation2 + $0x148] sm:$0x3] %vm226_vm1, %v5683_v0  ;;  %732 = vrot.lane.b32.xlu0 %v532_v33, %s5685_s11 }
  0x2a   : > { %264 = vst.msk [vmem:[#allocation2 + $0x138] sm:$0xff] %vm223_vm0, %v5683_v0  ;;  %265 = vst.msk [vmem:[#allocation2 + $0x140] sm:$0xff] %vm223_vm0, %v5683_v0 }
  0x2b   : > { %267 = vst.msk [vmem:[#allocation2 + $0x150] sm:$0xff] %vm223_vm0, %v5683_v0  ;;  %268 = vst.msk [vmem:[#allocation2 + $0x158] sm:$0xff] %vm223_vm0, %v5683_v0 }
  0x2c   : > { %269 = vst.msk [vmem:[#allocation2 + $0x160] sm:$0x3] %vm226_vm1, %v5683_v0  ;;  %272 = vst.msk [vmem:[#allocation2 + $0x178] sm:$0x3] %vm226_vm1, %v5683_v0 }
  0x2d   : > { %270 = vst.msk [vmem:[#allocation2 + $0x168] sm:$0xff] %vm223_vm0, %v5683_v0  ;;  %271 = vst.msk [vmem:[#allocation2 + $0x170] sm:$0xff] %vm223_vm0, %v5683_v0 }
  0x2e   : > { %273 = vst.msk [vmem:[#allocation2 + $0x180] sm:$0xff] %vm223_vm0, %v5683_v0  ;;  %274 = vst.msk [vmem:[#allocation2 + $0x188] sm:$0xff] %vm223_vm0, %v5683_v0 }
  0x2f   : > { %275 = vst.msk [vmem:[#allocation2 + $0x190] sm:$0x3] %vm226_vm1, %v5683_v0  ;;  %278 = vst.msk [vmem:[#allocation2 + $0x1a8] sm:$0x3] %vm226_vm1, %v5683_v0  ;;  %vm2985_vm1 = vcmask 1044484  }
  0x30   : > { %276 = vst.msk [vmem:[#allocation2 + $0x198] sm:$0xff] %vm223_vm0, %v5683_v0  ;;  %277 = vst.msk [vmem:[#allocation2 + $0x1a0] sm:$0xff] %vm223_vm0, %v5683_v0 }
  0x31   : > { %328 = vst.msk [vmem:[#allocation2 + $0xd9] sm:$0xff] %vm223_vm0, %v295_v1  ;;  %326 = vst.msk [vmem:[#allocation2 + $0xc1] sm:$0xff] %vm223_vm0, %v293_v2  ;;  %v301_v1 = vld [vmem:[%s5838_s9 + $0xb0] sm:$0xff] }
  0x32   : > { %327 = vst.msk [vmem:[#allocation2 + $0xc9] sm:$0xff] %vm223_vm0, %v294_v3  ;;  %312 = vst.msk [vmem:[#allocation2 + $0x19] sm:$0xff] %vm223_vm0, %v279_v11  ;;  %v285_v2 = vld [vmem:[%s5838_s9 + $0x30] sm:$0xff] }
  0x33   : > { %329 = vst.msk [vmem:[#allocation2 + $0xe1] sm:$0xff] %vm223_vm0, %v296_v12  ;;  %313 = vst.msk [vmem:[#allocation2 + $0x21] sm:$0xff] %vm223_vm0, %v280_v14 }
  0x34   : > { %330 = vst.msk [vmem:[#allocation2 + $0xf1] sm:$0xff] %vm223_vm0, %v297_v15  ;;  %314 = vst.msk [vmem:[#allocation2 + $0x31] sm:$0xff] %vm223_vm0, %v281_v16 }
  0x35   : > { %331 = vst.msk [vmem:[#allocation2 + $0xf9] sm:$0xff] %vm223_vm0, %v298_v19  ;;  %315 = vst.msk [vmem:[#allocation2 + $0x39] sm:$0xff] %vm223_vm0, %v282_v20 }
  0x36   : > { %332 = vst.msk [vmem:[#allocation2 + $0x109] sm:$0xff] %vm223_vm0, %v299_v21  ;;  %316 = vst.msk [vmem:[#allocation2 + $0x49] sm:$0xff] %vm223_vm0, %v283_v22 }
  0x37   : > { %333 = vst.msk [vmem:[#allocation2 + $0x111] sm:$0xff] %vm223_vm0, %v300_v23  ;;  %317 = vst.msk [vmem:[#allocation2 + $0x51] sm:$0xff] %vm223_vm0, %v284_v26  ;;  %v1665_v26 = vld [vmem:[%s8985_s1] sm:$0xff] }
  0x38   : > { %v5881_v27 = vld [vmem:[#allocation2 + $0xd8] sm:$0xff]  ;;  %v5889_v32 = vld [vmem:[#allocation2 + $0xc0] sm:$0xff]  ;;  %334 = vst.msk [vmem:[#allocation2 + $0x121] sm:$0xff] %vm223_vm0, %v301_v1  ;;  %318 = vst.msk [vmem:[#allocation2 + $0x61] sm:$0xff] %vm223_vm0, %v285_v2 }
  0x39   : > { %v5883_v28 = vld [vmem:[#allocation2 + $0xc8] sm:$0xff]  ;;  %v370_v29 = vld [vmem:[#allocation2 + $0xd0] sm:$0x3]  ;;  %858 = vrot.lane.b32.xlu1 %v5881_v27, %s5686_s12  ;;  %v568_v34 = vrot.slane %v5889_v32, 2  ;;  %v5903_v38 = vld [vmem:[#allocation2 + $0x18] sm:$0xff]  ;;  %v487_v40 = vrot.slane %v5889_v32, 1 }
  0x3a   : > { %v488_v30 = vrot.slane %v5883_v28, 1  ;;  %v490_v31 = vrot.slane %v370_v29, 1  ;;  %v569_v35 = vrot.slane %v5883_v28, 2  ;;  %v571_v39 = vrot.slane %v370_v29, 2  ;;  %826 = vrot.lane.b32.xlu0 %v5903_v38, %s5686_s12  ;;  %v5916_v43 = vld [vmem:[#allocation2 + $0xe0] sm:$0xff]  ;;  %335 = vst.msk [vmem:[#allocation2 + $0x129] sm:$0xff] %vm223_vm0, %v302_v9 }
  0x3b   : > { %v5918_v44 = vld [vmem:[#allocation2 + $0x20] sm:$0xff]  ;;  %v492_v45 = vrot.slane %v5881_v27, 1  ;;  %v493_v46 = vrot.slane %v5916_v43, 1  ;;  %v452_v47 = vrot.slane %v5903_v38, 1  ;;  %v373_v51 = vld [vmem:[#allocation2 + $0xe8] sm:$0x3] }
  0x3c   : > { %v5895_v36 = vsel %vm446_vm2, %v488_v30, %v490_v31  ;;  %v5901_v37 = vsel %vm527_vm3, %v568_v34, %v569_v35  ;;  %v5911_v41 = vsel %vm527_vm3, %v569_v35, %v571_v39  ;;  %v5914_v42 = vsel %vm446_vm2, %v487_v40, %v488_v30  ;;  %v349_v52 = vld [vmem:[#allocation2 + $0x28] sm:$0x3]  ;;  %v5977_v7 = vld [vmem:[#allocation2 + $0xf0] sm:$0xff]  ;;  %319 = vst.msk [vmem:[#allocation2 + $0x69] sm:$0xff] %vm223_vm0, %v286_v10  ;;  %v5992_v11 = vld [vmem:[#allocation2 + $0xf8] sm:$0xff] }
  0x3d   : > { %9078 = vst [vmem:[#allocation6_spill] sm:$0xff] %v5895_v36  ;;  %668 = vrot.lane.b32.xlu1 %v5895_v36, %s5684_s10  ;;  %9079 = vst [vmem:[#allocation7_spill] sm:$0xff] %v5901_v37  ;;  %v453_v48 = vrot.slane %v5918_v44, 1  ;;  %v5933_v49 = vsel %vm446_vm2, %v492_v45, %v493_v46  ;;  %v495_v53 = vrot.slane %v373_v51, 1  ;;  %v455_v54 = vrot.slane %v349_v52, 1  ;;  %v5979_v8 = vld [vmem:[#allocation2 + $0x30] sm:$0xff] }
  0x3e   : > { %9080 = vst [vmem:[#allocation8_spill] sm:$0xff] %v5911_v41  ;;  %666 = vrot.lane.b32.xlu0 %v5914_v42, %s5684_s10  ;;  %9081 = vst [vmem:[#allocation9_spill] sm:$0xff] %v5933_v49  ;;  %v573_v55 = vrot.slane %v5881_v27, 2  ;;  %v574_v56 = vrot.slane %v5916_v43, 2  ;;  %v533_v59 = vrot.slane %v5903_v38, 2  ;;  %v534_v60 = vrot.slane %v5918_v44, 2 }
  0x3f   : > { %v454_v50 = vsel %vm446_vm2, %v452_v47, %v453_v48  ;;  %v5945_v57 = vsel %vm446_vm2, %v493_v46, %v495_v53  ;;  %v456_v58 = vsel %vm446_vm2, %v453_v48, %v455_v54  ;;  %v576_v63 = vrot.slane %v373_v51, 2  ;;  %v5994_v12 = vld [vmem:[#allocation2 + $0x38] sm:$0xff]  ;;  %v376_v19 = vld [vmem:[#allocation2 + $0x100] sm:$0x3]  ;;  %v1666_v29 = vld [vmem:[%s8985_s1 + $0x8] sm:$0xff] }
  0x40   : > { %9082 = vst [vmem:[#allocation10_spill] sm:$0xff] %v5945_v57  ;;  %v5954_v61 = vsel %vm527_vm3, %v573_v55, %v574_v56  ;;  %v535_v62 = vsel %vm527_vm3, %v533_v59, %v534_v60  ;;  %v536_v0 = vrot.slane %v349_v52, 2  ;;  %v497_v13 = vrot.slane %v5977_v7, 1  ;;  %v352_v20 = vld [vmem:[#allocation2 + $0x40] sm:$0x3]  ;;  %v1667_v35 = vld [vmem:[%s8985_s1 + $0x10] sm:$0xff] }
  0x41   : > { %762 = vrot.lane.b32.xlu1 %v5901_v37, %s5685_s11  ;;  %9083 = vst [vmem:[#allocation11_spill] sm:$0xff] %v5954_v61  ;;  %v5971_v3 = vsel %vm527_vm3, %v574_v56, %v576_v63  ;;  %v498_v14 = vrot.slane %v5992_v11, 1  ;;  %v457_v15 = vrot.slane %v5979_v8, 1  ;;  %v458_v16 = vrot.slane %v5994_v12, 1  ;;  %v1668_v39 = vld [vmem:[%s8985_s1 + $0x18] sm:$0xff]  ;;  %v303_v53 = vld [vmem:[%s5838_s9 + $0xc0] sm:$0xff] }
  0x42   : > { %828 = vrot.lane.b32.xlu0 %v5918_v44, %s5686_s12  ;;  %9084 = vst [vmem:[#allocation12_spill] sm:$0xff] %v5971_v3  ;;  %v537_v5 = vsel %vm527_vm3, %v534_v60, %v536_v0  ;;  %v500_v21 = vrot.slane %v376_v19, 1  ;;  %v460_v22 = vrot.slane %v352_v20, 1  ;;  %v578_v23 = vrot.slane %v5977_v7, 2  ;;  %v1669_v47 = vld [vmem:[%s8985_s1 + $0x20] sm:$0xf] }
  0x43   : > { %v499_v17 = vsel %vm446_vm2, %v497_v13, %v498_v14  ;;  %v459_v18 = vsel %vm446_vm2, %v457_v15, %v458_v16  ;;  %v579_v24 = vrot.slane %v5992_v11, 2  ;;  %v538_v25 = vrot.slane %v5979_v8, 2  ;;  %v287_v54 = vld [vmem:[%s5838_s9 + $0x40] sm:$0xff]  ;;  %336 = vst.msk [vmem:[#allocation2 + $0x139] sm:$0xff] %vm223_vm0, %v303_v53  ;;  %v377_v55 = vld [vmem:[#allocation2 + $0x108] sm:$0xff]  ;;  %v354_v9 = vld [vmem:[#allocation2 + $0x50] sm:$0xff] }
  0x44   : > { %v501_v30 = vsel %vm446_vm2, %v498_v14, %v500_v21  ;;  %v461_v31 = vsel %vm446_vm2, %v458_v16, %v460_v22  ;;  %v539_v33 = vrot.slane %v5994_v12, 2  ;;  %v5514_v34 = vpack.c.bf16 %v1666_v29, %v1665_v26  ;;  %320 = vst.msk [vmem:[#allocation2 + $0x79] sm:$0xff] %vm223_vm0, %v287_v54  ;;  %v353_v56 = vld [vmem:[#allocation2 + $0x48] sm:$0xff] }
  0x45   : > { %764 = vrot.lane.b32.xlu1 %v5911_v41, %s5685_s11  ;;  %v580_v40 = vsel %vm527_vm3, %v578_v23, %v579_v24  ;;  %v5518_v46 = vpack.c.bf16 %v1668_v39, %v1667_v35  ;;  %v581_v48 = vrot.slane %v376_v19, 2  ;;  %v304_v63 = vld [vmem:[%s5838_s9 + $0xc8] sm:$0xff]  ;;  %v502_v10 = vrot.slane %v377_v55, 1  ;;  %v355_v23 = vld [vmem:[#allocation2 + $0x58] sm:$0x3] }
  0x46   : > { %922 = vrot.lane.b32.xlu0 %v454_v50, %s5687_s13  ;;  %5515 = vmatprep.subr.bf16.mxu0 %v5514_v34  ;;  %v540_v45 = vsel %vm527_vm3, %v538_v25, %v539_v33  ;;  %v288_v0 = vld [vmem:[%s5838_s9 + $0x48] sm:$0xff]  ;;  %337 = vst.msk [vmem:[#allocation2 + $0x141] sm:$0xff] %vm223_vm0, %v304_v63  ;;  %v463_v13 = vrot.slane %v354_v9, 1  ;;  %v465_v25 = vrot.slane %v355_v23, 1  ;;  %v543_v35 = vrot.slane %v353_v56, 2 }
  0x47   : > { %5522 = vmatprep.subr.bf16.mxu1 %v5514_v34  ;;  %5517 = vmatpush3.bf16.msra.mxu0 %v5514_v34  ;;  %v582_v51 = vsel %vm527_vm3, %v579_v24, %v581_v48  ;;  %321 = vst.msk [vmem:[#allocation2 + $0x81] sm:$0xff] %vm223_vm0, %v288_v0  ;;  %v544_v39 = vrot.slane %v354_v9, 2 }
  0x48   : > { %5525 = vmatpush3.bf16.msra.mxu1 %v5514_v34  ;;  %5519 = vmatprep.subr.bf16.mxu0 %v5518_v46 }
  0x49   : > { %860 = vrot.lane.b32.xlu1 %v5916_v43, %s5686_s12  ;;  %5523 = vmatprep.subr.bf16.mxu1 %v5518_v46 }
  0x4a   : > { %638 = vrot.lane.b32.xlu0 %v454_v50, %s5684_s10  ;;  %v541_v50 = vrot.slane %v352_v20, 2  ;;  %v379_v20 = vld [vmem:[#allocation2 + $0x118] sm:$0x3] }
  0x4b   : > { %5521 = vmatpush3.bf16.msra.mxu0 %v5518_v46  ;;  %v505_v24 = vrot.slane %v379_v20, 1 }
  0x4c   : > { %5526 = vmatpush3.bf16.msra.mxu1 %v5518_v46  ;;  %5464 = vmatprep.subr.msk.mxu0 %vm1767_vm4, %v1669_v47  ;;  %v542_v52 = vsel %vm527_vm3, %v539_v33, %v541_v50  ;;  %v466_v33 = vsel %vm446_vm2, %v463_v13, %v465_v25 }
  0x4d   : > { %954 = vrot.lane.b32.xlu1 %v5933_v49, %s5687_s13  ;;  %5524 = vmatprep.subr.msk.mxu1 %vm1767_vm4, %v1669_v47 }
  0x4e   : > { %924 = vrot.lane.b32.xlu0 %v456_v58, %s5687_s13 }
  0x4f   : > { %5465 = vmatpush3.msk.msra.mxu0 %vm1767_vm4, %v1669_v47 }
  0x50   : > { %5527 = vmatpush3.msk.msra.mxu1 %vm1767_vm4, %v1669_v47  ;;  %v545_v47 = vsel %vm527_vm3, %v543_v35, %v544_v39  ;;  %vm2991_vm4 = vcmask 1047559  }
  0x51   : > { %670 = vrot.lane.b32.xlu1 %v5933_v49, %s5684_s10 }
  0x52   : > { %1018 = vrot.lane.b32.xlu0 %v535_v62, %s5688_s14 }
  0x55   : > { %956 = vrot.lane.b32.xlu1 %v5945_v57, %s5687_s13 }
  0x56   : > { %640 = vrot.lane.b32.xlu0 %v456_v58, %s5684_s10 }
  0x59   : > { %1050 = vrot.lane.b32.xlu1 %v5954_v61, %s5688_s14 }
  0x5a   : > { %734 = vrot.lane.b32.xlu0 %v535_v62, %s5685_s11 }
  0x5d   : > { %672 = vrot.lane.b32.xlu1 %v5945_v57, %s5684_s10 }
  0x5e   : > { %1020 = vrot.lane.b32.xlu0 %v537_v5, %s5688_s14 }
  0x61   : > { %766 = vrot.lane.b32.xlu1 %v5954_v61, %s5685_s11 }
  0x62   : > { %1114 = vrot.lane.b32.xlu0 %v5979_v8, %s5689_s15 }
  0x65   : > { %1052 = vrot.lane.b32.xlu1 %v5971_v3, %s5688_s14 }
  0x66   : > { %736 = vrot.lane.b32.xlu0 %v537_v5, %s5685_s11  ;;  %v378_v5 = vld [vmem:[#allocation2 + $0x110] sm:$0xff] }
  0x67   : > { %v584_v34 = vrot.slane %v378_v5, 2 }
  0x69   : > { %1146 = vrot.lane.b32.xlu1 %v5977_v7, %s5689_s15 }
  0x6a   : > { %830 = vrot.lane.b32.xlu0 %v5979_v8, %s5686_s12 }
  0x6d   : > { %768 = vrot.lane.b32.xlu1 %v5971_v3, %s5685_s11 }
  0x6e   : > { %1116 = vrot.lane.b32.xlu0 %v5994_v12, %s5689_s15 }
  0x71   : > { %862 = vrot.lane.b32.xlu1 %v5977_v7, %s5686_s12 }
  0x72   : > { %1210 = vrot.lane.b32.xlu0 %v459_v18, %s5690_s16 }
  0x75   : > { %1148 = vrot.lane.b32.xlu1 %v5992_v11, %s5689_s15 }
  0x76   : > { %832 = vrot.lane.b32.xlu0 %v5994_v12, %s5686_s12  ;;  %v462_v12 = vrot.slane %v353_v56, 1 }
  0x79   : > { %1242 = vrot.lane.b32.xlu1 %v499_v17, %s5690_s16 }
  0x7a   : > { %926 = vrot.lane.b32.xlu0 %v459_v18, %s5687_s13 }
  0x7d   : > { %864 = vrot.lane.b32.xlu1 %v5992_v11, %s5686_s12  ;;  %v503_v11 = vrot.slane %v378_v5, 1 }
  0x7e   : > { %1212 = vrot.lane.b32.xlu0 %v461_v31, %s5690_s16 }
  0x7f   : > { %v504_v16 = vsel %vm446_vm2, %v502_v10, %v503_v11 }
  0x81   : > { %958 = vrot.lane.b32.xlu1 %v499_v17, %s5687_s13 }
  0x82   : > { %1306 = vrot.lane.b32.xlu0 %v540_v45, %s5691_s17 }
  0x85   : > { %1244 = vrot.lane.b32.xlu1 %v501_v30, %s5690_s16 }
  0x86   : > { %642 = vrot.lane.b32.xlu0 %v459_v18, %s5684_s10 }
  0x89   : > { %1338 = vrot.lane.b32.xlu1 %v580_v40, %s5691_s17 }
  0x8a   : > { %928 = vrot.lane.b32.xlu0 %v461_v31, %s5687_s13 }
  0x8d   : > { %674 = vrot.lane.b32.xlu1 %v499_v17, %s5684_s10  ;;  %v464_v17 = vsel %vm446_vm2, %v462_v12, %v463_v13 }
  0x8e   : > { %1022 = vrot.lane.b32.xlu0 %v540_v45, %s5688_s14 }
  0x91   : > { %960 = vrot.lane.b32.xlu1 %v501_v30, %s5687_s13 }
  0x92   : > { %1308 = vrot.lane.b32.xlu0 %v542_v52, %s5691_s17 }
  0x93   : > { %v6067_v59 = vpop.permute.xlu0 %634 }
  0x94   : > { %v6065_v58 = vpop.permute.xlu1 %636 }
  0x95   : > { %1054 = vrot.lane.b32.xlu1 %v580_v40, %s5688_s14 }
  0x96   : > { %644 = vrot.lane.b32.xlu0 %v461_v31, %s5684_s10  ;;  %v583_v31 = vrot.slane %v377_v55, 2 }
  0x97   : > { %v6071_v60 = vpop.permute.xlu0 %730 }
  0x98   : > { %v585_v46 = vsel %vm527_vm3, %v583_v31, %v584_v34  ;;  %v6179_v31 = vld [vmem:[#allocation2 + $0x60] sm:$0xff] }
  0x99   : > { %1340 = vrot.lane.b32.xlu1 %v582_v51, %s5691_s17 }
  0x9a   : > { %738 = vrot.lane.b32.xlu0 %v540_v45, %s5685_s11 }
  0x9b   : > { %v6081_v1 = vpop.permute.xlu0 %732 }
  0x9d   : > { %676 = vrot.lane.b32.xlu1 %v501_v30, %s5684_s10  ;;  %v506_v30 = vsel %vm446_vm2, %v503_v11, %v505_v24 }
  0x9e   : > { %1024 = vrot.lane.b32.xlu0 %v542_v52, %s5688_s14 }
  0xa1   : > { %770 = vrot.lane.b32.xlu1 %v580_v40, %s5685_s11 }
  0xa2   : > { %1118 = vrot.lane.b32.xlu0 %v353_v56, %s5689_s15 }
  0xa5   : > { %1056 = vrot.lane.b32.xlu1 %v582_v51, %s5688_s14 }
  0xa6   : > { %740 = vrot.lane.b32.xlu0 %v542_v52, %s5685_s11 }
  0xa9   : > { %1150 = vrot.lane.b32.xlu1 %v377_v55, %s5689_s15 }
  0xaa   : > { %834 = vrot.lane.b32.xlu0 %v353_v56, %s5686_s12  ;;  %v546_v56 = vrot.slane %v355_v23, 2  ;;  %v289_v23 = vld [vmem:[%s5838_s9 + $0x50] sm:$0xff] }
  0xab   : > { %v6073_v62 = vpop.permute.xlu1 %858  ;;  %322 = vst.msk [vmem:[#allocation2 + $0x91] sm:$0xff] %vm223_vm0, %v289_v23  ;;  %v6201_v23 = vld [vmem:[#allocation2 + $0x68] sm:$0xff] }
  0xac   : > { %v6089_v15 = vpop.permute.xlu0 %826  ;;  %v468_v3 = vrot.slane %v6201_v23, 1 }
  0xad   : > { %772 = vrot.lane.b32.xlu1 %v582_v51, %s5685_s11 }
  0xae   : > { %1120 = vrot.lane.b32.xlu0 %v354_v9, %s5689_s15 }
  0xaf   : > { %v6083_v2 = vpop.permute.xlu1 %668 }
  0xb0   : > { %v6097_v19 = vpop.permute.xlu0 %666 }
  0xb1   : > { %866 = vrot.lane.b32.xlu1 %v377_v55, %s5686_s12  ;;  %v586_v55 = vrot.slane %v379_v20, 2  ;;  %v305_v20 = vld [vmem:[%s5838_s9 + $0xd0] sm:$0xff] }
  0xb2   : > { %1214 = vrot.lane.b32.xlu0 %v464_v17, %s5690_s16  ;;  %338 = vst.msk [vmem:[#allocation2 + $0x151] sm:$0xff] %vm223_vm0, %v305_v20  ;;  %v6199_v20 = vld [vmem:[#allocation2 + $0x128] sm:$0xff] }
  0xb3   : > { %v6087_v14 = vpop.permute.xlu1 %762 }
  0xb4   : > { %v6103_v22 = vpop.permute.xlu0 %828 }
  0xb5   : > { %1152 = vrot.lane.b32.xlu1 %v378_v5, %s5689_s15 }
  0xb6   : > { %836 = vrot.lane.b32.xlu0 %v354_v9, %s5686_s12  ;;  %v547_v9 = vsel %vm527_vm3, %v544_v39, %v546_v56 }
  0xb7   : > { %v6095_v18 = vpop.permute.xlu1 %764 }
  0xb8   : > { %v6109_v29 = vpop.permute.xlu0 %922 }
  0xb9   : > { %1246 = vrot.lane.b32.xlu1 %v504_v16, %s5690_s16 }
  0xba   : > { %930 = vrot.lane.b32.xlu0 %v464_v17, %s5687_s13 }
  0xbb   : > { %v6101_v21 = vpop.permute.xlu1 %860 }
  0xbc   : > { %v6117_v45 = vpop.permute.xlu0 %638 }
  0xbd   : > { %868 = vrot.lane.b32.xlu1 %v378_v5, %s5686_s12  ;;  %v587_v5 = vsel %vm527_vm3, %v584_v34, %v586_v55 }
  0xbe   : > { %1216 = vrot.lane.b32.xlu0 %v466_v33, %s5690_s16 }
  0xbf   : > { %v6107_v26 = vpop.permute.xlu1 %954 }
  0xc0   : > { %v6125_v50 = vpop.permute.xlu0 %924 }
  0xc1   : > { %962 = vrot.lane.b32.xlu1 %v504_v16, %s5687_s13 }
  0xc2   : > { %1310 = vrot.lane.b32.xlu0 %v545_v47, %s5691_s17 }
  0xc3   : > { %v6115_v40 = vpop.permute.xlu1 %670 }
  0xc4   : > { %v6131_v52 = vpop.permute.xlu0 %1018 }
  0xc5   : > { %1248 = vrot.lane.b32.xlu1 %v506_v30, %s5690_s16 }
  0xc6   : > { %646 = vrot.lane.b32.xlu0 %v464_v17, %s5684_s10 }
  0xc7   : > { %v6123_v48 = vpop.permute.xlu1 %956 }
  0xc8   : > { %v6137_v54 = vpop.permute.xlu0 %640 }
  0xc9   : > { %1342 = vrot.lane.b32.xlu1 %v585_v46, %s5691_s17 }
  0xca   : > { %932 = vrot.lane.b32.xlu0 %v466_v33, %s5687_s13 }
  0xcb   : > { %v6129_v51 = vpop.permute.xlu1 %1050 }
  0xcc   : > { %v6143_v0 = vpop.permute.xlu0 %734 }
  0xcd   : > { %678 = vrot.lane.b32.xlu1 %v504_v16, %s5684_s10 }
  0xce   : > { %1026 = vrot.lane.b32.xlu0 %v545_v47, %s5688_s14 }
  0xcf   : > { %v6135_v53 = vpop.permute.xlu1 %672 }
  0xd0   : > { %v6151_v11 = vpop.permute.xlu0 %1020 }
  0xd1   : > { %964 = vrot.lane.b32.xlu1 %v506_v30, %s5687_s13 }
  0xd2   : > { %1312 = vrot.lane.b32.xlu0 %v547_v9, %s5691_s17 }
  0xd3   : > { %v6141_v63 = vpop.permute.xlu1 %766 }
  0xd4   : > { %v6157_v13 = vpop.permute.xlu0 %1114 }
  0xd5   : > { %1058 = vrot.lane.b32.xlu1 %v585_v46, %s5688_s14 }
  0xd6   : > { %648 = vrot.lane.b32.xlu0 %v466_v33, %s5684_s10 }
  0xd7   : > { %v6149_v10 = vpop.permute.xlu1 %1052 }
  0xd8   : > { %v6163_v17 = vpop.permute.xlu0 %736 }
  0xd9   : > { %1344 = vrot.lane.b32.xlu1 %v587_v5, %s5691_s17 }
  0xda   : > { %742 = vrot.lane.b32.xlu0 %v545_v47, %s5685_s11  ;;  %v290_v47 = vld [vmem:[%s5838_s9 + $0x58] sm:$0xff] }
  0xdb   : > { %v6155_v12 = vpop.permute.xlu1 %1146  ;;  %323 = vst.msk [vmem:[#allocation2 + $0x99] sm:$0xff] %vm223_vm0, %v290_v47  ;;  %v467_v47 = vrot.slane %v6179_v31, 1 }
  0xdc   : > { %v6173_v25 = vpop.permute.xlu0 %830 }
  0xdd   : > { %680 = vrot.lane.b32.xlu1 %v506_v30, %s5684_s10  ;;  %v6177_v30 = vld [vmem:[#allocation2 + $0x120] sm:$0xff] }
  0xde   : > { %1028 = vrot.lane.b32.xlu0 %v547_v9, %s5688_s14 }
  0xdf   : > { %v6161_v16 = vpop.permute.xlu1 %768 }
  0xe0   : > { %v6183_v34 = vpop.permute.xlu0 %1116 }
  0xe1   : > { %774 = vrot.lane.b32.xlu1 %v585_v46, %s5685_s11  ;;  %v306_v46 = vld [vmem:[%s5838_s9 + $0xd8] sm:$0xff] }
  0xe2   : > { %1122 = vrot.lane.b32.xlu0 %v6179_v31, %s5689_s15  ;;  %339 = vst.msk [vmem:[#allocation2 + $0x159] sm:$0xff] %vm223_vm0, %v306_v46  ;;  %v508_v46 = vrot.slane %v6199_v20, 1 }
  0xe3   : > { %v6171_v24 = vpop.permute.xlu1 %862 }
  0xe4   : > { %v1211_v39 = vpop.permute.xlu0 %1210 }
  0xe5   : > { %1060 = vrot.lane.b32.xlu1 %v587_v5, %s5688_s14 }
  0xe6   : > { %744 = vrot.lane.b32.xlu0 %v547_v9, %s5685_s11  ;;  %v507_v9 = vrot.slane %v6177_v30, 1 }
  0xe7   : > { %v6181_v33 = vpop.permute.xlu1 %1148 }
  0xe8   : > { %v6197_v56 = vpop.permute.xlu0 %832  ;;  %v6230_v41 = vsel %vm446_vm2, %v507_v9, %v508_v46 }
  0xe9   : > { %1154 = vrot.lane.b32.xlu1 %v6177_v30, %s5689_s15 }
  0xea   : > { %838 = vrot.lane.b32.xlu0 %v6179_v31, %s5686_s12 }
  0xeb   : > { %v1243_v35 = vpop.permute.xlu1 %1242 }
  0xec   : > { %v6216_v57 = vpop.permute.xlu0 %926 }
  0xed   : > { %776 = vrot.lane.b32.xlu1 %v587_v5, %s5685_s11  ;;  %v1418_v5 = vsel %vm223_vm0, %v5889_v32, %v6097_v19  ;;  %v1402_v19 = vsel %vm223_vm0, %v5845_v6, %v6067_v59 }
  0xee   : > { %v1451_v32 = vsel %vm1434_vm5, %v1418_v5, %v6087_v14  ;;  %1124 = vrot.lane.b32.xlu0 %v6201_v23, %s5689_s15  ;;  %v1435_v49 = vsel %vm1434_vm5, %v1402_v19, %v6071_v60  ;;  %v6233_v14 = vsel %vm446_vm2, %v467_v47, %v468_v3 }
  0xef   : > { %v6195_v55 = vpop.permute.xlu1 %864  ;;  %v1468_v6 = vsel %vm1467_vm6, %v1435_v49, %v6089_v15  ;;  %v1484_v59 = vsel %vm1467_vm6, %v1451_v32, %v6073_v62 }
  0xf0   : > { %v1213_v37 = vpop.permute.xlu0 %1212  ;;  %v1517_v36 = vsel %vm1500_vm7, %v1484_v59, %v6107_v26  ;;  %v1501_v60 = vsel %vm1500_vm7, %v1468_v6, %v6109_v29 }
  0xf1   : > { %870 = vrot.lane.b32.xlu1 %v6177_v30, %s5686_s12  ;;  %v1550_v9 = vsel %vm1533_vm8, %v1517_v36, %v6129_v51  ;;  %v1534_v47 = vsel %vm1533_vm8, %v1501_v60, %v6131_v52  ;;  %v6257_v51 = vld [vmem:[#allocation2 + $0x130] sm:$0x3]  ;;  %v588_v60 = vrot.slane %v6177_v30, 2 }
  0xf2   : > { %1218 = vrot.lane.b32.xlu0 %v6233_v14, %s5690_s16  ;;  %v1583_v49 = vsel %vm1566_vm9, %v1550_v9, %v6155_v12  ;;  %v1567_v62 = vsel %vm1566_vm9, %v1534_v47, %v6157_v13  ;;  %v6259_v52 = vld [vmem:[#allocation2 + $0x70] sm:$0x3]  ;;  %v510_v12 = vrot.slane %v6257_v51, 1  ;;  %v589_v9 = vrot.slane %v6199_v20, 2 }
  0xf3   : > { %v6214_v61 = vpop.permute.xlu1 %958  ;;  %v1616_v15 = vsel %vm1599_vm10, %v1583_v49, %v1243_v35  ;;  %v1600_v36 = vsel %vm1599_vm10, %v1567_v62, %v1211_v39  ;;  %v470_v13 = vrot.slane %v6259_v52, 1  ;;  %v1403_v47 = vsel %vm223_vm0, %v5843_v4, %v6065_v58 }
  0xf4   : > { %v1307_v29 = vpop.permute.xlu0 %1306  ;;  %v511_v6 = vsel %vm446_vm2, %v508_v46, %v510_v12  ;;  %v1419_v49 = vsel %vm223_vm0, %v5883_v28, %v6083_v2  ;;  %v548_v46 = vrot.slane %v6179_v31, 2  ;;  %v1436_v30 = vsel %vm1434_vm5, %v1403_v47, %v6081_v1 }
  0xf5   : > { %1156 = vrot.lane.b32.xlu1 %v6199_v20, %s5689_s15  ;;  %v1633_v19 = vsel %vm1632_vm11, %v1600_v36, %v1307_v29  ;;  %v471_v59 = vsel %vm446_vm2, %v468_v3, %v470_v13  ;;  %v549_v3 = vrot.slane %v6201_v23, 2  ;;  %v1452_v4 = vsel %vm1434_vm5, %v1419_v49, %v6095_v18 }
  0xf6   : > { %840 = vrot.lane.b32.xlu0 %v6201_v23, %s5686_s12  ;;  %5466 = vmatprep.mubr.msk.f32.mxu0 %vm1670_vm12, %v1633_v19  ;;  %v590_v28 = vsel %vm527_vm3, %v588_v60, %v589_v9  ;;  %v1485_v58 = vsel %vm1467_vm6, %v1452_v4, %v6101_v21  ;;  %v1469_v2 = vsel %vm1467_vm6, %v1436_v30, %v6103_v22  ;;  %v551_v19 = vrot.slane %v6259_v52, 2 }
  0xf7   : > { %v1245_v5 = vpop.permute.xlu1 %1244  ;;  %v550_v23 = vsel %vm527_vm3, %v548_v46, %v549_v3  ;;  %v1518_v1 = vsel %vm1500_vm7, %v1485_v58, %v6123_v48  ;;  %v1502_v18 = vsel %vm1500_vm7, %v1469_v2, %v6125_v50  ;;  %v291_v46 = vld [vmem:[%s5838_s9 + $0x60] sm:$0xff] }
  0xf8   : > { %v6273_v39 = vpop.permute.xlu0 %642  ;;  %v1551_v36 = vsel %vm1533_vm8, %v1518_v1, %v6149_v10  ;;  %v1535_v21 = vsel %vm1533_vm8, %v1502_v18, %v6151_v11  ;;  %324 = vst.msk [vmem:[#allocation2 + $0xa9] sm:$0xff] %vm223_vm0, %v291_v46  ;;  %v292_v1 = vld [vmem:[%s5838_s9 + $0x68] sm:$0xff] }
  0xf9   : > { %1250 = vrot.lane.b32.xlu1 %v6230_v41, %s5690_s16  ;;  %v1584_v22 = vsel %vm1566_vm9, %v1551_v36, %v6181_v33  ;;  %325 = vst.msk [vmem:[#allocation2 + $0xb1] sm:$0xff] %vm223_vm0, %v292_v1 }
  0xfa   : > { %934 = vrot.lane.b32.xlu0 %v6233_v14, %s5687_s13  ;;  %v1617_v48 = vsel %vm1599_vm10, %v1584_v22, %v1245_v5  ;;  %v6399_v22 = vld [vmem:[#allocation2 + $0x80] sm:$0xff] }
  0xfb   : > { %v1339_v26 = vpop.permute.xlu1 %1338 }
  0xfc   : > { %v1649_v32 = vsel %vm1632_vm11, %v1616_v15, %v1339_v26  ;;  %v6291_v15 = vpop.permute.xlu0 %928  ;;  %v1568_v26 = vsel %vm1566_vm9, %v1535_v21, %v6183_v34  ;;  %v6397_v21 = vld [vmem:[#allocation2 + $0x140] sm:$0xff] }
  0xfd   : > { %872 = vrot.lane.b32.xlu1 %v6199_v20, %s5686_s12  ;;  %5490 = vmatprep.mubr.msk.f32.mxu1 %vm1670_vm12, %v1649_v32  ;;  %v1601_v50 = vsel %vm1599_vm10, %v1568_v26, %v1213_v37  ;;  %v591_v37 = vrot.slane %v6257_v51, 2  ;;  %v552_v51 = vsel %vm527_vm3, %v549_v3, %v551_v19 }
  0xfe   : > { %1220 = vrot.lane.b32.xlu0 %v471_v59, %s5690_s16 }
  0xff   : > { %v6271_v35 = vpop.permute.xlu1 %674 }
 0x100   : > { %v6308_v20 = vpop.permute.xlu0 %1022 }
 0x101   : > { %966 = vrot.lane.b32.xlu1 %v6230_v41, %s5687_s13 }
 0x102   : > { %1314 = vrot.lane.b32.xlu0 %v550_v23, %s5691_s17 }
 0x103   : > { %v6289_v62 = vpop.permute.xlu1 %960 }
 0x104   : > { %v1309_v32 = vpop.permute.xlu0 %1308 }
 0x105   : > { %1252 = vrot.lane.b32.xlu1 %v511_v6, %s5690_s16  ;;  %v1634_v11 = vsel %vm1632_vm11, %v1601_v50, %v1309_v32 }
 0x106   : > { %650 = vrot.lane.b32.xlu0 %v6233_v14, %s5684_s10  ;;  %5467 = vmatmul.mubr.msk.f32.vlgmr.msra.gmra.mrb[0].mxu0 %vm1670_vm12, %v1634_v11  ;;  %v592_v14 = vsel %vm527_vm3, %v589_v9, %v591_v37  ;;  %v307_v9 = vld [vmem:[%s5838_s9 + $0xe0] sm:$0xff]  ;;  %v1420_v11 = vsel %vm223_vm0, %v5881_v27, %v6115_v40  ;;  %v1404_v37 = vsel %vm223_vm0, %v5903_v38, %v6117_v45 }
 0x107   : > { %v6306_v31 = vpop.permute.xlu1 %1054  ;;  %340 = vst.msk [vmem:[#allocation2 + $0x169] sm:$0xff] %vm223_vm0, %v307_v9  ;;  %v1453_v19 = vsel %vm1434_vm5, %v1420_v11, %v6141_v63  ;;  %v6457_v11 = vld [vmem:[#allocation2 + $0x88] sm:$0x3] }
 0x108   : > { %v6337_v34 = vpop.permute.xlu0 %644  ;;  %v1486_v27 = vsel %vm1467_vm6, %v1453_v19, %v6171_v24 }
 0x109   : > { %1346 = vrot.lane.b32.xlu1 %v590_v28, %s5691_s17  ;;  %v1519_v63 = vsel %vm1500_vm7, %v1486_v27, %v6214_v61 }
 0x10a   : > { %936 = vrot.lane.b32.xlu0 %v471_v59, %s5687_s13  ;;  %v1552_v46 = vsel %vm1533_vm8, %v1519_v63, %v6306_v31  ;;  %v6453_v31 = vld [vmem:[#allocation2 + $0x148] sm:$0x3] }
 0x10b   : > { %v1341_v29 = vpop.permute.xlu1 %1340 }
 0x10c   : > { %v1650_v10 = vsel %vm1632_vm11, %v1617_v48, %v1341_v29  ;;  %v513_v48 = vrot.slane %v6397_v21, 1 }
 0x10d   : > { %682 = vrot.lane.b32.xlu1 %v6230_v41, %s5684_s10  ;;  %5491 = vmatmul.mubr.msk.f32.vlgmr.msra.gmra.mrb[0].mxu1 %vm1670_vm12, %v1650_v10  ;;  %v6344_v41 = vpop.permute.xlu0 %738  ;;  %v473_v10 = vrot.slane %v6399_v22, 1 }
 0x10e   : > { %1030 = vrot.lane.b32.xlu0 %v550_v23, %s5688_s14 }
 0x10f   : > { %v6335_v33 = vpop.permute.xlu1 %676 }
 0x111   : > { %968 = vrot.lane.b32.xlu1 %v511_v6, %s5687_s13  ;;  %v6352_v13 = vpop.permute.xlu0 %1024 }
 0x112   : > { %1316 = vrot.lane.b32.xlu0 %v552_v51, %s5691_s17 }
 0x113   : > { %v6342_v5 = vpop.permute.xlu1 %770 }
 0x115   : > { %1062 = vrot.lane.b32.xlu1 %v590_v28, %s5688_s14  ;;  %v1119_v52 = vpop.permute.xlu0 %1118 }
 0x116   : > { %652 = vrot.lane.b32.xlu0 %v471_v59, %s5684_s10  ;;  %v6375_v59 = vld [vmem:[#allocation2 + $0x138] sm:$0xff] }
 0x117   : > { %v6350_v12 = vpop.permute.xlu1 %1056  ;;  %v512_v26 = vrot.slane %v6375_v59, 1  ;;  %v593_v19 = vrot.slane %v6375_v59, 2 }
 0x119   : > { %1348 = vrot.lane.b32.xlu1 %v592_v14, %s5691_s17  ;;  %v6361_v49 = vpop.permute.xlu0 %740 }
 0x11a   : > { %746 = vrot.lane.b32.xlu0 %v550_v23, %s5685_s11  ;;  %v308_v23 = vld [vmem:[%s5838_s9 + $0xe8] sm:$0xff] }
 0x11b   : > { %v1151_v60 = vpop.permute.xlu1 %1150  ;;  %341 = vst.msk [vmem:[#allocation2 + $0x171] sm:$0xff] %vm223_vm0, %v308_v23 }
 0x11d   : > { %684 = vrot.lane.b32.xlu1 %v511_v6, %s5684_s10  ;;  %v6371_v6 = vpop.permute.xlu0 %834 }
 0x11e   : > { %1032 = vrot.lane.b32.xlu0 %v552_v51, %s5688_s14 }
 0x11f   : > { %v6359_v47 = vpop.permute.xlu1 %772 }
 0x121   : > { %778 = vrot.lane.b32.xlu1 %v590_v28, %s5685_s11  ;;  %v6379_v4 = vpop.permute.xlu0 %1120  ;;  %v6381_v28 = vld [vmem:[#allocation2 + $0x78] sm:$0xff] }
 0x122   : > { %1126 = vrot.lane.b32.xlu0 %v6381_v28, %s5689_s15  ;;  %v472_v32 = vrot.slane %v6381_v28, 1 }
 0x123   : > { %v6369_v3 = vpop.permute.xlu1 %866 }
 0x124   : > { %v6435_v9 = vsel %vm446_vm2, %v472_v32, %v473_v10 }
 0x125   : > { %1064 = vrot.lane.b32.xlu1 %v592_v14, %s5688_s14  ;;  %v1215_v2 = vpop.permute.xlu0 %1214 }
 0x126   : > { %748 = vrot.lane.b32.xlu0 %v552_v51, %s5685_s11  ;;  %v6428_v51 = vsel %vm446_vm2, %v512_v26, %v513_v48 }
 0x127   : > { %v6377_v30 = vpop.permute.xlu1 %1152 }
 0x129   : > { %1158 = vrot.lane.b32.xlu1 %v6375_v59, %s5689_s15  ;;  %v6395_v36 = vpop.permute.xlu0 %836 }
 0x12a   : > { %842 = vrot.lane.b32.xlu0 %v6381_v28, %s5686_s12 }
 0x12b   : > { %v1247_v58 = vpop.permute.xlu1 %1246 }
 0x12d   : > { %780 = vrot.lane.b32.xlu1 %v592_v14, %s5685_s11  ;;  %v6409_v29 = vpop.permute.xlu0 %930  ;;  %v1437_v14 = vsel %vm1434_vm5, %v1404_v37, %v6143_v0 }
 0x12e   : > { %1128 = vrot.lane.b32.xlu0 %v6399_v22, %s5689_s15  ;;  %v1470_v38 = vsel %vm1467_vm6, %v1437_v14, %v6173_v25  ;;  %v1585_v25 = vsel %vm1566_vm9, %v1552_v46, %v1151_v60  ;;  %v515_v60 = vrot.slane %v6453_v31, 1  ;;  %v594_v14 = vrot.slane %v6397_v21, 2 }
 0x12f   : > { %v6393_v18 = vpop.permute.xlu1 %868  ;;  %v1503_v0 = vsel %vm1500_vm7, %v1470_v38, %v6216_v57  ;;  %v1618_v61 = vsel %vm1599_vm10, %v1585_v25, %v1247_v58  ;;  %v554_v46 = vrot.slane %v6399_v22, 2 }
 0x130   : > { %v1536_v24 = vsel %vm1533_vm8, %v1503_v0, %v6308_v20  ;;  %v516_v37 = vsel %vm446_vm2, %v513_v48, %v515_v60  ;;  %v553_v0 = vrot.slane %v6381_v28, 2  ;;  %v595_v28 = vsel %vm527_vm3, %v593_v19, %v594_v14 }
 0x131   : > { %874 = vrot.lane.b32.xlu1 %v6375_v59, %s5686_s12  ;;  %v1217_v45 = vpop.permute.xlu0 %1216  ;;  %v1569_v23 = vsel %vm1566_vm9, %v1536_v24, %v1119_v52  ;;  %v1421_v24 = vsel %vm223_vm0, %v5916_v43, %v6135_v53  ;;  %v1405_v59 = vsel %vm223_vm0, %v5918_v44, %v6137_v54 }
 0x132   : > { %1222 = vrot.lane.b32.xlu0 %v6435_v9, %s5690_s16  ;;  %v1602_v57 = vsel %vm1599_vm10, %v1569_v23, %v1215_v2  ;;  %v475_v2 = vrot.slane %v6457_v11, 1  ;;  %v1438_v48 = vsel %vm1434_vm5, %v1405_v59, %v6163_v17  ;;  %v555_v54 = vsel %vm527_vm3, %v553_v0, %v554_v46 }
 0x133   : > { %v6407_v50 = vpop.permute.xlu1 %962  ;;  %v1471_v43 = vsel %vm1467_vm6, %v1438_v48, %v6197_v56 }
 0x134   : > { %v476_v63 = vsel %vm446_vm2, %v473_v10, %v475_v2  ;;  %v1504_v17 = vsel %vm1500_vm7, %v1471_v43, %v6291_v15  ;;  %v309_v2 = vld [vmem:[%s5838_s9 + $0xf0] sm:$0xff]  ;;  %v6591_v43 = vld [vmem:[#allocation2 + $0x98] sm:$0xff] }
 0x135   : > { %1160 = vrot.lane.b32.xlu1 %v6397_v21, %s5689_s15  ;;  %v1311_v26 = vpop.permute.xlu0 %1310  ;;  %342 = vst.msk [vmem:[#allocation2 + $0x181] sm:$0xff] %vm223_vm0, %v309_v2  ;;  %v6648_v2 = vld [vmem:[#allocation2 + $0xa0] sm:$0x3] }
 0x136   : > { %v1635_v32 = vsel %vm1632_vm11, %v1602_v57, %v1311_v26  ;;  %844 = vrot.lane.b32.xlu0 %v6399_v22, %s5686_s12  ;;  %v556_v57 = vrot.slane %v6457_v11, 2 }
 0x137   : > { %v1249_v40 = vpop.permute.xlu1 %1248  ;;  %5469 = vmatprep.mubr.msk.f32.mxu0 %vm1670_vm12, %v1635_v32 }
 0x139   : > { %1254 = vrot.lane.b32.xlu1 %v6428_v51, %s5690_s16  ;;  %v6468_v58 = vpop.permute.xlu0 %646 }
 0x13a   : > { %938 = vrot.lane.b32.xlu0 %v6435_v9, %s5687_s13 }
 0x13b   : > { %v1343_v1 = vpop.permute.xlu1 %1342 }
 0x13c   : > { %v1651_v20 = vsel %vm1632_vm11, %v1618_v61, %v1343_v1 }
 0x13d   : > { %876 = vrot.lane.b32.xlu1 %v6397_v21, %s5686_s12  ;;  %5493 = vmatprep.mubr.msk.f32.mxu1 %vm1670_vm12, %v1651_v20  ;;  %v6480_v38 = vpop.permute.xlu0 %932  ;;  %v1454_v21 = vsel %vm1434_vm5, %v1421_v24, %v6161_v16  ;;  %v557_v20 = vsel %vm527_vm3, %v554_v46, %v556_v57  ;;  %v6575_v46 = vld [vmem:[#allocation2 + $0x90] sm:$0xff] }
 0x13e   : > { %1224 = vrot.lane.b32.xlu0 %v476_v63, %s5690_s16  ;;  %v1487_v22 = vsel %vm1467_vm6, %v1454_v21, %v6195_v55  ;;  %v1537_v55 = vsel %vm1533_vm8, %v1504_v17, %v6352_v13  ;;  %v310_v21 = vld [vmem:[%s5838_s9 + $0xf8] sm:$0xff] }
 0x13f   : > { %v6466_v52 = vpop.permute.xlu1 %678  ;;  %v1520_v16 = vsel %vm1500_vm7, %v1487_v22, %v6289_v62  ;;  %v1570_v25 = vsel %vm1566_vm9, %v1537_v55, %v6379_v4  ;;  %343 = vst.msk [vmem:[#allocation2 + $0x189] sm:$0xff] %vm223_vm0, %v310_v21  ;;  %v478_v55 = vrot.slane %v6591_v43, 1 }
 0x140   : > { %v1553_v10 = vsel %vm1533_vm8, %v1520_v16, %v6350_v12  ;;  %v1603_v15 = vsel %vm1599_vm10, %v1570_v25, %v1217_v45  ;;  %v1422_v25 = vsel %vm223_vm0, %v5977_v7, %v6271_v35 }
 0x141   : > { %970 = vrot.lane.b32.xlu1 %v6428_v51, %s5687_s13  ;;  %v6504_v44 = vpop.permute.xlu0 %1026  ;;  %v1586_v56 = vsel %vm1566_vm9, %v1553_v10, %v6377_v30  ;;  %v477_v10 = vrot.slane %v6575_v46, 1 }
 0x142   : > { %1318 = vrot.lane.b32.xlu0 %v555_v54, %s5691_s17  ;;  %v1619_v62 = vsel %vm1599_vm10, %v1586_v56, %v1249_v40  ;;  %v596_v40 = vrot.slane %v6453_v31, 2 }
 0x143   : > { %v6478_v27 = vpop.permute.xlu1 %964 }
 0x145   : > { %1256 = vrot.lane.b32.xlu1 %v516_v37, %s5690_s16  ;;  %v1313_v61 = vpop.permute.xlu0 %1312 }
 0x146   : > { %v1636_v13 = vsel %vm1632_vm11, %v1603_v15, %v1313_v61  ;;  %654 = vrot.lane.b32.xlu0 %v6435_v9, %s5684_s10  ;;  %v597_v9 = vsel %vm527_vm3, %v594_v14, %v596_v40  ;;  %v1455_v15 = vsel %vm1434_vm5, %v1422_v25, %v6342_v5 }
 0x147   : > { %v6502_v53 = vpop.permute.xlu1 %1058  ;;  %5470 = vmatmul.mubr.msk.f32.gmra.mrb[2].mxu0 %vm1670_vm12, %v1636_v13  ;;  %v1488_v7 = vsel %vm1467_vm6, %v1455_v15, %v6369_v3  ;;  %v558_v15 = vrot.slane %v6575_v46, 2 }
 0x149   : > { %1350 = vrot.lane.b32.xlu1 %v595_v28, %s5691_s17  ;;  %v6533_v4 = vpop.permute.xlu0 %648 }
 0x14a   : > { %940 = vrot.lane.b32.xlu0 %v476_v63, %s5687_s13 }
 0x14b   : > { %v1345_v23 = vpop.permute.xlu1 %1344 }
 0x14c   : > { %v1652_v12 = vsel %vm1632_vm11, %v1619_v62, %v1345_v23  ;;  %v1406_v62 = vsel %vm223_vm0, %v5979_v8, %v6273_v39  ;;  %v1521_v39 = vsel %vm1500_vm7, %v1488_v7, %v6407_v50 }
 0x14d   : > { %686 = vrot.lane.b32.xlu1 %v6428_v51, %s5684_s10  ;;  %5494 = vmatmul.mubr.msk.f32.gmra.mrb[2].mxu1 %vm1670_vm12, %v1652_v12  ;;  %v6540_v51 = vpop.permute.xlu0 %742  ;;  %v1439_v61 = vsel %vm1434_vm5, %v1406_v62, %v6344_v41  ;;  %v6625_v12 = vsel %vm446_vm2, %v477_v10, %v478_v55  ;;  %v1554_v41 = vsel %vm1533_vm8, %v1521_v39, %v6502_v53 }
 0x14e   : > { %1034 = vrot.lane.b32.xlu0 %v555_v54, %s5688_s14  ;;  %v1472_v8 = vsel %vm1467_vm6, %v1439_v61, %v6371_v6  ;;  %v559_v61 = vrot.slane %v6591_v43, 2 }
 0x14f   : > { %v6531_v30 = vpop.permute.xlu1 %680  ;;  %v1505_v13 = vsel %vm1500_vm7, %v1472_v8, %v6409_v29  ;;  %v6644_v29 = vld [vmem:[#allocation2 + $0x160] sm:$0x3]  ;;  %v5600_v8 = vld [vmem:[#allocation2 + $0xf8] sm:$0xff] }
 0x150   : > { %v1538_v3 = vsel %vm1533_vm8, %v1505_v13, %v6504_v44  ;;  %v1423_v39 = vsel %vm223_vm0, %v5600_v8, %v6335_v33 }
 0x151   : > { %972 = vrot.lane.b32.xlu1 %v516_v37, %s5687_s13  ;;  %v6548_v26 = vpop.permute.xlu0 %1028 }
 0x152   : > { %1320 = vrot.lane.b32.xlu0 %v557_v20, %s5691_s17 }
 0x153   : > { %v6538_v45 = vpop.permute.xlu1 %774 }
 0x155   : > { %1066 = vrot.lane.b32.xlu1 %v595_v28, %s5688_s14  ;;  %v1123_v32 = vpop.permute.xlu0 %1122 }
 0x156   : > { %656 = vrot.lane.b32.xlu0 %v476_v63, %s5684_s10  ;;  %v1571_v6 = vsel %vm1566_vm9, %v1538_v3, %v1123_v32 }
 0x157   : > { %v6546_v1 = vpop.permute.xlu1 %1060 }
 0x159   : > { %1352 = vrot.lane.b32.xlu1 %v597_v9, %s5691_s17  ;;  %v6557_v60 = vpop.permute.xlu0 %744 }
 0x15a   : > { %750 = vrot.lane.b32.xlu0 %v555_v54, %s5685_s11 }
 0x15b   : > { %v1155_v31 = vpop.permute.xlu1 %1154 }
 0x15c   : > { %v1587_v40 = vsel %vm1566_vm9, %v1554_v41, %v1155_v31  ;;  %v520_v31 = vrot.slane %v6644_v29, 1  ;;  %v1456_v41 = vsel %vm1434_vm5, %v1423_v39, %v6359_v47  ;;  %v6757_v39 = vld [vmem:[#allocation2 + $0x168] sm:$0xff] }
 0x15d   : > { %688 = vrot.lane.b32.xlu1 %v516_v37, %s5684_s10  ;;  %v6565_v14 = vpop.permute.xlu0 %838  ;;  %v6569_v37 = vld [vmem:[#allocation2 + $0x150] sm:$0xff] }
 0x15e   : > { %1036 = vrot.lane.b32.xlu0 %v557_v20, %s5688_s14  ;;  %v517_v54 = vrot.slane %v6569_v37, 1 }
 0x15f   : > { %v6555_v11 = vpop.permute.xlu1 %776 }
 0x161   : > { %782 = vrot.lane.b32.xlu1 %v595_v28, %s5685_s11  ;;  %v6573_v0 = vpop.permute.xlu0 %1124  ;;  %v6587_v28 = vld [vmem:[#allocation2 + $0x158] sm:$0xff] }
 0x162   : > { %1130 = vrot.lane.b32.xlu0 %v6575_v46, %s5689_s15  ;;  %v518_v16 = vrot.slane %v6587_v28, 1  ;;  %v599_v10 = vrot.slane %v6587_v28, 2 }
 0x163   : > { %v6563_v19 = vpop.permute.xlu1 %870 }
 0x164   : > { %v6618_v23 = vsel %vm446_vm2, %v517_v54, %v518_v16  ;;  %v521_v21 = vsel %vm446_vm2, %v518_v16, %v520_v31  ;;  %v598_v54 = vrot.slane %v6569_v37, 2  ;;  %v5601_v16 = vld [vmem:[#allocation2 + $0x38] sm:$0xff] }
 0x165   : > { %1068 = vrot.lane.b32.xlu1 %v597_v9, %s5688_s14  ;;  %v1219_v59 = vpop.permute.xlu0 %1218  ;;  %v1407_v13 = vsel %vm223_vm0, %v5601_v16, %v6337_v34 }
 0x166   : > { %752 = vrot.lane.b32.xlu0 %v557_v20, %s5685_s11  ;;  %v1604_v53 = vsel %vm1599_vm10, %v1571_v6, %v1219_v59  ;;  %v1440_v3 = vsel %vm1434_vm5, %v1407_v13, %v6361_v49  ;;  %v560_v6 = vsel %vm527_vm3, %v558_v15, %v559_v61 }
 0x167   : > { %v6571_v63 = vpop.permute.xlu1 %1156  ;;  %v1473_v34 = vsel %vm1467_vm6, %v1440_v3, %v6395_v36  ;;  %v6773_v3 = vld [vmem:[#allocation2 + $0x170] sm:$0xff] }
 0x168   : > { %9085 = vst [vmem:[#allocation13_spill] sm:$0xff] %v6773_v3 }
 0x169   : > { %1162 = vrot.lane.b32.xlu1 %v6569_v37, %s5689_s15  ;;  %v6589_v22 = vpop.permute.xlu0 %840 }
 0x16a   : > { %846 = vrot.lane.b32.xlu0 %v6575_v46, %s5686_s12 }
 0x16b   : > { %v1251_v24 = vpop.permute.xlu1 %1250 }
 0x16c   : > { %v1620_v50 = vsel %vm1599_vm10, %v1587_v40, %v1251_v24  ;;  %v480_v24 = vrot.slane %v6648_v2, 1  ;;  %v1489_v40 = vsel %vm1467_vm6, %v1456_v41, %v6393_v18 }
 0x16d   : > { %784 = vrot.lane.b32.xlu1 %v597_v9, %s5685_s11  ;;  %v6603_v56 = vpop.permute.xlu0 %934  ;;  %v1522_v47 = vsel %vm1500_vm7, %v1489_v40, %v6478_v27 }
 0x16e   : > { %1132 = vrot.lane.b32.xlu0 %v6591_v43, %s5689_s15  ;;  %v481_v62 = vsel %vm446_vm2, %v478_v55, %v480_v24  ;;  %v600_v55 = vsel %vm527_vm3, %v598_v54, %v599_v10  ;;  %v1555_v49 = vsel %vm1533_vm8, %v1522_v47, %v6546_v1  ;;  %v523_v47 = vrot.slane %v6773_v3, 1 }
 0x16f   : > { %v6585_v48 = vpop.permute.xlu1 %872 }
 0x171   : > { %878 = vrot.lane.b32.xlu1 %v6569_v37, %s5686_s12  ;;  %v1221_v5 = vpop.permute.xlu0 %1220 }
 0x172   : > { %1226 = vrot.lane.b32.xlu0 %v6625_v12, %s5690_s16 }
 0x173   : > { %v6599_v17 = vpop.permute.xlu1 %966 }
 0x175   : > { %1164 = vrot.lane.b32.xlu1 %v6587_v28, %s5689_s15  ;;  %v1315_v20 = vpop.permute.xlu0 %1314 }
 0x176   : > { %v1637_v44 = vsel %vm1632_vm11, %v1604_v53, %v1315_v20  ;;  %848 = vrot.lane.b32.xlu0 %v6591_v43, %s5686_s12  ;;  %v1588_v53 = vsel %vm1566_vm9, %v1555_v49, %v6571_v63 }
 0x177   : > { %v1253_v35 = vpop.permute.xlu1 %1252  ;;  %5472 = vmatprep.mubr.msk.f32.mxu0 %vm1670_vm12, %v1637_v44 }
 0x178   : > { %v1621_v27 = vsel %vm1599_vm10, %v1588_v53, %v1253_v35 }
 0x179   : > { %1258 = vrot.lane.b32.xlu1 %v6618_v23, %s5690_s16  ;;  %v6661_v59 = vpop.permute.xlu0 %650 }
 0x17a   : > { %942 = vrot.lane.b32.xlu0 %v6625_v12, %s5687_s13 }
 0x17b   : > { %v1347_v57 = vpop.permute.xlu1 %1346 }
 0x17c   : > { %v1653_v9 = vsel %vm1632_vm11, %v1620_v50, %v1347_v57  ;;  %v1506_v57 = vsel %vm1500_vm7, %v1473_v34, %v6480_v38  ;;  %v522_v34 = vrot.slane %v6757_v39, 1 }
 0x17d   : > { %880 = vrot.lane.b32.xlu1 %v6587_v28, %s5686_s12  ;;  %5496 = vmatprep.mubr.msk.f32.mxu1 %vm1670_vm12, %v1653_v9  ;;  %v6675_v7 = vpop.permute.xlu0 %936  ;;  %v1539_v18 = vsel %vm1533_vm8, %v1506_v57, %v6548_v26 }
 0x17e   : > { %1228 = vrot.lane.b32.xlu0 %v481_v62, %s5690_s16  ;;  %v1572_v36 = vsel %vm1566_vm9, %v1539_v18, %v6573_v0  ;;  %v601_v0 = vrot.slane %v6644_v29, 2 }
 0x17f   : > { %v6658_v32 = vpop.permute.xlu1 %682  ;;  %v1605_v38 = vsel %vm1599_vm10, %v1572_v36, %v1221_v5  ;;  %v5602_v36 = vld [vmem:[#allocation2 + $0x108] sm:$0xff] }
 0x181   : > { %974 = vrot.lane.b32.xlu1 %v6618_v23, %s5687_s13  ;;  %v6697_v50 = vpop.permute.xlu0 %1030 }
 0x182   : > { %1322 = vrot.lane.b32.xlu0 %v560_v6, %s5691_s17 }
 0x183   : > { %v6670_v25 = vpop.permute.xlu1 %968 }
 0x185   : > { %1260 = vrot.lane.b32.xlu1 %v521_v21, %s5690_s16  ;;  %v1317_v20 = vpop.permute.xlu0 %1316 }
 0x186   : > { %v1638_v44 = vsel %vm1632_vm11, %v1605_v38, %v1317_v20  ;;  %658 = vrot.lane.b32.xlu0 %v6625_v12, %s5684_s10  ;;  %v602_v12 = vsel %vm527_vm3, %v599_v10, %v601_v0  ;;  %v6802_v20 = vsel %vm446_vm2, %v522_v34, %v523_v47 }
 0x187   : > { %v6690_v33 = vpop.permute.xlu1 %1062  ;;  %5473 = vmatmul.mubr.msk.f32.gmra.mrb[4].mxu0 %vm1670_vm12, %v1638_v44 }
 0x189   : > { %1354 = vrot.lane.b32.xlu1 %v600_v55, %s5691_s17  ;;  %v6723_v63 = vpop.permute.xlu0 %652 }
 0x18a   : > { %944 = vrot.lane.b32.xlu0 %v481_v62, %s5687_s13 }
 0x18b   : > { %v1349_v9 = vpop.permute.xlu1 %1348 }
 0x18c   : > { %v1654_v1 = vsel %vm1632_vm11, %v1621_v27, %v1349_v9  ;;  %v1424_v27 = vsel %vm223_vm0, %v5602_v36, %v6466_v52  ;;  %v5603_v9 = vld [vmem:[#allocation2 + $0x48] sm:$0xff] }
 0x18d   : > { %690 = vrot.lane.b32.xlu1 %v6618_v23, %s5684_s10  ;;  %5497 = vmatmul.mubr.msk.f32.gmra.mrb[4].mxu1 %vm1670_vm12, %v1654_v1  ;;  %v561_v23 = vrot.slane %v6648_v2, 2  ;;  %v6731_v5 = vpop.permute.xlu0 %746  ;;  %v1408_v38 = vsel %vm223_vm0, %v5603_v9, %v6468_v58  ;;  %v1457_v1 = vsel %vm1434_vm5, %v1424_v27, %v6538_v45  ;;  %v6832_v9 = vld [vmem:[#allocation2 + $0xb8] sm:$0x3] }
 0x18e   : > { %1038 = vrot.lane.b32.xlu0 %v560_v6, %s5688_s14  ;;  %v1441_v44 = vsel %vm1434_vm5, %v1408_v38, %v6540_v51  ;;  %v1490_v52 = vsel %vm1467_vm6, %v1457_v1, %v6563_v19  ;;  %v603_v1 = vrot.slane %v6757_v39, 2 }
 0x18f   : > { %v6721_v26 = vpop.permute.xlu1 %684  ;;  %v562_v24 = vsel %vm527_vm3, %v559_v61, %v561_v23  ;;  %v1474_v58 = vsel %vm1467_vm6, %v1441_v44, %v6565_v14  ;;  %v1523_v45 = vsel %vm1500_vm7, %v1490_v52, %v6599_v17  ;;  %v604_v44 = vrot.slane %v6773_v3, 2 }
 0x190   : > { %v1556_v51 = vsel %vm1533_vm8, %v1523_v45, %v6690_v33 }
 0x191   : > { %976 = vrot.lane.b32.xlu1 %v521_v21, %s5687_s13  ;;  %v6739_v54 = vpop.permute.xlu0 %1032 }
 0x192   : > { %1324 = vrot.lane.b32.xlu0 %v562_v24, %s5691_s17 }
 0x193   : > { %v6728_v35 = vpop.permute.xlu1 %778 }
 0x195   : > { %1070 = vrot.lane.b32.xlu1 %v600_v55, %s5688_s14  ;;  %v1127_v2 = vpop.permute.xlu0 %1126 }
 0x196   : > { %660 = vrot.lane.b32.xlu0 %v481_v62, %s5684_s10  ;;  %v6761_v62 = vld [vmem:[#allocation2 + $0xa8] sm:$0xff] }
 0x197   : > { %v6736_v31 = vpop.permute.xlu1 %1064  ;;  %v482_v49 = vrot.slane %v6761_v62, 1  ;;  %v563_v45 = vrot.slane %v6761_v62, 2 }
 0x199   : > { %1356 = vrot.lane.b32.xlu1 %v602_v12, %s5691_s17  ;;  %v6747_v8 = vpop.permute.xlu0 %748 }
 0x19a   : > { %754 = vrot.lane.b32.xlu0 %v560_v6, %s5685_s11  ;;  %v6777_v6 = vld [vmem:[#allocation2 + $0xb0] sm:$0xff] }
 0x19b   : > { %v1159_v29 = vpop.permute.xlu1 %1158  ;;  %9086 = vst [vmem:[#allocation14_spill] sm:$0xff] %v6777_v6  ;;  %v483_v18 = vrot.slane %v6777_v6, 1 }
 0x19c   : > { %v1589_v34 = vsel %vm1566_vm9, %v1556_v51, %v1159_v29 }
 0x19d   : > { %692 = vrot.lane.b32.xlu1 %v521_v21, %s5684_s10  ;;  %v6753_v61 = vpop.permute.xlu0 %842  ;;  %v6809_v23 = vsel %vm446_vm2, %v482_v49, %v483_v18 }
 0x19e   : > { %1040 = vrot.lane.b32.xlu0 %v562_v24, %s5688_s14 }
 0x19f   : > { %v6745_v15 = vpop.permute.xlu1 %780 }
 0x1a1   : > { %786 = vrot.lane.b32.xlu1 %v600_v55, %s5685_s11  ;;  %v6763_v16 = vpop.permute.xlu0 %1128 }
 0x1a2   : > { %1134 = vrot.lane.b32.xlu0 %v6761_v62, %s5689_s15 }
 0x1a3   : > { %v6751_v10 = vpop.permute.xlu1 %874 }
 0x1a5   : > { %1072 = vrot.lane.b32.xlu1 %v602_v12, %s5688_s14  ;;  %v1223_v41 = vpop.permute.xlu0 %1222 }
 0x1a6   : > { %756 = vrot.lane.b32.xlu0 %v562_v24, %s5685_s11  ;;  %v1507_v24 = vsel %vm1500_vm7, %v1474_v58, %v6603_v56  ;;  %v6828_v56 = vld [vmem:[#allocation2 + $0x178] sm:$0x3] }
 0x1a7   : > { %v6759_v21 = vpop.permute.xlu1 %1160  ;;  %v1540_v19 = vsel %vm1533_vm8, %v1507_v24, %v6697_v50  ;;  %v525_v29 = vrot.slane %v6828_v56, 1  ;;  %v564_v24 = vrot.slane %v6777_v6, 2 }
 0x1a8   : > { %v1573_v14 = vsel %vm1566_vm9, %v1540_v19, %v1127_v2  ;;  %v5604_v19 = vld [vmem:[#allocation2 + $0x110] sm:$0xff] }
 0x1a9   : > { %1166 = vrot.lane.b32.xlu1 %v6757_v39, %s5689_s15  ;;  %v6775_v40 = vpop.permute.xlu0 %844  ;;  %v1606_v33 = vsel %vm1599_vm10, %v1573_v14, %v1223_v41  ;;  %v526_v38 = vsel %vm446_vm2, %v523_v47, %v525_v29  ;;  %v5605_v47 = vld [vmem:[#allocation2 + $0x50] sm:$0xff] }
 0x1aa   : > { %850 = vrot.lane.b32.xlu0 %v6761_v62, %s5686_s12  ;;  %v1409_v14 = vsel %vm223_vm0, %v5605_v47, %v6533_v4 }
 0x1ab   : > { %v1255_v13 = vpop.permute.xlu1 %1254 }
 0x1ac   : > { %v1622_v17 = vsel %vm1599_vm10, %v1589_v34, %v1255_v13  ;;  %v485_v13 = vrot.slane %v6832_v9, 1  ;;  %v1425_v34 = vsel %vm223_vm0, %v5604_v19, %v6531_v30 }
 0x1ad   : > { %788 = vrot.lane.b32.xlu1 %v602_v12, %s5685_s11  ;;  %v6789_v53 = vpop.permute.xlu0 %938 }
 0x1ae   : > { %1136 = vrot.lane.b32.xlu0 %v6777_v6, %s5689_s15  ;;  %v486_v58 = vsel %vm446_vm2, %v483_v18, %v485_v13  ;;  %v605_v18 = vsel %vm527_vm3, %v603_v1, %v604_v44 }
 0x1af   : > { %v6771_v55 = vpop.permute.xlu1 %876 }
 0x1b1   : > { %882 = vrot.lane.b32.xlu1 %v6757_v39, %s5686_s12  ;;  %v1225_v12 = vpop.permute.xlu0 %1224 }
 0x1b2   : > { %1230 = vrot.lane.b32.xlu0 %v6809_v23, %s5690_s16 }
 0x1b3   : > { %v6785_v57 = vpop.permute.xlu1 %970 }
 0x1b5   : > { %1168 = vrot.lane.b32.xlu1 %v6773_v3, %s5689_s15  ;;  %v1319_v27 = vpop.permute.xlu0 %1318 }
 0x1b6   : > { %v1639_v50 = vsel %vm1632_vm11, %v1606_v33, %v1319_v27  ;;  %852 = vrot.lane.b32.xlu0 %v6777_v6, %s5686_s12 }
 0x1b7   : > { %v1257_v0 = vpop.permute.xlu1 %1256  ;;  %5475 = vmatprep.mubr.msk.f32.mxu0 %vm1670_vm12, %v1639_v50 }
 0x1b9   : > { %1262 = vrot.lane.b32.xlu1 %v6802_v20, %s5690_s16  ;;  %v6845_v41 = vpop.permute.xlu0 %654 }
 0x1ba   : > { %946 = vrot.lane.b32.xlu0 %v6809_v23, %s5687_s13 }
 0x1bb   : > { %v1351_v49 = vpop.permute.xlu1 %1350 }
 0x1bc   : > { %v1655_v36 = vsel %vm1632_vm11, %v1622_v17, %v1351_v49  ;;  %v1458_v17 = vsel %vm1434_vm5, %v1425_v34, %v6555_v11  ;;  %v1442_v49 = vsel %vm1434_vm5, %v1409_v14, %v6557_v60 }
 0x1bd   : > { %884 = vrot.lane.b32.xlu1 %v6773_v3, %s5686_s12  ;;  %5499 = vmatprep.mubr.msk.f32.mxu1 %vm1670_vm12, %v1655_v36  ;;  %v6859_v51 = vpop.permute.xlu0 %940  ;;  %v1491_v33 = vsel %vm1467_vm6, %v1458_v17, %v6585_v48  ;;  %v565_v36 = vsel %vm527_vm3, %v563_v45, %v564_v24  ;;  %v1475_v4 = vsel %vm1467_vm6, %v1442_v49, %v6589_v22 }
 0x1be   : > { %1232 = vrot.lane.b32.xlu0 %v486_v58, %s5690_s16  ;;  %v1524_v11 = vsel %vm1500_vm7, %v1491_v33, %v6670_v25  ;;  %v1508_v50 = vsel %vm1500_vm7, %v1475_v4, %v6675_v7 }
 0x1bf   : > { %v6842_v2 = vpop.permute.xlu1 %686  ;;  %v1557_v60 = vsel %vm1533_vm8, %v1524_v11, %v6736_v31  ;;  %v1541_v48 = vsel %vm1533_vm8, %v1508_v50, %v6739_v54 }
 0x1c0   : > { %v1590_v29 = vsel %vm1566_vm9, %v1557_v60, %v6759_v21  ;;  %v1574_v22 = vsel %vm1566_vm9, %v1541_v48, %v6763_v16  ;;  %v606_v16 = vrot.slane %v6828_v56, 2 }
 0x1c1   : > { %978 = vrot.lane.b32.xlu1 %v6802_v20, %s5687_s13  ;;  %v6881_v27 = vpop.permute.xlu0 %1034  ;;  %v1623_v25 = vsel %vm1599_vm10, %v1590_v29, %v1257_v0  ;;  %v1607_v7 = vsel %vm1599_vm10, %v1574_v22, %v1225_v12  ;;  %v6962_v29 = vld [vmem:[#allocation2 + $0x188] sm:$0xff] }
 0x1c2   : > { %1326 = vrot.lane.b32.xlu0 %v565_v36, %s5691_s17 }
 0x1c3   : > { %v6854_v52 = vpop.permute.xlu1 %972 }
 0x1c5   : > { %1264 = vrot.lane.b32.xlu1 %v526_v38, %s5690_s16  ;;  %v1321_v1 = vpop.permute.xlu0 %1320 }
 0x1c6   : > { %v1640_v45 = vsel %vm1632_vm11, %v1607_v7, %v1321_v1  ;;  %662 = vrot.lane.b32.xlu0 %v6809_v23, %s5684_s10  ;;  %v607_v23 = vsel %vm527_vm3, %v604_v44, %v606_v16  ;;  %v5607_v1 = vld [vmem:[#allocation2 + $0x120] sm:$0xff] }
 0x1c7   : > { %v6874_v30 = vpop.permute.xlu1 %1066  ;;  %5476 = vmatmul.mubr.msk.f32.gmra.mrb[6].mxu0 %vm1670_vm12, %v1640_v45  ;;  %v1426_v45 = vsel %vm223_vm0, %v5607_v1, %v6658_v32  ;;  %v5608_v16 = vld [vmem:[#allocation2 + $0x60] sm:$0xff] }
 0x1c9   : > { %1358 = vrot.lane.b32.xlu1 %v605_v18, %s5691_s17  ;;  %v6907_v21 = vpop.permute.xlu0 %656 }
 0x1ca   : > { %948 = vrot.lane.b32.xlu0 %v486_v58, %s5687_s13 }
 0x1cb   : > { %v1353_v13 = vpop.permute.xlu1 %1352 }
 0x1cc   : > { %v1656_v31 = vsel %vm1632_vm11, %v1623_v25, %v1353_v13  ;;  %v612_v13 = vrot.slane %v6962_v29, 1 }
 0x1cd   : > { %694 = vrot.lane.b32.xlu1 %v6802_v20, %s5684_s10  ;;  %5500 = vmatmul.mubr.msk.f32.gmra.mrb[6].mxu1 %vm1670_vm12, %v1656_v31  ;;  %v566_v20 = vrot.slane %v6832_v9, 2  ;;  %v6915_v12 = vpop.permute.xlu0 %750 }
 0x1ce   : > { %1042 = vrot.lane.b32.xlu0 %v565_v36, %s5688_s14 }
 0x1cf   : > { %v6905_v54 = vpop.permute.xlu1 %688  ;;  %v567_v34 = vsel %vm527_vm3, %v564_v24, %v566_v20  ;;  %v1410_v20 = vsel %vm223_vm0, %v5608_v16, %v6661_v59 }
 0x1d0   : > { %v1443_v6 = vsel %vm1434_vm5, %v1410_v20, %v6731_v5 }
 0x1d1   : > { %980 = vrot.lane.b32.xlu1 %v526_v38, %s5687_s13  ;;  %v6923_v47 = vpop.permute.xlu0 %1036  ;;  %v1476_v3 = vsel %vm1467_vm6, %v1443_v6, %v6753_v61 }
 0x1d2   : > { %1328 = vrot.lane.b32.xlu0 %v567_v34, %s5691_s17 }
 0x1d3   : > { %v6912_v0 = vpop.permute.xlu1 %782 }
 0x1d5   : > { %1074 = vrot.lane.b32.xlu1 %v605_v18, %s5688_s14  ;;  %v1131_v9 = vpop.permute.xlu0 %1130 }
 0x1d6   : > { %664 = vrot.lane.b32.xlu0 %v486_v58, %s5684_s10  ;;  %v6949_v58 = vld [vmem:[#allocation2 + $0x180] sm:$0xff] }
 0x1d7   : > { %v6920_v19 = vpop.permute.xlu1 %1068  ;;  %v611_v25 = vrot.slane %v6949_v58, 1 }
 0x1d9   : > { %1360 = vrot.lane.b32.xlu1 %v607_v23, %s5691_s17  ;;  %v6931_v17 = vpop.permute.xlu0 %752  ;;  %v6935_v49 = vpop.f32.mrb[0].mxu0 }
 0x1da   : > { %v6940_v33 = vpop.f32.mrb[1].mxu0  ;;  %758 = vrot.lane.b32.xlu0 %v565_v36, %s5685_s11 }
 0x1db   : > { %v1163_v56 = vpop.permute.xlu1 %1162 }
 0x1dd   : > { %696 = vrot.lane.b32.xlu1 %v526_v38, %s5684_s10  ;;  %v6945_v38 = vpop.permute.xlu0 %846 }
 0x1de   : > { %1044 = vrot.lane.b32.xlu0 %v567_v34, %s5688_s14 }
 0x1df   : > { %v6929_v14 = vpop.permute.xlu1 %784 }
 0x1e0   : > { %v6933_v44 = vpop.f32.mrb[0].mxu1 }
 0x1e1   : > { %790 = vrot.lane.b32.xlu1 %v605_v18, %s5685_s11  ;;  %v6938_v24 = vpop.f32.mrb[1].mxu1  ;;  %v6953_v50 = vpop.permute.xlu0 %1132  ;;  %v5606_v18 = vld [vmem:[#allocation2 + $0xc0] sm:$0xff] }
 0x1e2   : > { %1138 = vrot.lane.b32.xlu0 %v5606_v18, %s5689_s15 }
 0x1e3   : > { %v6943_v4 = vpop.permute.xlu1 %878 }
 0x1e5   : > { %1076 = vrot.lane.b32.xlu1 %v607_v23, %s5688_s14  ;;  %v1227_v60 = vpop.permute.xlu0 %1226 }
 0x1e6   : > { %760 = vrot.lane.b32.xlu0 %v567_v34, %s5685_s11  ;;  %v5609_v34 = vld [vmem:[#allocation2 + $0xc8] sm:$0xff] }
 0x1e7   : > { %v6951_v11 = vpop.permute.xlu1 %1164 }
 0x1e9   : > { %1170 = vrot.lane.b32.xlu1 %v6949_v58, %s5689_s15  ;;  %v6964_v22 = vpop.permute.xlu0 %848 }
 0x1ea   : > { %854 = vrot.lane.b32.xlu0 %v5606_v18, %s5686_s12  ;;  %v613_v18 = vsel %vm446_vm2, %v611_v25, %v612_v13 }
 0x1eb   : > { %v1259_v36 = vpop.permute.xlu1 %1258 }
 0x1ed   : > { %792 = vrot.lane.b32.xlu1 %v607_v23, %s5685_s11  ;;  %v6973_v31 = vpop.permute.xlu0 %942  ;;  %v1459_v23 = vsel %vm1434_vm5, %v1426_v45, %v6728_v35  ;;  %v1509_v35 = vsel %vm1500_vm7, %v1476_v3, %v6789_v53  ;;  %v394_v45 = vld [vmem:[#allocation2 + $0x190] sm:$0x3]  ;;  %s5224_s11 = scalar_lea.sflag [#allocation4], %s215_s6 }
 0x1ee   : > { %1140 = vrot.lane.b32.xlu0 %v5609_v34, %s5689_s15  ;;  %v1492_v32 = vsel %vm1467_vm6, %v1459_v23, %v6751_v10  ;;  %v1542_v5 = vsel %vm1533_vm8, %v1509_v35, %v6881_v27  ;;  %v614_v27 = vrot.slane %v394_v45, 1 }
 0x1ef   : > { %v6960_v48 = vpop.permute.xlu1 %880  ;;  %v1525_v59 = vsel %vm1500_vm7, %v1492_v32, %v6785_v57  ;;  %v1575_v61 = vsel %vm1566_vm9, %v1542_v5, %v1131_v9 }
 0x1f0   : > { %v1558_v25 = vsel %vm1533_vm8, %v1525_v59, %v6874_v30  ;;  %v1608_v3 = vsel %vm1599_vm10, %v1575_v61, %v1227_v60  ;;  %v617_v60 = vrot.slane %v6962_v29, 2  ;;  %v615_v23 = vsel %vm446_vm2, %v612_v13, %v614_v27  ;;  %v5610_v59 = vld [vmem:[#allocation2 + $0x128] sm:$0xff]  ;;  %v9089_v27 = vld [vmem:[#allocation8_spill] sm:$0xff] }
 0x1f1   : > { %886 = vrot.lane.b32.xlu1 %v6949_v58, %s5686_s12  ;;  %v1229_v16 = vpop.permute.xlu0 %1228  ;;  %v1591_v10 = vsel %vm1566_vm9, %v1558_v25, %v1163_v56  ;;  %v1427_v35 = vsel %vm223_vm0, %v5610_v59, %v6721_v26  ;;  %v2071_v59 = vlaneseq }
 0x1f2   : > { %1234 = vrot.lane.b32.xlu0 %v5914_v42, %s5690_s16  ;;  %v1624_v6 = vsel %vm1599_vm10, %v1591_v10, %v1259_v36  ;;  %v616_v36 = vrot.slane %v6949_v58, 2 }
 0x1f3   : > { %v6971_v7 = vpop.permute.xlu1 %974 }
 0x1f4   : > { %v618_v13 = vsel %vm527_vm3, %v616_v36, %v617_v60 }
 0x1f5   : > { %1172 = vrot.lane.b32.xlu1 %v6962_v29, %s5689_s15  ;;  %v1323_v30 = vpop.permute.xlu0 %1322 }
 0x1f6   : > { %v1641_v20 = vsel %vm1632_vm11, %v1608_v3, %v1323_v30  ;;  %856 = vrot.lane.b32.xlu0 %v5609_v34, %s5686_s12 }
 0x1f7   : > { %v1261_v1 = vpop.permute.xlu1 %1260  ;;  %5478 = vmatprep.mubr.msk.f32.mxu0 %vm1670_vm12, %v1641_v20 }
 0x1f9   : > { %1266 = vrot.lane.b32.xlu1 %v613_v18, %s5690_s16  ;;  %v7015_v9 = vpop.permute.xlu0 %658 }
 0x1fa   : > { %950 = vrot.lane.b32.xlu0 %v5914_v42, %s5687_s13  ;;  %v9087_v42 = vld [vmem:[#allocation6_spill] sm:$0xff] }
 0x1fb   : > { %v1355_v57 = vpop.permute.xlu1 %1354 }
 0x1fc   : > { %v1657_v53 = vsel %vm1632_vm11, %v1624_v6, %v1355_v57 }
 0x1fd   : > { %888 = vrot.lane.b32.xlu1 %v6962_v29, %s5686_s12  ;;  %5502 = vmatprep.mubr.msk.f32.mxu1 %vm1670_vm12, %v1657_v53  ;;  %v7025_v34 = vpop.permute.xlu0 %944  ;;  %v1460_v29 = vsel %vm1434_vm5, %v1427_v35, %v6745_v15  ;;  %s5700_s12 = smov [#allocation3]  }
 0x1fe   : > { %1236 = vrot.lane.b32.xlu0 %v9087_v42, %s5690_s16  ;;  %v1493_v26 = vsel %vm1467_vm6, %v1460_v29, %v6771_v55 }
 0x1ff   : > { %v7013_v56 = vpop.permute.xlu1 %690 }
 0x201   : > { %982 = vrot.lane.b32.xlu1 %v613_v18, %s5687_s13  ;;  %v5611_v18 = vld [vmem:[#allocation2 + $0x68] sm:$0xff]  ;;  %v7047_v15 = vpop.permute.xlu0 %1038 }
 0x202   : > { %v1411_v58 = vsel %vm223_vm0, %v5611_v18, %v6723_v63  ;;  %v1526_v63 = vsel %vm1500_vm7, %v1493_v26, %v6854_v52  ;;  %v7082_v18 = vld [vmem:[#allocation2 + $0x1a0] sm:$0xff] }
 0x203   : > { %v7023_v32 = vpop.permute.xlu1 %976  ;;  %v1444_v25 = vsel %vm1434_vm5, %v1411_v58, %v6747_v8  ;;  %v1559_v6 = vsel %vm1533_vm8, %v1526_v63, %v6920_v19  ;;  %v397_v63 = vld [vmem:[#allocation2 + $0x1a8] sm:$0x3] }
 0x204   : > { %v1477_v10 = vsel %vm1467_vm6, %v1444_v25, %v6775_v40  ;;  %v1592_v55 = vsel %vm1566_vm9, %v1559_v6, %v6951_v11  ;;  %v9088_v40 = vld [vmem:[#allocation7_spill] sm:$0xff]  ;;  %v625_v25 = vrot.slane %v7082_v18, 1 }
 0x205   : > { %1268 = vrot.lane.b32.xlu1 %v615_v23, %s5690_s16  ;;  %v1510_v61 = vsel %vm1500_vm7, %v1477_v10, %v6859_v51  ;;  %1330 = vrot.lane.b32.xlu0 %v9088_v40, %s5691_s17  ;;  %v1625_v57 = vsel %vm1599_vm10, %v1592_v55, %v1261_v1  ;;  %v1325_v53 = vpop.permute.xlu0 %1324  ;;  %v7097_v10 = vld [vmem:[%s8986_s2] ss:$0 sm:$0xff] }
 0x206   : > { %v1543_v8 = vsel %vm1533_vm8, %v1510_v61, %v6923_v47  ;;  %v619_v47 = vrot.slane %v394_v45, 2  ;;  %v5612_v61 = vld [vmem:[#allocation2 + $0xd8] sm:$0xff] }
 0x207   : > { %v7041_v5 = vpop.permute.xlu1 %1070  ;;  %v1576_v52 = vsel %vm1566_vm9, %v1543_v8, %v6953_v50 }
 0x208   : > { %v1609_v3 = vsel %vm1599_vm10, %v1576_v52, %v1229_v16  ;;  %v620_v1 = vsel %vm527_vm3, %v617_v60, %v619_v47  ;;  %v395_v60 = vld [vmem:[#allocation2 + $0x198] sm:$0xff]  ;;  %v2020_v52 = vadd.f32 %v6933_v44, %v7097_v10 }
 0x209   : > { %1362 = vrot.lane.b32.xlu1 %v618_v13, %s5691_s17  ;;  %v1642_v30 = vsel %vm1632_vm11, %v1609_v3, %v1325_v53  ;;  %952 = vrot.lane.b32.xlu0 %v9087_v42, %s5687_s13  ;;  %v661_v50 = vpop.permute.xlu0 %660  ;;  %v624_v29 = vrot.slane %v395_v60, 1  ;;  %v627_v53 = vrot.slane %v397_v63, 1 }
 0x20a   : > { %5479 = vmatmul.mubr.msk.f32.gmra.mrb[8].mxu0 %vm1670_vm12, %v1642_v30  ;;  %v2019_v30 = vadd.f32 %v7097_v10, %v6938_v24 }
 0x20b   : > { %v1357_v51 = vpop.permute.xlu1 %1356 }
 0x20c   : > { %v1658_v19 = vsel %vm1632_vm11, %v1625_v57, %v1357_v51  ;;  %v1415_v57 = vsel %vm223_vm0, %v6591_v43, %v661_v50  ;;  %v2003_v50 = vadd.f32 %v7097_v10, %v6940_v33 }
 0x20d   : > { %984 = vrot.lane.b32.xlu1 %v615_v23, %s5687_s13  ;;  %5503 = vmatmul.mubr.msk.f32.gmra.mrb[8].mxu1 %vm1670_vm12, %v1658_v19  ;;  %v755_v20 = vpop.permute.xlu0 %754  ;;  %v5692_v23 = vmov 1983009808   ;;  %s5623_s13 = sshll.u32 %s5700_s12, 4  ;;  %s5624_s13 = int_to_ptr.vmem [resolvable:$false] %s5623_s13 }
 0x20e   : > { %1046 = vrot.lane.b32.xlu0 %v9088_v40, %s5688_s14  ;;  %v2069_v45 = vunpack.c.l.s4 %v5692_v23  ;;  %v626_v40 = vsel %vm446_vm2, %v624_v29, %v625_v25  ;;  %v5613_v23 = vld [vmem:[#allocation2 + $0xe0] sm:$0xff]  ;;  %p5626_p0 = scmp.lt.s32.totalorder %s8943_s23, %s5624_s13 }
 0x20f   : > { %v693_v11 = vpop.permute.xlu1 %692 }
 0x210   : > { %v2070_v42 = vunpack.c.0.s8 %v2069_v45  ;;  %v1431_v6 = vsel %vm223_vm0, %v6587_v28, %v693_v11  ;;  %v2004_v28 = vadd.f32 %v6935_v49, %v7097_v10  ;;  %v1430_v49 = vsel %vm223_vm0, %v6569_v37, %v7013_v56 }
 0x211   : > { %1078 = vrot.lane.b32.xlu1 %v618_v13, %s5688_s14  ;;  %v7080_v35 = vpop.permute.xlu0 %1040  ;;  %v7089_v13 = vshrl.u32 %v2071_v59, 7  ;;  %v1414_v45 = vsel %vm223_vm0, %v6575_v46, %v7015_v9  ;;  %v629_v46 = vrot.slane %v395_v60, 2  ;;  %v630_v9 = vrot.slane %v7082_v18, 2 }
 0x212   : > { %1332 = vrot.lane.b32.xlu0 %v9089_v27, %s5691_s17  ;;  %v1447_v37 = vsel %vm1434_vm5, %v1414_v45, %v755_v20  ;;  %v628_v20 = vsel %vm446_vm2, %v625_v25, %v627_v53  ;;  %v9094_v53 = vld [vmem:[#allocation11_spill] sm:$0xff]  ;;  %v9095_v45 = vld [vmem:[#allocation12_spill] sm:$0xff]  ;;  %vm2987_vm2 = vcmask 1045509  }
 0x213   : > { %v787_v16 = vpop.permute.xlu1 %786  ;;  %9090 = vst [vmem:[#allocation6_spill] sm:$0xff] %v7089_v13  ;;  %v7104_v55 = vsub.s32 %v2070_v42, %v7089_v13 }
 0x214   : > { %v1463_v59 = vsel %vm1434_vm5, %v1430_v49, %v787_v16  ;;  %v9092_v16 = vld [vmem:[#allocation9_spill] sm:$0xff] }
 0x215   : > { %1364 = vrot.lane.b32.xlu1 %v620_v1, %s5691_s17  ;;  %v7092_v26 = vpop.permute.xlu0 %1134  ;;  %9091 = vst [vmem:[#allocation7_spill] sm:$0xff] %v7104_v55 }
 0x216   : > { %1048 = vrot.lane.b32.xlu0 %v9089_v27, %s5688_s14 }
 0x217   : > { %v7078_v36 = vpop.permute.xlu1 %1072 }
 0x219   : > { %1080 = vrot.lane.b32.xlu1 %v620_v1, %s5688_s14  ;;  %v757_v3 = vpop.permute.xlu0 %756  ;;  %s5625_s14 = scalar_lea.vmem %s5624_s13, 512 }
 0x21a   : > { %1142 = vrot.lane.b32.xlu0 %v5612_v61, %s5689_s15  ;;  %v7119_v47 = vsel %vm1434_vm5, %v1415_v57, %v757_v3  ;;  %v5471_v11 = vpop.f32.mrb[2].mxu0 }
 0x21b   : > { %v7087_v58 = vpop.permute.xlu1 %1166  ;;  %v2006_v1 = vadd.f32 %v5471_v11, %v7097_v10  ;;  %v1847_v24 = vpop.f32.mrb[3].mxu0  ;;  %v9093_v11 = vld [vmem:[#allocation10_spill] sm:$0xff] }
 0x21c   : > { %v2005_v33 = vadd.f32 %v7097_v10, %v1847_v24 }
 0x21d   : > { %1174 = vrot.lane.b32.xlu1 %v395_v60, %s5689_s15  ;;  %v7140_v56 = vmax.f32 %v2004_v28, %v2006_v1  ;;  %v631_v60 = vsel %vm527_vm3, %v629_v46, %v630_v9 }
 0x21e   : > { %1144 = vrot.lane.b32.xlu0 %v5613_v23, %s5689_s15  ;;  %v2035_v57 = vmax.f32 %v2003_v50, %v2005_v33 }
 0x21f   : > { %v789_v8 = vpop.permute.xlu1 %788 }
 0x220   : > { %v7112_v51 = vsel %vm1434_vm5, %v1431_v6, %v789_v8  ;;  %v5495_v19 = vpop.f32.mrb[2].mxu1  ;;  %v851_v8 = vpop.permute.xlu0 %850  ;;  %v2074_v28 = vrot.slane %v2035_v57, %v7104_v55 }
 0x221   : > { %v2022_v44 = vadd.f32 %v5495_v19, %v7097_v10  ;;  %1176 = vrot.lane.b32.xlu1 %v7082_v18, %s5689_s15  ;;  %v1927_v43 = vpop.f32.mrb[3].mxu1  ;;  %v1480_v3 = vsel %vm1467_vm6, %v1447_v37, %v851_v8  ;;  %v2067_v19 = vcombine.high %v2035_v57, %v2035_v57  ;;  %v632_v18 = vrot.slane %v397_v63, 2  ;;  %v5614_v37 = vld [vmem:[#allocation2 + $0x138] sm:$0xff] }
 0x222   : > { %v2021_v27 = vadd.f32 %v7097_v10, %v1927_v43  ;;  %1238 = vrot.lane.b32.xlu0 %v9092_v16, %s5690_s16  ;;  %v2082_v43 = vcombine.high %v2074_v28, %v2074_v28  ;;  %v5338_v23 = vrot.slane %v2074_v28, 9  ;;  %v1428_v8 = vsel %vm223_vm0, %v5614_v37, %v6842_v2  ;;  %v5615_v57 = vld [vmem:[#allocation2 + $0x78] sm:$0xff] }
 0x223   : > { %v7136_v29 = vmax.f32 %v2020_v52, %v2022_v44  ;;  %v883_v42 = vpop.permute.xlu1 %882  ;;  %v2081_v44 = vrot.slane %v2067_v19, %v7104_v55  ;;  %v633_v50 = vsel %vm527_vm3, %v630_v9, %v632_v18  ;;  %v1412_v46 = vsel %vm223_vm0, %v5615_v57, %v6845_v41 }
 0x224   : > { %v7142_v61 = vmax.f32 %v2019_v30, %v2021_v27  ;;  %v1496_v6 = vsel %vm1467_vm6, %v1463_v59, %v883_v42  ;;  %v7154_v30 = vpop.permute.xlu0 %1136  ;;  %v5339_v49 = vrot.slane %v2082_v43, 9  ;;  %v7169_v59 = vsub.s32 0, %v7089_v13 }
 0x225   : > { %1270 = vrot.lane.b32.xlu1 %v626_v40, %s5690_s16  ;;  %v2083_v24 = vcombine.high %v2081_v44, %v2081_v44  ;;  %v5340_v63 = vrot.slane %v2081_v44, 9  ;;  %v2091_v9 = vrot.slane %v7140_v56, %v7104_v55  ;;  %v7179_v19 = vmax.f32 %v2074_v28, %v5338_v23 }
 0x226   : > { %1240 = vrot.lane.b32.xlu0 %v9093_v11, %s5690_s16  ;;  %v7171_v33 = vmax.f32 %v2082_v43, %v5339_v49  ;;  %v1461_v2 = vsel %vm1434_vm5, %v1428_v8, %v6912_v0  ;;  %v1445_v41 = vsel %vm1434_vm5, %v1412_v46, %v6915_v12  ;;  %vm2989_vm3 = vcmask 1046534  }
 0x227   : > { %v7151_v52 = vpop.permute.xlu1 %1168  ;;  %v5341_v16 = vrot.slane %v2083_v24, 9  ;;  %v7192_v43 = vmax.f32 %v2081_v44, %v5340_v63 }
 0x228   : > { %v1231_v25 = vpop.permute.xlu0 %1230  ;;  %v2730_v0 = vrot.slane %v7171_v33, %v7169_v59 }
 0x229   : > { %1272 = vrot.lane.b32.xlu1 %v628_v20, %s5690_s16 }
 0x22a   : > { %1334 = vrot.lane.b32.xlu0 %v9094_v53, %s5691_s17 }
 0x22b   : > { %v1263_v40 = vpop.permute.xlu1 %1262 }
 0x22c   : > { %v853_v27 = vpop.permute.xlu0 %852 }
 0x22d   : > { %1366 = vrot.lane.b32.xlu1 %v631_v60, %s5691_s17  ;;  %v1481_v60 = vsel %vm1467_vm6, %v7119_v47, %v853_v27  ;;  %v1478_v47 = vsel %vm1467_vm6, %v1445_v41, %v6945_v38  ;;  %v2099_v38 = vcombine.high %v2091_v9, %v2091_v9 }
 0x22e   : > { %1336 = vrot.lane.b32.xlu0 %v9095_v45, %s5691_s17 }
 0x22f   : > { %v885_v1 = vpop.permute.xlu1 %884 }
 0x230   : > { %v947_v20 = vpop.permute.xlu0 %946  ;;  %v1497_v11 = vsel %vm1467_vm6, %v7112_v51, %v885_v1  ;;  %v1494_v51 = vsel %vm1467_vm6, %v1461_v2, %v6943_v4  ;;  %v2734_v1 = vrot.slane %v7192_v43, %v7169_v59 }
 0x231   : > { %1368 = vrot.lane.b32.xlu1 %v633_v50, %s5691_s17  ;;  %v7195_v28 = vsel %vm1500_vm7, %v1480_v3, %v947_v20  ;;  %v1527_v12 = vsel %vm1500_vm7, %v1494_v51, %v6971_v7  ;;  %v1511_v3 = vsel %vm1500_vm7, %v1478_v47, %v6973_v31  ;;  %v2726_v50 = vrot.slane %v7179_v19, %v7169_v59 }
 0x232   : > { %v1560_v4 = vsel %vm1533_vm8, %v1527_v12, %v7041_v5  ;;  %v1544_v49 = vsel %vm1533_vm8, %v1511_v3, %v7047_v15  ;;  %v5342_v31 = vrot.slane %v2091_v9, 9  ;;  %v5616_v3 = vld [vmem:[#allocation2 + $0x140] sm:$0xff] }
 0x233   : > { %v979_v42 = vpop.permute.xlu1 %978  ;;  %v1593_v7 = vsel %vm1566_vm9, %v1560_v4, %v7087_v58  ;;  %v1577_v27 = vsel %vm1566_vm9, %v1544_v49, %v7092_v26  ;;  %v5343_v58 = vrot.slane %v2099_v38, 9  ;;  %v1429_v4 = vsel %vm223_vm0, %v5616_v3, %v6905_v54  ;;  %v5617_v49 = vld [vmem:[#allocation2 + $0x80] sm:$0xff] }
 0x234   : > { %v7186_v18 = vsel %vm1500_vm7, %v1496_v6, %v979_v42  ;;  %v2084_v6 = vcombine.high %v7140_v56, %v7140_v56  ;;  %v7211_v44 = vpop.permute.xlu0 %1232  ;;  %v7215_v56 = vmax.f32 %v2083_v24, %v5341_v16  ;;  %v2980_v24 = vsel %vm2979_vm13, %v2730_v0, %v2726_v50 }
 0x235   : > { %v1626_v23 = vsel %vm1599_vm10, %v1593_v7, %v1263_v40  ;;  %v1610_v45 = vsel %vm1599_vm10, %v1577_v27, %v1231_v25  ;;  %v7236_v26 = vmax.f32 %v2091_v9, %v5342_v31  ;;  %v2982_v40 = vsel %vm2981_vm14, %v2734_v1, %v2980_v24 }
 0x236   : > { %v2098_v5 = vrot.slane %v2084_v6, %v7104_v55  ;;  %v2738_v37 = vrot.slane %v7215_v56, %v7169_v59  ;;  %v7240_v20 = vmax.f32 %v2099_v38, %v5343_v58  ;;  %v1413_v7 = vsel %vm223_vm0, %v5617_v49, %v6907_v21 }
 0x237   : > { %v7205_v53 = vpop.permute.xlu1 %1264  ;;  %v2742_v41 = vrot.slane %v7236_v26, %v7169_v59  ;;  %v1446_v31 = vsel %vm1434_vm5, %v1413_v7, %v6931_v17 }
 0x238   : > { %v1327_v42 = vpop.permute.xlu0 %1326  ;;  %v2100_v57 = vcombine.high %v2098_v5, %v2098_v5  ;;  %v5344_v46 = vrot.slane %v2098_v5, 9  ;;  %v2984_v2 = vsel %vm2983_vm15, %v2738_v37, %v2982_v40  ;;  %v2746_v50 = vrot.slane %v7240_v20, %v7169_v59 }
 0x239   : > { %v1643_v8 = vsel %vm1632_vm11, %v1610_v45, %v1327_v42  ;;  %v2986_v12 = vsel %vm2985_vm1, %v2742_v41, %v2984_v2 }
 0x23a   : > { %5481 = vmatprep.mubr.msk.f32.mxu0 %vm1670_vm12, %v1643_v8  ;;  %v5345_v9 = vrot.slane %v2100_v57, 9  ;;  %v7245_v47 = vmax.f32 %v2098_v5, %v5344_v46  ;;  %v2988_v27 = vsel %vm2987_vm2, %v2746_v50, %v2986_v12  ;;  %v1479_v5 = vsel %vm1467_vm6, %v1446_v31, %v6964_v22 }
 0x23b   : > { %v1359_v63 = vpop.permute.xlu1 %1358  ;;  %v1512_v17 = vsel %vm1500_vm7, %v1479_v5, %v7025_v34 }
 0x23c   : > { %v1659_v15 = vsel %vm1632_vm11, %v1626_v23, %v1359_v63  ;;  %v663_v16 = vpop.permute.xlu0 %662  ;;  %v1545_v23 = vsel %vm1533_vm8, %v1512_v17, %v7080_v35 }
 0x23d   : > { %5505 = vmatprep.mubr.msk.f32.mxu1 %vm1670_vm12, %v1659_v15  ;;  %v1416_v40 = vsel %vm223_vm0, %v6761_v62, %v663_v16 }
 0x23f   : > { %v695_v25 = vpop.permute.xlu1 %694 }
 0x240   : > { %v949_v0 = vpop.permute.xlu0 %948 }
 0x241   : > { %v7254_v38 = vsel %vm1500_vm7, %v1481_v60, %v949_v0  ;;  %v7266_v60 = vmax.f32 %v2100_v57, %v5345_v9 }
 0x243   : > { %v981_v51 = vpop.permute.xlu1 %980  ;;  %v2754_v34 = vrot.slane %v7266_v60, %v7169_v59 }
 0x244   : > { %v7248_v6 = vsel %vm1500_vm7, %v1497_v11, %v981_v51  ;;  %v1462_v11 = vsel %vm1434_vm5, %v1429_v4, %v6929_v14  ;;  %v1043_v24 = vpop.permute.xlu0 %1042  ;;  %v2750_v14 = vrot.slane %v7245_v47, %v7169_v59 }
 0x245   : > { %v1495_v54 = vsel %vm1467_vm6, %v1462_v11, %v6960_v48 }
 0x246   : > { %v1528_v21 = vsel %vm1500_vm7, %v1495_v54, %v7023_v32  ;;  %v2990_v22 = vsel %vm2989_vm3, %v2750_v14, %v2988_v27  ;;  %v1578_v32 = vsel %vm1566_vm9, %v1545_v23, %v7154_v30  ;;  %v1546_v23 = vsel %vm1533_vm8, %v7195_v28, %v1043_v24 }
 0x247   : > { %v1075_v1 = vpop.permute.xlu1 %1074  ;;  %v1561_v48 = vsel %vm1533_vm8, %v1528_v21, %v7078_v36  ;;  %v1611_v36 = vsel %vm1599_vm10, %v1578_v32, %v7211_v44  ;;  %v2992_v58 = vsel %vm2991_vm4, %v2754_v34, %v2990_v22  ;;  %v1432_v44 = vsel %vm223_vm0, %v6757_v39, %v695_v25 }
 0x248   : > { %v1594_v63 = vsel %vm1566_vm9, %v1561_v48, %v7151_v52  ;;  %v1329_v42 = vpop.permute.xlu0 %1328  ;;  %v3050_v37 = vsel %vm1632_vm11, %v2992_v58, 0.0  ;;  %v1562_v48 = vsel %vm1533_vm8, %v7186_v18, %v1075_v1 }
 0x249   : > { %v1627_v45 = vsel %vm1599_vm10, %v1594_v63, %v7205_v53  ;;  %v1644_v52 = vsel %vm1632_vm11, %v1611_v36, %v1329_v42 }
 0x24a   : > { %5482 = vmatmul.mubr.msk.f32.gmra.mrb[10].mxu0 %vm1670_vm12, %v1644_v52 }
 0x24b   : > { %v1361_v15 = vpop.permute.xlu1 %1360 }
 0x24c   : > { %v1660_v35 = vsel %vm1632_vm11, %v1627_v45, %v1361_v15  ;;  %v7299_v53 = vpop.permute.xlu0 %664 }
 0x24d   : > { %5506 = vmatmul.mubr.msk.f32.gmra.mrb[10].mxu1 %vm1670_vm12, %v1660_v35  ;;  %3051 = vadd.xlane.f32.xlu0 %v3050_v37 }
 0x24f   : > { %v7297_v30 = vpop.permute.xlu1 %696 }
 0x250   : > { %v759_v46 = vpop.permute.xlu0 %758 }
 0x251   : > { %v7310_v2 = vsel %vm1434_vm5, %v1416_v40, %v759_v46 }
 0x253   : > { %v791_v8 = vpop.permute.xlu1 %790 }
 0x254   : > { %v7307_v57 = vsel %vm1434_vm5, %v1432_v44, %v791_v8  ;;  %v1045_v51 = vpop.permute.xlu0 %1044 }
 0x255   : > { %v1547_v52 = vsel %vm1533_vm8, %v7254_v38, %v1045_v51  ;;  %v2210_v51 = vrot.slane %v7142_v61, %v7104_v55 }
 0x257   : > { %v1077_v41 = vpop.permute.xlu1 %1076 }
 0x258   : > { %v1139_v0 = vpop.permute.xlu0 %1138  ;;  %v1563_v42 = vsel %vm1533_vm8, %v7248_v6, %v1077_v41  ;;  %v2203_v41 = vcombine.high %v7142_v61, %v7142_v61 }
 0x259   : > { %v1579_v22 = vsel %vm1566_vm9, %v1546_v23, %v1139_v0  ;;  %v5370_v23 = vrot.slane %v2210_v51, 9 }
 0x25a   : > { %v7318_v25 = vpop.f32.mrb[4].mxu0 }
 0x25b   : > { %v1171_v9 = vpop.permute.xlu1 %1170  ;;  %v7322_v16 = vpop.f32.mrb[5].mxu0 }
 0x25c   : > { %v7314_v3 = vpop.permute.xlu0 %760  ;;  %v1595_v63 = vsel %vm1566_vm9, %v1562_v48, %v1171_v9 }
 0x25f   : > { %v7312_v12 = vpop.permute.xlu1 %792 }
 0x260   : > { %v7316_v39 = vpop.f32.mrb[4].mxu1  ;;  %v7326_v50 = vpop.permute.xlu0 %854 }
 0x261   : > { %v7320_v62 = vpop.f32.mrb[5].mxu1 }
 0x263   : > { %v7324_v4 = vpop.permute.xlu1 %886 }
 0x264   : > { %v1141_v7 = vpop.permute.xlu0 %1140 }
 0x265   : > { %v1580_v37 = vsel %vm1566_vm9, %v1547_v52, %v1141_v7 }
 0x267   : > { %v1173_v49 = vpop.permute.xlu1 %1172 }
 0x268   : > { %v1235_v31 = vpop.permute.xlu0 %1234  ;;  %v1596_v58 = vsel %vm1566_vm9, %v1563_v42, %v1173_v49  ;;  %v9096_v42 = vld [vmem:[#allocation13_spill] sm:$0xff] }
 0x269   : > { %v1612_v15 = vsel %vm1599_vm10, %v1579_v22, %v1235_v31  ;;  %v2218_v31 = vcombine.high %v2210_v51, %v2210_v51  ;;  %v1433_v52 = vsel %vm223_vm0, %v9096_v42, %v7297_v30 }
 0x26b   : > { %v1267_v11 = vpop.permute.xlu1 %1266 }
 0x26c   : > { %v7330_v27 = vpop.permute.xlu0 %856  ;;  %v1628_v32 = vsel %vm1599_vm10, %v1595_v63, %v1267_v11  ;;  %v2217_v11 = vrot.slane %v2203_v41, %v7104_v55  ;;  %v5371_v63 = vrot.slane %v2218_v31, 9 }
 0x26e   : > { %v7365_v48 = vcombine.high %v2217_v11, %v2217_v11  ;;  %v5372_v22 = vrot.slane %v2217_v11, 9 }
 0x26f   : > { %v7328_v54 = vpop.permute.xlu1 %888 }
 0x270   : > { %v7332_v21 = vpop.permute.xlu0 %950  ;;  %v5373_v61 = vrot.slane %v7365_v48, 9 }
 0x273   : > { %v983_v5 = vpop.permute.xlu1 %982 }
 0x274   : > { %v1237_v17 = vpop.permute.xlu0 %1236 }
 0x275   : > { %v1613_v40 = vsel %vm1599_vm10, %v1580_v37, %v1237_v17 }
 0x277   : > { %v1269_v14 = vpop.permute.xlu1 %1268 }
 0x278   : > { %v1331_v36 = vpop.permute.xlu0 %1330  ;;  %v1629_v44 = vsel %vm1599_vm10, %v1596_v58, %v1269_v14  ;;  %v1498_v58 = vsel %vm1467_vm6, %v7307_v57, %v7324_v4  ;;  %v2024_v57 = vadd.f32 %v7316_v39, %v7097_v10 }
 0x279   : > { %v1645_v35 = vsel %vm1632_vm11, %v1612_v15, %v1331_v36  ;;  %v7369_v15 = vrot.slane %v7136_v29, %v7104_v55  ;;  %v7374_v36 = vmax.f32 %v2218_v31, %v5371_v63 }
 0x27a   : > { %5484 = vmatprep.mubr.msk.f32.mxu0 %vm1670_vm12, %v1645_v35  ;;  %v7376_v35 = vmax.f32 %v2217_v11, %v5372_v22 }
 0x27b   : > { %v1363_v45 = vpop.permute.xlu1 %1362 }
 0x27c   : > { %v1661_v34 = vsel %vm1632_vm11, %v1628_v32, %v1363_v45  ;;  %v7346_v28 = vpop.permute.xlu0 %952 }
 0x27d   : > { %5508 = vmatprep.mubr.msk.f32.mxu1 %vm1670_vm12, %v1661_v34  ;;  %v7372_v34 = vmax.f32 %v2210_v51, %v5370_v23 }
 0x27f   : > { %v985_v18 = vpop.permute.xlu1 %984 }
 0x280   : > { %v1047_v24 = vpop.permute.xlu0 %1046 }
 0x283   : > { %v1079_v1 = vpop.permute.xlu1 %1078 }
 0x284   : > { %v1333_v9 = vpop.permute.xlu0 %1332 }
 0x285   : > { %v1646_v0 = vsel %vm1632_vm11, %v1613_v40, %v1333_v9  ;;  %v1466_v40 = vsel %vm1434_vm5, %v1433_v52, %v7312_v12  ;;  %v1531_v9 = vsel %vm1500_vm7, %v1498_v58, %v983_v5  ;;  %v2008_v12 = vadd.f32 %v7318_v25, %v7097_v10 }
 0x286   : > { %5485 = vmatmul.mubr.msk.f32.gmra.mrb[12].mxu0 %vm1670_vm12, %v1646_v0  ;;  %v1499_v39 = vsel %vm1467_vm6, %v1466_v40, %v7328_v54 }
 0x287   : > { %v1365_v8 = vpop.permute.xlu1 %1364 }
 0x288   : > { %v1662_v46 = vsel %vm1632_vm11, %v1629_v44, %v1365_v8  ;;  %v1049_v38 = vpop.permute.xlu0 %1048  ;;  %v9097_v44 = vld [vmem:[#allocation14_spill] sm:$0xff] }
 0x289   : > { %5509 = vmatmul.mubr.msk.f32.gmra.mrb[12].mxu1 %vm1670_vm12, %v1662_v46  ;;  %v1417_v8 = vsel %vm223_vm0, %v9097_v44, %v7299_v53  ;;  %v1482_v46 = vsel %vm1467_vm6, %v7310_v2, %v7326_v50  ;;  %v1564_v53 = vsel %vm1533_vm8, %v1531_v9, %v1079_v1  ;;  %v2023_v2 = vadd.f32 %v7097_v10, %v7320_v62 }
 0x28a   : > { %v1450_v30 = vsel %vm1434_vm5, %v1417_v8, %v7314_v3  ;;  %v1515_v4 = vsel %vm1500_vm7, %v1482_v46, %v7332_v21  ;;  %v2007_v3 = vadd.f32 %v7097_v10, %v7322_v16  ;;  %v1532_v62 = vsel %vm1500_vm7, %v1499_v39, %v985_v18 }
 0x28b   : > { %v1081_v6 = vpop.permute.xlu1 %1080  ;;  %v1548_v50 = vsel %vm1533_vm8, %v1515_v4, %v1047_v24  ;;  %v1483_v25 = vsel %vm1467_vm6, %v1450_v30, %v7330_v27  ;;  %v2858_v46 = vrot.slane %v7374_v36, %v7169_v59  ;;  %v5374_v4 = vrot.slane %v7369_v15, 9 }
 0x28c   : > { %v1143_v7 = vpop.permute.xlu0 %1142  ;;  %v1516_v16 = vsel %vm1500_vm7, %v1483_v25, %v7346_v28  ;;  %v1565_v54 = vsel %vm1533_vm8, %v1532_v62, %v1081_v6  ;;  %vm5214_vm0 = vcmask 523264   ;;  %vm5216_vm5 = vcmask 785408  }
 0x28d   : > { %v1581_v21 = vsel %vm1566_vm9, %v1548_v50, %v1143_v7  ;;  %v1549_v27 = vsel %vm1533_vm8, %v1516_v16, %v1049_v38 }
 0x28f   : > { %v1175_v49 = vpop.permute.xlu1 %1174 }
 0x290   : > { %v1145_v17 = vpop.permute.xlu0 %1144  ;;  %v1597_v5 = vsel %vm1566_vm9, %v1564_v53, %v1175_v49  ;;  %v2854_v53 = vrot.slane %v7372_v34, %v7169_v59 }
 0x291   : > { %v1582_v6 = vsel %vm1566_vm9, %v1549_v27, %v1145_v17 }
 0x293   : > { %v1177_v14 = vpop.permute.xlu1 %1176 }
 0x294   : > { %v1239_v45 = vpop.permute.xlu0 %1238  ;;  %v1598_v18 = vsel %vm1566_vm9, %v1565_v54, %v1177_v14 }
 0x295   : > { %v1614_v24 = vsel %vm1599_vm10, %v1581_v21, %v1239_v45 }
 0x297   : > { %v1271_v32 = vpop.permute.xlu1 %1270 }
 0x298   : > { %v1241_v0 = vpop.permute.xlu0 %1240  ;;  %v1630_v1 = vsel %vm1599_vm10, %v1597_v5, %v1271_v32 }
 0x299   : > { %v1615_v38 = vsel %vm1599_vm10, %v1582_v6, %v1241_v0 }
 0x29a   : > { %v5477_v31 = vpop.f32.mrb[6].mxu0 }
 0x29b   : > { %v1273_v37 = vpop.permute.xlu1 %1272  ;;  %v2010_v22 = vadd.f32 %v5477_v31, %v7097_v10  ;;  %v1867_v32 = vpop.f32.mrb[7].mxu0 }
 0x29c   : > { %v1335_v49 = vpop.permute.xlu0 %1334  ;;  %v1631_v45 = vsel %vm1599_vm10, %v1598_v18, %v1273_v37  ;;  %v2009_v52 = vadd.f32 %v7097_v10, %v1867_v32  ;;  %v2220_v37 = vcombine.high %v7136_v29, %v7136_v29  ;;  %v2862_v29 = vrot.slane %v7376_v35, %v7169_v59 }
 0x29d   : > { %v1647_v7 = vsel %vm1632_vm11, %v1614_v24, %v1335_v49  ;;  %v2038_v44 = vmax.f32 %v2008_v12, %v2010_v22 }
 0x29e   : > { %5487 = vmatprep.mubr.msk.f32.mxu0 %vm1670_vm12, %v1647_v7  ;;  %v2037_v9 = vmax.f32 %v2007_v3, %v2009_v52  ;;  %v3014_v3 = vsel %vm2979_vm13, %v2858_v46, %v2854_v53  ;;  %v2234_v39 = vrot.slane %v2220_v37, %v7104_v55 }
 0x29f   : > { %v1367_v41 = vpop.permute.xlu1 %1366  ;;  %v2118_v30 = vcombine.high %v2038_v44, %v2038_v44  ;;  %v2125_v0 = vrot.slane %v2038_v44, %v7104_v55  ;;  %v3015_v24 = vsel %vm2981_vm14, %v2862_v29, %v3014_v3 }
 0x2a0   : > { %v1663_v51 = vsel %vm1632_vm11, %v1630_v1, %v1367_v41  ;;  %v5501_v11 = vpop.f32.mrb[6].mxu1  ;;  %v1337_v40 = vpop.permute.xlu0 %1336  ;;  %v2101_v12 = vcombine.high %v2037_v9, %v2037_v9  ;;  %v2108_v5 = vrot.slane %v2037_v9, %v7104_v55  ;;  %v7462_v41 = vmax.f32 %v7369_v15, %v5374_v4 }
 0x2a1   : > { %v2026_v23 = vadd.f32 %v5501_v11, %v7097_v10  ;;  %v1947_v63 = vpop.f32.mrb[7].mxu1  ;;  %5511 = vmatprep.mubr.msk.f32.mxu1 %vm1670_vm12, %v1663_v51  ;;  %v1648_v17 = vsel %vm1632_vm11, %v1615_v38, %v1337_v40  ;;  %v2132_v50 = vrot.slane %v2118_v30, %v7104_v55  ;;  %v2133_v21 = vcombine.high %v2125_v0, %v2125_v0 }
 0x2a2   : > { %v2025_v28 = vadd.f32 %v7097_v10, %v1947_v63  ;;  %5488 = vmatmul.mubr.msk.f32.gmra.mrb[14].mxu0 %vm1670_vm12, %v1648_v17  ;;  %v2115_v25 = vrot.slane %v2101_v12, %v7104_v55  ;;  %v2116_v62 = vcombine.high %v2108_v5, %v2108_v5  ;;  %v5350_v51 = vrot.slane %v2125_v0, 9 }
 0x2a3   : > { %v7430_v42 = vmax.f32 %v2024_v57, %v2026_v23  ;;  %v1369_v58 = vpop.permute.xlu1 %1368  ;;  %v2235_v57 = vcombine.high %v7369_v15, %v7369_v15  ;;  %v5346_v11 = vrot.slane %v2108_v5, 9  ;;  %v2236_v54 = vcombine.high %v2234_v39, %v2234_v39 }
 0x2a4   : > { %v7434_v14 = vmax.f32 %v2023_v2, %v2025_v28  ;;  %v1664_v8 = vsel %vm1632_vm11, %v1631_v45, %v1369_v58  ;;  %v7453_v2 = vmax.f32 %v7365_v48, %v5373_v61  ;;  %v2134_v61 = vcombine.high %v2132_v50, %v2132_v50 }
 0x2a5   : > { %5512 = vmatmul.mubr.msk.f32.gmra.mrb[14].mxu1 %vm1670_vm12, %v1664_v8  ;;  %v5375_v1 = vrot.slane %v2235_v57, 9  ;;  %v2117_v49 = vcombine.high %v2115_v25, %v2115_v25  ;;  %v5348_v16 = vrot.slane %v2115_v25, 9  ;;  %v5376_v7 = vrot.slane %v2234_v39, 9 }
 0x2a6   : > { %v2866_v48 = vrot.slane %v7453_v2, %v7169_v59  ;;  %v5351_v31 = vrot.slane %v2133_v21, 9  ;;  %v5347_v23 = vrot.slane %v2116_v62, 9  ;;  %v5352_v63 = vrot.slane %v2132_v50, 9 }
 0x2a7   : > { %v5349_v15 = vrot.slane %v2117_v49, 9  ;;  %v7468_v27 = vmax.f32 %v2108_v5, %v5346_v11  ;;  %v7470_v18 = vmax.f32 %v2115_v25, %v5348_v16  ;;  %v7472_v22 = vmax.f32 %v2235_v57, %v5375_v1 }
 0x2a8   : > { %v7474_v32 = vmax.f32 %v2116_v62, %v5347_v23  ;;  %v5353_v28 = vrot.slane %v2134_v61, 9  ;;  %v3016_v6 = vsel %vm2983_vm15, %v2866_v48, %v3015_v24  ;;  %v2870_v45 = vrot.slane %v7462_v41, %v7169_v59 }
 0x2a9   : > { %v7479_v52 = vmax.f32 %v2125_v0, %v5350_v51  ;;  %v7481_v58 = vmax.f32 %v2117_v49, %v5349_v15  ;;  %v2766_v38 = vrot.slane %v7470_v18, %v7169_v59  ;;  %v7485_v44 = vmax.f32 %v2133_v21, %v5351_v31 }
 0x2aa   : > { %v2758_v8 = vrot.slane %v7468_v27, %v7169_v59  ;;  %v2762_v40 = vrot.slane %v7474_v32, %v7169_v59  ;;  %v5377_v46 = vrot.slane %v2236_v54, 9  ;;  %v7491_v9 = vmax.f32 %v2234_v39, %v5376_v7 }
 0x2ab   : > { %v7493_v17 = vmax.f32 %v2132_v50, %v5352_v63  ;;  %v2770_v37 = vrot.slane %v7481_v58, %v7169_v59  ;;  %v3017_v30 = vsel %vm2985_vm1, %v2870_v45, %v3016_v6  ;;  %v7499_v57 = vmax.f32 %v2134_v61, %v5353_v28 }
 0x2ac   : > { %v2993_v0 = vsel %vm2979_vm13, %v2762_v40, %v2758_v8  ;;  %v2874_v4 = vrot.slane %v7472_v22, %v7169_v59  ;;  %v2774_v53 = vrot.slane %v7479_v52, %v7169_v59  ;;  %v2778_v29 = vrot.slane %v7485_v44, %v7169_v59 }
 0x2ad   : > { %v2994_v12 = vsel %vm2981_vm14, %v2766_v38, %v2993_v0  ;;  %v7509_v5 = vmax.f32 %v2236_v54, %v5377_v46  ;;  %v2782_v39 = vrot.slane %v7493_v17, %v7169_v59  ;;  %v2878_v1 = vrot.slane %v7491_v9, %v7169_v59 }
 0x2ae   : > { %v2995_v50 = vsel %vm2983_vm15, %v2770_v37, %v2994_v12  ;;  %v3018_v3 = vsel %vm2987_vm2, %v2874_v4, %v3017_v30  ;;  %v2786_v25 = vrot.slane %v7499_v57, %v7169_v59  ;;  %v5693_v63 = vmov 269488144  }
 0x2af   : > { %v2996_v21 = vsel %vm2985_vm1, %v2774_v53, %v2995_v50  ;;  %v3019_v62 = vsel %vm2989_vm3, %v2878_v1, %v3018_v3  ;;  %v2882_v51 = vrot.slane %v7509_v5, %v7169_v59  ;;  %v3092_v15 = vunpack.c.l.s4 %v5693_v63 }
 0x2b0   : > { %v2997_v48 = vsel %vm2987_vm2, %v2778_v29, %v2996_v21  ;;  %v5694_v38 = vmov 842150450   ;;  %v5695_v30 = vmov 1414812756   ;;  %v5696_v29 = vmov 1987475062  }
 0x2b1   : > { %v2998_v61 = vsel %vm2989_vm3, %v2782_v39, %v2997_v48  ;;  %v3020_v11 = vsel %vm2991_vm4, %v2882_v51, %v3019_v62  ;;  %v3093_v28 = vunpack.c.0.s8 %v3092_v15  ;;  %v3099_v8 = vunpack.c.l.s4 %v5694_v38 }
 0x2b2   : > { %v2999_v24 = vsel %vm2991_vm4, %v2786_v25, %v2998_v61  ;;  %v3062_v16 = vsel %vm1632_vm11, %v3020_v11, 0.0  ;;  %v3106_v0 = vunpack.c.l.s4 %v5695_v30  ;;  %v3113_v50 = vunpack.c.l.s4 %v5696_v29 }
 0x2b3   : > { %v3053_v49 = vsel %vm1632_vm11, %v2999_v24, 0.0  ;;  %v7529_v45 = vsub.s32 %v3093_v28, %v7089_v13  ;;  %v3100_v46 = vunpack.c.0.s8 %v3099_v8 }
 0x2b4   : > { %3054 = vadd.xlane.f32.xlu1 %v3053_v49  ;;  %v3107_v12 = vunpack.c.0.s8 %v3106_v0  ;;  %v3114_v25 = vunpack.c.0.s8 %v3113_v50 }
 0x2b5   : > { %v7533_v4 = vsub.s32 %v3100_v46, %v7089_v13 }
 0x2b6   : > { %v7540_v21 = vsub.s32 %v3107_v12, %v7089_v13  ;;  %v7554_v51 = vsub.s32 %v3114_v25, %v7089_v13 }
 0x2b8   : > { %3063 = vadd.xlane.f32.xlu1 %v3062_v16 }
 0x2da   : > { %v3052_v6 = vpop.xlane.xlu0 %3051 }
 0x2db   : > { %v3075_v40 = vmul.f32 0.03125, %v3052_v6 }
 0x2dd   : > { %v5480_v7 = vpop.f32.mrb[8].mxu0  ;;  %v3097_v37 = vrot.slane %v3075_v40, %v7529_v45  ;;  %v3104_v3 = vrot.slane %v3075_v40, %v7533_v4  ;;  %v3111_v62 = vrot.slane %v3075_v40, %v7540_v21 }
 0x2de   : > { %v1877_v23 = vpop.f32.mrb[9].mxu0 }
 0x2df   : > { %v3315_v53 = vrot.slane %v3097_v37, 1  ;;  %v7543_v1 = vsub.f32 %v7179_v19, %v3097_v37  ;;  %v3316_v48 = vrot.slane %v3104_v3, 1  ;;  %v7549_v24 = vsub.f32 %v7192_v43, %v3104_v3 }
 0x2e0   : > { %v5504_v54 = vpop.f32.mrb[8].mxu1  ;;  %v3317_v11 = vrot.slane %v3111_v62, 1  ;;  %v3118_v43 = vrot.slane %v3075_v40, %v7554_v51  ;;  %v7565_v15 = vsub.f32 %v7236_v26, %v3111_v62  ;;  %v2012_v37 = vadd.f32 %v5480_v7, %v7097_v10 }
 0x2e1   : > { %v1957_v31 = vpop.f32.mrb[9].mxu1  ;;  %v7537_v39 = vsub.f32 %v7171_v33, %v3315_v53  ;;  %9099 = vst [vmem:[#allocation9_spill] sm:$0xff] %v7543_v1  ;;  %9100 = vst [vmem:[#allocation10_spill] sm:$0xff] %v7549_v24  ;;  %v3475_v33 = vmul.f32 %v7543_v1, %v7543_v1  ;;  %v7557_v49 = vsub.f32 %v7215_v56, %v3316_v48 }
 0x2e2   : > { %v3477_v16 = vmul.f32 %v7549_v24, %v7549_v24  ;;  %9102 = vst [vmem:[#allocation12_spill] sm:$0xff] %v7565_v15  ;;  %v7571_v56 = vsub.f32 %v7240_v20, %v3317_v11  ;;  %v3318_v8 = vrot.slane %v3118_v43, 1  ;;  %v3479_v46 = vmul.f32 %v7565_v15, %v7565_v15 }
 0x2e3   : > { %9098 = vst [vmem:[#allocation8_spill] sm:$0xff] %v7537_v39  ;;  %v3476_v61 = vmul.f32 %v7537_v39, %v7537_v39  ;;  %9101 = vst [vmem:[#allocation11_spill] sm:$0xff] %v7557_v49  ;;  %v3606_v63 = vrot.slane %v3475_v33, %v7169_v59  ;;  %v3478_v28 = vmul.f32 %v7557_v49, %v7557_v49 }
 0x2e4   : > { %9103 = vst [vmem:[#allocation13_spill] sm:$0xff] %v7571_v56  ;;  %v3614_v38 = vrot.slane %v3477_v16, %v7169_v59  ;;  %v7579_v30 = vsub.f32 %v7245_v47, %v3118_v43  ;;  %v2028_v0 = vadd.f32 %v5504_v54, %v7097_v10  ;;  %v2027_v50 = vadd.f32 %v7097_v10, %v1957_v31 }
 0x2e5   : > { %v3610_v19 = vrot.slane %v3476_v61, %v7169_v59  ;;  %v3618_v29 = vrot.slane %v3478_v28, %v7169_v59  ;;  %v3480_v48 = vmul.f32 %v7571_v56, %v7571_v56  ;;  %v2011_v47 = vadd.f32 %v7097_v10, %v1877_v23 }
 0x2e6   : > { %9104 = vst [vmem:[#allocation14_spill] sm:$0xff] %v7579_v30  ;;  %v7593_v11 = vsub.f32 %v7266_v60, %v3318_v8  ;;  %v3622_v31 = vrot.slane %v3479_v46, %v7169_v59  ;;  %v7599_v28 = vmul.f32 %v7579_v30, %v7579_v30 }
 0x2e7   : > { %v3859_v6 = vsel %vm2979_vm13, %v3610_v19, %v3606_v63 }
 0x2e8   : > { %v3860_v26 = vsel %vm2981_vm14, %v3614_v38, %v3859_v6  ;;  %9105 = vst [vmem:[#allocation15_spill] sm:$0xff] %v7593_v11  ;;  %v3626_v6 = vrot.slane %v3480_v48, %v7169_v59 }
 0x2e9   : > { %v3861_v62 = vsel %vm2983_vm15, %v3618_v29, %v3860_v26 }
 0x2ea   : > { %v3862_v38 = vsel %vm2985_vm1, %v3622_v31, %v3861_v62 }
 0x31d   : > { %v5483_v53 = vpop.f32.mrb[10].mxu0 }
 0x31e   : > { %v2014_v3 = vadd.f32 %v5483_v53, %v7097_v10  ;;  %v1887_v25 = vpop.f32.mrb[11].mxu0 }
 0x31f   : > { %v2013_v54 = vadd.f32 %v7097_v10, %v1887_v25 }
 0x320   : > { %v5507_v40 = vpop.f32.mrb[10].mxu1  ;;  %v2040_v33 = vmax.f32 %v2012_v37, %v2014_v3 }
 0x321   : > { %v2030_v20 = vadd.f32 %v5507_v40, %v7097_v10  ;;  %v1967_v12 = vpop.f32.mrb[11].mxu1  ;;  %v2039_v43 = vmax.f32 %v2011_v47, %v2013_v54 }
 0x322   : > { %v2029_v7 = vadd.f32 %v7097_v10, %v1967_v12  ;;  %v2152_v23 = vcombine.high %v2040_v33, %v2040_v33  ;;  %v2159_v10 = vrot.slane %v2040_v33, %v7104_v55  ;;  %v7609_v12 = vmul.f32 %v7593_v11, %v7593_v11 }
 0x323   : > { %v2048_v61 = vmax.f32 %v2028_v0, %v2030_v20  ;;  %v2135_v46 = vcombine.high %v2039_v43, %v2039_v43  ;;  %v2142_v53 = vrot.slane %v2039_v43, %v7104_v55 }
 0x324   : > { %v2047_v19 = vmax.f32 %v2027_v50, %v2029_v7  ;;  %v2166_v40 = vrot.slane %v2152_v23, %v7104_v55  ;;  %v2167_v26 = vcombine.high %v2159_v10, %v2159_v10  ;;  %v5358_v0 = vrot.slane %v2159_v10, 9 }
 0x325   : > { %v2288_v16 = vcombine.high %v2048_v61, %v2048_v61  ;;  %v2295_v63 = vrot.slane %v2048_v61, %v7104_v55  ;;  %v7615_v7 = vsel %vm2987_vm2, %v3626_v6, %v3862_v38  ;;  %v2149_v54 = vrot.slane %v2135_v46, %v7104_v55 }
 0x326   : > { %v2271_v20 = vcombine.high %v2047_v19, %v2047_v19  ;;  %v2278_v25 = vrot.slane %v2047_v19, %v7104_v55  ;;  %v2168_v48 = vcombine.high %v2166_v40, %v2166_v40  ;;  %v5359_v62 = vrot.slane %v2167_v26, 9 }
 0x327   : > { %v2302_v60 = vrot.slane %v2288_v16, %v7104_v55  ;;  %v2303_v8 = vcombine.high %v2295_v63, %v2295_v63  ;;  %v5390_v37 = vrot.slane %v2295_v63, 9  ;;  %v5360_v33 = vrot.slane %v2166_v40, 9 }
 0x328   : > { %v7620_v31 = vmax.f32 %v2159_v10, %v5358_v0  ;;  %v2150_v16 = vcombine.high %v2142_v53, %v2142_v53  ;;  %v2151_v43 = vcombine.high %v2149_v54, %v2149_v54  ;;  %v5354_v23 = vrot.slane %v2142_v53, 9 }
 0x329   : > { %v2304_v50 = vcombine.high %v2302_v60, %v2302_v60  ;;  %v5391_v3 = vrot.slane %v2303_v8, 9  ;;  %v5392_v47 = vrot.slane %v2302_v60, 9  ;;  %v7617_v61 = vmax.f32 %v2295_v63, %v5390_v37 }
 0x32a   : > { %9106 = vst [vmem:[#allocation16_spill] sm:$0xff] %v7620_v31  ;;  %v5356_v29 = vrot.slane %v2149_v54, 9  ;;  %v2285_v13 = vrot.slane %v2271_v20, %v7104_v55  ;;  %v5355_v6 = vrot.slane %v2150_v16, 9  ;;  %v2286_v38 = vcombine.high %v2278_v25, %v2278_v25 }
 0x32b   : > { %v7623_v19 = vmax.f32 %v2303_v8, %v5391_v3  ;;  %v5386_v30 = vrot.slane %v2278_v25, 9  ;;  %v5357_v24 = vrot.slane %v2151_v43, 9  ;;  %v7625_v63 = vmax.f32 %v2142_v53, %v5354_v23 }
 0x32c   : > { %v7627_v37 = vmax.f32 %v2149_v54, %v5356_v29  ;;  %v2287_v46 = vcombine.high %v2285_v13, %v2285_v13  ;;  %v7629_v11 = vmax.f32 %v2150_v16, %v5355_v6  ;;  %v5387_v10 = vrot.slane %v2286_v38, 9 }
 0x32d   : > { %9107 = vst [vmem:[#allocation17_spill] sm:$0xff] %v7623_v19  ;;  %v5388_v0 = vrot.slane %v2285_v13, 9  ;;  %v7631_v1 = vmax.f32 %v2278_v25, %v5386_v30  ;;  %v7633_v49 = vmax.f32 %v2151_v43, %v5357_v24  ;;  %v2790_v8 = vrot.slane %v7625_v63, %v7169_v59 }
 0x32e   : > { %9108 = vst [vmem:[#allocation18_spill] sm:$0xff] %v7627_v37  ;;  %v5389_v20 = vrot.slane %v2287_v46, 9  ;;  %v5393_v3 = vrot.slane %v2304_v50, 9  ;;  %v2794_v53 = vrot.slane %v7629_v11, %v7169_v59  ;;  %v2798_v29 = vrot.slane %v7627_v37, %v7169_v59 }
 0x32f   : > { %9109 = vst [vmem:[#allocation19_spill] sm:$0xff] %v7633_v49  ;;  %v7641_v54 = vmax.f32 %v2286_v38, %v5387_v10  ;;  %v7643_v16 = vmax.f32 %v2285_v13, %v5388_v0  ;;  %v7645_v23 = vmax.f32 %v2167_v26, %v5359_v62  ;;  %v7647_v30 = vmax.f32 %v2166_v40, %v5360_v33 }
 0x330   : > { %v2802_v24 = vrot.slane %v7633_v49, %v7169_v59  ;;  %v7651_v25 = vmax.f32 %v2287_v46, %v5389_v20  ;;  %v3000_v43 = vsel %vm2979_vm13, %v2794_v53, %v2790_v8  ;;  %v2918_v6 = vrot.slane %v7631_v1, %v7169_v59 }
 0x331   : > { %9110 = vst [vmem:[#allocation20_spill] sm:$0xff] %v7645_v23  ;;  %9111 = vst [vmem:[#allocation21_spill] sm:$0xff] %v7647_v30  ;;  %v2922_v38 = vrot.slane %v7641_v54, %v7169_v59  ;;  %v2926_v13 = vrot.slane %v7643_v16, %v7169_v59  ;;  %v7660_v26 = vmax.f32 %v2302_v60, %v5392_v47  ;;  %v5361_v33 = vrot.slane %v2168_v48, 9 }
 0x332   : > { %9112 = vst [vmem:[#allocation22_spill] sm:$0xff] %v7651_v25  ;;  %v2934_v40 = vrot.slane %v7617_v61, %v7169_v59  ;;  %v2930_v62 = vrot.slane %v7651_v25, %v7169_v59  ;;  %v2806_v46 = vrot.slane %v7620_v31, %v7169_v59  ;;  %v7669_v0 = vmax.f32 %v2304_v50, %v5393_v3 }
 0x333   : > { %v3028_v10 = vsel %vm2979_vm13, %v2922_v38, %v2918_v6  ;;  %v3001_v8 = vsel %vm2981_vm14, %v2798_v29, %v3000_v43  ;;  %v7673_v60 = vmax.f32 %v2168_v48, %v5361_v33  ;;  %v2810_v47 = vrot.slane %v7645_v23, %v7169_v59 }
 0x334   : > { %9113 = vst [vmem:[#allocation23_spill] sm:$0xff] %v7669_v0  ;;  %v3029_v20 = vsel %vm2981_vm14, %v2926_v13, %v3028_v10  ;;  %v3002_v53 = vsel %vm2983_vm15, %v2802_v24, %v3001_v8  ;;  %v2938_v15 = vrot.slane %v7623_v19, %v7169_v59  ;;  %v2814_v50 = vrot.slane %v7647_v30, %v7169_v59 }
 0x335   : > { %9114 = vst [vmem:[#allocation24_spill] sm:$0xff] %v7673_v60  ;;  %v3030_v39 = vsel %vm2983_vm15, %v2930_v62, %v3029_v20  ;;  %v3003_v3 = vsel %vm2985_vm1, %v2806_v46, %v3002_v53  ;;  %v2942_v29 = vrot.slane %v7660_v26, %v7169_v59  ;;  %v2818_v43 = vrot.slane %v7673_v60, %v7169_v59 }
 0x336   : > { %v3031_v48 = vsel %vm2985_vm1, %v2934_v40, %v3030_v39  ;;  %v3004_v24 = vsel %vm2987_vm2, %v2810_v47, %v3003_v3  ;;  %v2946_v6 = vrot.slane %v7669_v0, %v7169_v59  ;;  %v9115_v39 = vrot.slane %v7599_v28, %v7169_v59 }
 0x337   : > { %v3032_v38 = vsel %vm2987_vm2, %v2938_v15, %v3031_v48  ;;  %v3005_v13 = vsel %vm2989_vm3, %v2814_v50, %v3004_v24  ;;  %v3634_v8 = vrot.slane %v7609_v12, %v7169_v59  ;;  %v2244_v28 = vrot.slane %v7434_v14, %v7104_v55 }
 0x338   : > { %v3033_v62 = vsel %vm2989_vm3, %v2942_v29, %v3032_v38  ;;  %v3006_v33 = vsel %vm2991_vm4, %v2818_v43, %v3005_v13  ;;  %v3864_v40 = vsel %vm2989_vm3, %v9115_v39, %v7615_v7  ;;  %v2237_v7 = vcombine.high %v7434_v14, %v7434_v14 }
 0x339   : > { %v3034_v46 = vsel %vm2991_vm4, %v2946_v6, %v3033_v62  ;;  %v3056_v10 = vsel %vm1632_vm11, %v3006_v33, 0.0  ;;  %v3865_v20 = vsel %vm2991_vm4, %v3634_v8, %v3864_v40  ;;  %v2252_v53 = vcombine.high %v2244_v28, %v2244_v28 }
 0x33a   : > { %v3068_v15 = vsel %vm1632_vm11, %v3034_v46, 0.0  ;;  %3057 = vadd.xlane.f32.xlu0 %v3056_v10  ;;  %v3923_v47 = vsel %vm1632_vm11, %v3865_v20, 0.0  ;;  %v2251_v12 = vrot.slane %v2237_v7, %v7104_v55  ;;  %v5378_v38 = vrot.slane %v2244_v28, 9 }
 0x33b   : > { %3069 = vadd.xlane.f32.xlu1 %v3068_v15  ;;  %v5379_v43 = vrot.slane %v2252_v53, 9  ;;  %v2254_v62 = vcombine.high %v7430_v42, %v7430_v42  ;;  %v2261_v39 = vrot.slane %v7430_v42, %v7104_v55 }
 0x33c   : > { %v2253_v6 = vcombine.high %v2251_v12, %v2251_v12  ;;  %v5380_v13 = vrot.slane %v2251_v12, 9  ;;  %v7727_v46 = vmax.f32 %v2244_v28, %v5378_v38 }
 0x33d   : > { %v7723_v14 = vmax.f32 %v2252_v53, %v5379_v43  ;;  %v2268_v8 = vrot.slane %v2254_v62, %v7104_v55  ;;  %v5382_v43 = vrot.slane %v2261_v39, 9 }
 0x33e   : > { %v5381_v40 = vrot.slane %v2253_v6, 9  ;;  %9117 = vst [vmem:[#allocation26_spill] sm:$0xff] %v7727_v46  ;;  %v7729_v10 = vmax.f32 %v2251_v12, %v5380_v13  ;;  %v2886_v53 = vrot.slane %v7727_v46, %v7169_v59 }
 0x33f   : > { %3924 = vadd.xlane.f32.xlu1 %v3923_v47  ;;  %9116 = vst [vmem:[#allocation25_spill] sm:$0xff] %v7723_v14  ;;  %v2890_v15 = vrot.slane %v7723_v14, %v7169_v59  ;;  %v2269_v47 = vcombine.high %v2261_v39, %v2261_v39  ;;  %v2270_v28 = vcombine.high %v2268_v8, %v2268_v8 }
 0x340   : > { %9118 = vst [vmem:[#allocation27_spill] sm:$0xff] %v7729_v10  ;;  %v7735_v7 = vmax.f32 %v2253_v6, %v5381_v40  ;;  %v2894_v42 = vrot.slane %v7729_v10, %v7169_v59  ;;  %v7745_v56 = vmax.f32 %v2261_v39, %v5382_v43  ;;  %v5384_v40 = vrot.slane %v2268_v8, 9 }
 0x341   : > { %v3055_v24 = vpop.xlane.xlu1 %3054  ;;  %v3021_v12 = vsel %vm2979_vm13, %v2890_v15, %v2886_v53  ;;  %v5383_v38 = vrot.slane %v2269_v47, 9  ;;  %v5385_v46 = vrot.slane %v2270_v28, 9 }
 0x342   : > { %v3076_v33 = vmul.f32 0.03125, %v3055_v24  ;;  %9119 = vst [vmem:[#allocation28_spill] sm:$0xff] %v7735_v7  ;;  %v2898_v13 = vrot.slane %v7735_v7, %v7169_v59  ;;  %9120 = vst [vmem:[#allocation29_spill] sm:$0xff] %v7745_v56  ;;  %v3022_v6 = vsel %vm2981_vm14, %v2894_v42, %v3021_v12  ;;  %v2902_v7 = vrot.slane %v7745_v56, %v7169_v59 }
 0x343   : > { %v7751_v10 = vmax.f32 %v2269_v47, %v5383_v38  ;;  %v7759_v39 = vmax.f32 %v2268_v8, %v5384_v40  ;;  %v7763_v42 = vmax.f32 %v2270_v28, %v5385_v46  ;;  %v5618_v40 = vld [vmem:[%s8986_s2] ss:$0 sm:$0xff] }
 0x344   : > { %v3125_v20 = vrot.slane %v3076_v33, %v7529_v45  ;;  %v3132_v62 = vrot.slane %v3076_v33, %v7533_v4  ;;  %v3023_v53 = vsel %vm2983_vm15, %v2898_v13, %v3022_v6  ;;  %v7767_v47 = vrot.slane %v3076_v33, %v7554_v51 }
 0x345   : > { %9122 = vst [vmem:[#allocation31_spill] sm:$0xff] %v7751_v10  ;;  %v2906_v46 = vrot.slane %v7751_v10, %v7169_v59 }
 0x346   : > { %v3319_v24 = vrot.slane %v3125_v20, 1  ;;  %v3320_v0 = vrot.slane %v3132_v62, 1  ;;  %v7754_v15 = vsub.f32 %v7468_v27, %v3125_v20  ;;  %v7770_v27 = vsub.f32 %v7470_v18, %v3132_v62 }
 0x347   : > { %v3024_v20 = vsel %vm2985_vm1, %v2902_v7, %v3023_v53 }
 0x348   : > { %v7749_v14 = vsub.f32 %v7474_v32, %v3319_v24  ;;  %9123 = vst [vmem:[#allocation32_spill] sm:$0xff] %v7754_v15  ;;  %v3139_v32 = vrot.slane %v3076_v33, %v7540_v21  ;;  %9124 = vst [vmem:[#allocation33_spill] sm:$0xff] %v7770_v27  ;;  %v7774_v12 = vsub.f32 %v7481_v58, %v3320_v0 }
 0x349   : > { %v3483_v8 = vmul.f32 %v7754_v15, %v7754_v15  ;;  %v7786_v24 = vsel %vm2987_vm2, %v2906_v46, %v3024_v20  ;;  %v3485_v38 = vmul.f32 %v7770_v27, %v7770_v27 }
 0x34a   : > { %9121 = vst [vmem:[#allocation30_spill] sm:$0xff] %v7749_v14  ;;  %v3484_v43 = vmul.f32 %v7749_v14, %v7749_v14  ;;  %9125 = vst [vmem:[#allocation34_spill] sm:$0xff] %v7774_v12  ;;  %v3321_v7 = vrot.slane %v3139_v32, 1  ;;  %v7790_v0 = vsub.f32 %v7479_v52, %v3139_v32  ;;  %v3486_v62 = vmul.f32 %v7774_v12, %v7774_v12 }
 0x34b   : > { %v3638_v6 = vrot.slane %v3483_v8, %v7169_v59  ;;  %v7807_v14 = vsub.f32 %v7493_v17, %v7767_v47 }
 0x34c   : > { %v3642_v28 = vrot.slane %v3484_v43, %v7169_v59  ;;  %9126 = vst [vmem:[#allocation35_spill] sm:$0xff] %v7790_v0 }
 0x34e   : > { %v3866_v12 = vsel %vm2979_vm13, %v3642_v28, %v3638_v6  ;;  %v3650_v28 = vrot.slane %v3486_v62, %v7169_v59 }
 0x359   : > { %v7715_v3 = vpop.f32.mrb[12].mxu0 }
 0x35a   : > { %v7719_v48 = vpop.f32.mrb[13].mxu0  ;;  %v2016_v52 = vadd.f32 %v5618_v40, %v7715_v3  ;;  %v7811_v3 = vsub.f32 %v7485_v44, %v3321_v7 }
 0x35b   : > { %v2015_v27 = vadd.f32 %v5618_v40, %v7719_v48 }
 0x35c   : > { %v7712_v50 = vpop.f32.mrb[12].mxu1  ;;  %9127 = vst [vmem:[#allocation36_spill] sm:$0xff] %v7811_v3 }
 0x35d   : > { %v7717_v29 = vpop.f32.mrb[13].mxu1  ;;  %v2032_v53 = vadd.f32 %v5618_v40, %v7712_v50  ;;  %v3646_v50 = vrot.slane %v3485_v38, %v7169_v59 }
 0x35e   : > { %v2031_v32 = vadd.f32 %v5618_v40, %v7717_v29 }
 0x35f   : > { %v3867_v6 = vsel %vm2981_vm14, %v3646_v50, %v3866_v12  ;;  %v7826_v12 = vmul.f32 %v7811_v3, %v7811_v3 }
 0x375   : > { %v5489_v43 = vpop.f32.mrb[14].mxu0 }
 0x376   : > { %v2018_v18 = vadd.f32 %v5618_v40, %v5489_v43  ;;  %v1907_v58 = vpop.f32.mrb[15].mxu0 }
 0x377   : > { %v2017_v8 = vadd.f32 %v5618_v40, %v1907_v58 }
 0x378   : > { %v5513_v13 = vpop.f32.mrb[14].mxu1 }
 0x379   : > { %v2034_v20 = vadd.f32 %v5618_v40, %v5513_v13  ;;  %v1987_v46 = vpop.f32.mrb[15].mxu1  ;;  %v2042_v13 = vmax.f32 %v2016_v52, %v2018_v18 }
 0x37a   : > { %v2033_v33 = vadd.f32 %v5618_v40, %v1987_v46  ;;  %v2041_v46 = vmax.f32 %v2015_v27, %v2017_v8  ;;  %v7832_v8 = vsel %vm2983_vm15, %v3650_v28, %v3867_v6 }
 0x37b   : > { %v2050_v15 = vmax.f32 %v2032_v53, %v2034_v20  ;;  %v2186_v48 = vcombine.high %v2042_v13, %v2042_v13  ;;  %v2193_v58 = vrot.slane %v2042_v13, %v7104_v55 }
 0x37c   : > { %v2049_v10 = vmax.f32 %v2031_v32, %v2033_v33  ;;  %v2169_v18 = vcombine.high %v2041_v46, %v2041_v46  ;;  %v2176_v53 = vrot.slane %v2041_v46, %v7104_v55 }
 0x37d   : > { %v2322_v29 = vcombine.high %v2050_v15, %v2050_v15  ;;  %v2329_v43 = vrot.slane %v2050_v15, %v7104_v55  ;;  %v2200_v33 = vrot.slane %v2186_v48, %v7104_v55  ;;  %v2201_v44 = vcombine.high %v2193_v58, %v2193_v58 }
 0x37e   : > { %v5366_v7 = vrot.slane %v2193_v58, 9  ;;  %v7822_v15 = vmul.f32 %v7790_v0, %v7790_v0  ;;  %v2305_v20 = vcombine.high %v2049_v10, %v2049_v10  ;;  %v2312_v32 = vrot.slane %v2049_v10, %v7104_v55 }
 0x37f   : > { %v2336_v17 = vrot.slane %v2322_v29, %v7104_v55  ;;  %v2337_v40 = vcombine.high %v2329_v43, %v2329_v43  ;;  %v5398_v38 = vrot.slane %v2329_v43, 9  ;;  %v2202_v62 = vcombine.high %v2200_v33, %v2200_v33 }
 0x380   : > { %v5367_v50 = vrot.slane %v2201_v44, 9  ;;  %v2183_v46 = vrot.slane %v2169_v18, %v7104_v55  ;;  %v5368_v48 = vrot.slane %v2200_v33, 9  ;;  %v7837_v0 = vmax.f32 %v2193_v58, %v5366_v7 }
 0x381   : > { %v5399_v27 = vrot.slane %v2337_v40, 9  ;;  %v7828_v52 = vcombine.high %v2336_v17, %v2336_v17  ;;  %v5400_v13 = vrot.slane %v2336_v17, 9  ;;  %v7834_v29 = vmax.f32 %v2329_v43, %v5398_v38 }
 0x382   : > { %v2184_v3 = vcombine.high %v2176_v53, %v2176_v53  ;;  %v2185_v60 = vcombine.high %v2183_v46, %v2183_v46  ;;  %v5362_v30 = vrot.slane %v2176_v53, 9  ;;  %v5364_v23 = vrot.slane %v2183_v46, 9 }
 0x383   : > { %v7839_v56 = vmax.f32 %v2337_v40, %v5399_v27  ;;  %v2319_v10 = vrot.slane %v2305_v20, %v7104_v55  ;;  %v2320_v28 = vcombine.high %v2312_v32, %v2312_v32  ;;  %v5394_v6 = vrot.slane %v2312_v32, 9 }
 0x384   : > { %v5363_v31 = vrot.slane %v2184_v3, 9  ;;  %v5369_v19 = vrot.slane %v2202_v62, 9  ;;  %v5365_v25 = vrot.slane %v2185_v60, 9  ;;  %v7842_v43 = vmax.f32 %v2176_v53, %v5362_v30 }
 0x385   : > { %v7844_v38 = vmax.f32 %v2183_v46, %v5364_v23  ;;  %v2321_v18 = vcombine.high %v2319_v10, %v2319_v10  ;;  %v5395_v40 = vrot.slane %v2320_v28, 9  ;;  %v5396_v7 = vrot.slane %v2319_v10, 9 }
 0x386   : > { %v7846_v58 = vmax.f32 %v2184_v3, %v5363_v31  ;;  %v7848_v27 = vmax.f32 %v2312_v32, %v5394_v6  ;;  %v7850_v49 = vmax.f32 %v2201_v44, %v5367_v50  ;;  %v7852_v37 = vmax.f32 %v2185_v60, %v5365_v25 }
 0x387   : > { %v2830_v20 = vrot.slane %v7844_v38, %v7169_v59  ;;  %v5397_v55 = vrot.slane %v2321_v18, 9  ;;  %v2822_v30 = vrot.slane %v7842_v43, %v7169_v59  ;;  %v7860_v31 = vmax.f32 %v2320_v28, %v5395_v40 }
 0x388   : > { %v2826_v23 = vrot.slane %v7846_v58, %v7169_v59  ;;  %v7862_v3 = vmax.f32 %v2319_v10, %v5396_v7  ;;  %v7864_v53 = vmax.f32 %v2200_v33, %v5368_v48  ;;  %v2834_v25 = vrot.slane %v7852_v37, %v7169_v59 }
 0x389   : > { %v7868_v60 = vmax.f32 %v2321_v18, %v5397_v55  ;;  %v2950_v44 = vrot.slane %v7848_v27, %v7169_v59  ;;  %v2954_v50 = vrot.slane %v7860_v31, %v7169_v59  ;;  %v7877_v10 = vmax.f32 %v2202_v62, %v5369_v19 }
 0x38a   : > { %v3007_v32 = vsel %vm2979_vm13, %v2826_v23, %v2822_v30  ;;  %v2958_v46 = vrot.slane %v7862_v3, %v7169_v59  ;;  %v2838_v33 = vrot.slane %v7837_v0, %v7169_v59  ;;  %v7881_v48 = vmax.f32 %v2336_v17, %v5400_v13 }
 0x38b   : > { %v2962_v55 = vrot.slane %v7868_v60, %v7169_v59  ;;  %v3008_v28 = vsel %vm2981_vm14, %v2830_v20, %v3007_v32  ;;  %v3035_v6 = vsel %vm2979_vm13, %v2954_v50, %v2950_v44  ;;  %v2842_v18 = vrot.slane %v7850_v49, %v7169_v59 }
 0x38c   : > { %v3009_v40 = vsel %vm2983_vm15, %v2834_v25, %v3008_v28  ;;  %v5401_v19 = vrot.slane %v7828_v52, 9  ;;  %v2966_v62 = vrot.slane %v7834_v29, %v7169_v59  ;;  %v2846_v17 = vrot.slane %v7864_v53, %v7169_v59 }
 0x38d   : > { %v3010_v13 = vsel %vm2985_vm1, %v2838_v33, %v3009_v40  ;;  %v3036_v7 = vsel %vm2981_vm14, %v2958_v46, %v3035_v6  ;;  %v2850_v20 = vrot.slane %v7877_v10, %v7169_v59  ;;  %v2970_v23 = vrot.slane %v7839_v56, %v7169_v59 }
 0x38e   : > { %v3011_v30 = vsel %vm2987_vm2, %v2842_v18, %v3010_v13  ;;  %v3037_v25 = vsel %vm2983_vm15, %v2962_v55, %v3036_v7  ;;  %v9128_v32 = vrot.slane %v7759_v39, %v7169_v59  ;;  %v3654_v33 = vrot.slane %v7822_v15, %v7169_v59 }
 0x38f   : > { %v3012_v44 = vsel %vm2989_vm3, %v2846_v17, %v3011_v30  ;;  %v3038_v46 = vsel %vm2985_vm1, %v2966_v62, %v3037_v25  ;;  %v7914_v6 = vmax.f32 %v7828_v52, %v5401_v19  ;;  %v9129_v18 = vrot.slane %v7767_v47, 1 }
 0x390   : > { %v3026_v50 = vsel %vm2989_vm3, %v9128_v32, %v7786_v24  ;;  %v3013_v28 = vsel %vm2991_vm4, %v2850_v20, %v3012_v44  ;;  %v3039_v55 = vsel %vm2987_vm2, %v2970_v23, %v3038_v46  ;;  %v2974_v24 = vrot.slane %v7881_v48, %v7169_v59  ;;  %v3064_v46 = vpop.xlane.xlu1 %3063 }
 0x391   : > { %v7920_v40 = vsub.f32 %v7499_v57, %v9129_v18  ;;  %v3059_v17 = vsel %vm1632_vm11, %v3013_v28, 0.0  ;;  %v3489_v15 = vmul.f32 %v7807_v14, %v7807_v14  ;;  %v3869_v62 = vsel %vm2985_vm1, %v3654_v33, %v7832_v8 }
 0x392   : > { %3060 = vadd.xlane.f32.xlu0 %v3059_v17  ;;  %v9130_v52 = vrot.slane %v7763_v42, %v7169_v59  ;;  %v3658_v57 = vrot.slane %v7826_v12, %v7169_v59  ;;  %v3040_v19 = vsel %vm2989_vm3, %v2974_v24, %v3039_v55  ;;  %v2978_v13 = vrot.slane %v7914_v6, %v7169_v59 }
 0x393   : > { %v3490_v7 = vmul.f32 %v7920_v40, %v7920_v40  ;;  %v3662_v30 = vrot.slane %v3489_v15, %v7169_v59  ;;  %v3079_v33 = vmul.f32 0.03125, %v3064_v46 }
 0x394   : > { %v3027_v47 = vsel %vm2991_vm4, %v9130_v52, %v3026_v50  ;;  %v3870_v20 = vsel %vm2987_vm2, %v3658_v57, %v3869_v62  ;;  %v3041_v23 = vsel %vm2991_vm4, %v2978_v13, %v3040_v19 }
 0x395   : > { %v3065_v8 = vsel %vm1632_vm11, %v3027_v47, 0.0  ;;  %v3871_v25 = vsel %vm2989_vm3, %v3662_v30, %v3870_v20  ;;  %v3666_v12 = vrot.slane %v3490_v7, %v7169_v59  ;;  %v3071_v44 = vsel %vm1632_vm11, %v3041_v23, 0.0 }
 0x396   : > { %3066 = vadd.xlane.f32.xlu0 %v3065_v8  ;;  %v3209_v28 = vrot.slane %v3079_v33, %v7529_v45  ;;  %v3216_v18 = vrot.slane %v3079_v33, %v7533_v4  ;;  %v3223_v52 = vrot.slane %v3079_v33, %v7540_v21  ;;  %v3230_v19 = vrot.slane %v3079_v33, %v7554_v51 }
 0x397   : > { %v3872_v32 = vsel %vm2991_vm4, %v3666_v12, %v3871_v25 }
 0x398   : > { %v3926_v50 = vsel %vm1632_vm11, %v3872_v32, 0.0  ;;  %v3331_v55 = vrot.slane %v3209_v28, 1  ;;  %v7955_v24 = vsub.f32 %v7372_v34, %v3209_v28  ;;  %v3332_v15 = vrot.slane %v3216_v18, 1 }
 0x399   : > { %v7961_v47 = vsub.f32 %v7376_v35, %v3216_v18  ;;  %v3333_v13 = vrot.slane %v3223_v52, 1  ;;  %v7973_v20 = vsub.f32 %v7462_v41, %v3223_v52  ;;  %v3334_v8 = vrot.slane %v3230_v19, 1 }
 0x39a   : > { %3072 = vadd.xlane.f32.xlu0 %v3071_v44  ;;  %v7952_v17 = vsub.f32 %v7374_v36, %v3331_v55  ;;  %9131 = vst [vmem:[#allocation37_spill] sm:$0xff] %v7955_v24  ;;  %v3507_v57 = vmul.f32 %v7955_v24, %v7955_v24  ;;  %v7967_v36 = vsub.f32 %v7453_v2, %v3332_v15 }
 0x39b   : > { %9132 = vst [vmem:[#allocation38_spill] sm:$0xff] %v7961_v47  ;;  %v3509_v7 = vmul.f32 %v7961_v47, %v7961_v47  ;;  %v7980_v2 = vsub.f32 %v7472_v22, %v3333_v13  ;;  %v7984_v12 = vsub.f32 %v7491_v9, %v3230_v19  ;;  %v3511_v41 = vmul.f32 %v7973_v20, %v7973_v20 }
 0x39c   : > { %v3508_v62 = vmul.f32 %v7952_v17, %v7952_v17  ;;  %9133 = vst [vmem:[#allocation39_spill] sm:$0xff] %v7967_v36  ;;  %v3734_v35 = vrot.slane %v3507_v57, %v7169_v59  ;;  %v3510_v30 = vmul.f32 %v7967_v36, %v7967_v36  ;;  %v7989_v44 = vsub.f32 %v7509_v5, %v3334_v8 }
 0x39d   : > { %v3742_v25 = vrot.slane %v3509_v7, %v7169_v59  ;;  %9134 = vst [vmem:[#allocation40_spill] sm:$0xff] %v7984_v12  ;;  %v3512_v22 = vmul.f32 %v7980_v2, %v7980_v2  ;;  %v7997_v9 = vmul.f32 %v7984_v12, %v7984_v12  ;;  %v3750_v18 = vrot.slane %v3511_v41, %v7169_v59 }
 0x39e   : > { %3927 = vadd.xlane.f32.xlu0 %v3926_v50  ;;  %v3738_v34 = vrot.slane %v3508_v62, %v7169_v59  ;;  %9135 = vst [vmem:[#allocation41_spill] sm:$0xff] %v7989_v44  ;;  %v3746_v46 = vrot.slane %v3510_v30, %v7169_v59  ;;  %v8006_v57 = vmul.f32 %v7989_v44, %v7989_v44 }
 0x39f   : > { %v3754_v41 = vrot.slane %v3512_v22, %v7169_v59 }
 0x3a0   : > { %v3887_v23 = vsel %vm2979_vm13, %v3738_v34, %v3734_v35 }
 0x3a1   : > { %v3888_v32 = vsel %vm2981_vm14, %v3742_v25, %v3887_v23 }
 0x3a2   : > { %v3889_v5 = vsel %vm2983_vm15, %v3746_v46, %v3888_v32  ;;  %v3758_v32 = vrot.slane %v7997_v9, %v7169_v59 }
 0x3a3   : > { %v3890_v30 = vsel %vm2985_vm1, %v3750_v18, %v3889_v5 }
 0x3a4   : > { %v3891_v18 = vsel %vm2987_vm2, %v3754_v41, %v3890_v30  ;;  %v9141_v30 = vld [vmem:[#allocation19_spill] sm:$0xff] }
 0x3c7   : > { %v3058_v50 = vpop.xlane.xlu0 %3057 }
 0x3c8   : > { %v3070_v33 = vpop.xlane.xlu1 %3069  ;;  %v3077_v28 = vmul.f32 0.03125, %v3058_v50 }
 0x3c9   : > { %v3081_v55 = vmul.f32 0.03125, %v3070_v33 }
 0x3ca   : > { %v3153_v15 = vrot.slane %v3077_v28, %v7529_v45  ;;  %v3160_v62 = vrot.slane %v3077_v28, %v7533_v4  ;;  %v3167_v52 = vrot.slane %v3077_v28, %v7540_v21  ;;  %v3174_v7 = vrot.slane %v3077_v28, %v7554_v51 }
 0x3cb   : > { %v3265_v19 = vrot.slane %v3081_v55, %v7529_v45  ;;  %v3272_v34 = vrot.slane %v3081_v55, %v7533_v4  ;;  %v3279_v13 = vrot.slane %v3081_v55, %v7540_v21  ;;  %v3286_v35 = vrot.slane %v3081_v55, %v7554_v51 }
 0x3cc   : > { %v3323_v8 = vrot.slane %v3153_v15, 1  ;;  %v3324_v25 = vrot.slane %v3160_v62, 1  ;;  %v3325_v33 = vrot.slane %v3167_v52, 1  ;;  %v3326_v55 = vrot.slane %v3174_v7, 1 }
 0x3cd   : > { %v3339_v23 = vrot.slane %v3265_v19, 1  ;;  %v3340_v50 = vrot.slane %v3272_v34, 1  ;;  %v3341_v46 = vrot.slane %v3279_v13, 1  ;;  %v8023_v47 = vsub.f32 %v7625_v63, %v3153_v15  ;;  %v9140_v63 = vld [vmem:[#allocation18_spill] sm:$0xff] }
 0x3ce   : > { %v3342_v5 = vrot.slane %v3286_v35, 1  ;;  %v8027_v22 = vsub.f32 %v7631_v1, %v3265_v19  ;;  %v8030_v9 = vsub.f32 %v7643_v16, %v3272_v34  ;;  %v8033_v44 = vsub.f32 %v7629_v11, %v3323_v8  ;;  %v9143_v1 = vld [vmem:[#allocation22_spill] sm:$0xff]  ;;  %v9145_v16 = vld [vmem:[#allocation17_spill] sm:$0xff]  ;;  %v9147_v11 = vld [vmem:[#allocation16_spill] sm:$0xff] }
 0x3cf   : > { %v8020_v28 = vsub.f32 %v7641_v54, %v3339_v23  ;;  %v8036_v12 = vsub.f32 %v7617_v61, %v3279_v13  ;;  %v8039_v54 = vsub.f32 %v7660_v26, %v3286_v35  ;;  %v8042_v15 = vsub.f32 %v9140_v63, %v3160_v62  ;;  %v9148_v61 = vld [vmem:[#allocation20_spill] sm:$0xff]  ;;  %v9149_v62 = vld [vmem:[#allocation21_spill] sm:$0xff] }
 0x3d0   : > { %9137 = vst [vmem:[#allocation43_spill] sm:$0xff] %v8027_v22  ;;  %9138 = vst [vmem:[#allocation44_spill] sm:$0xff] %v8030_v9  ;;  %v8045_v23 = vsub.f32 %v9141_v30, %v3324_v25  ;;  %v8048_v19 = vsub.f32 %v9143_v1, %v3340_v50  ;;  %v8051_v34 = vsub.f32 %v9145_v16, %v3341_v46  ;;  %v9150_v30 = vld [vmem:[#allocation24_spill] sm:$0xff] }
 0x3d1   : > { %9136 = vst [vmem:[#allocation42_spill] sm:$0xff] %v8020_v28  ;;  %9139 = vst [vmem:[#allocation45_spill] sm:$0xff] %v8039_v54  ;;  %v8054_v8 = vsub.f32 %v9147_v11, %v3167_v52  ;;  %v8057_v13 = vsub.f32 %v9148_v61, %v3325_v33  ;;  %v3524_v26 = vmul.f32 %v8020_v28, %v8020_v28 }
 0x3d2   : > { %9142 = vst [vmem:[#allocation18_spill] sm:$0xff] %v8045_v23  ;;  %9144 = vst [vmem:[#allocation19_spill] sm:$0xff] %v8048_v19  ;;  %v8062_v35 = vsub.f32 %v9149_v62, %v3174_v7  ;;  %v3491_v25 = vmul.f32 %v8023_v47, %v8023_v47  ;;  %v3492_v41 = vmul.f32 %v8033_v44, %v8033_v44 }
 0x3d3   : > { %9146 = vst [vmem:[#allocation22_spill] sm:$0xff] %v8051_v34  ;;  %v3523_v50 = vmul.f32 %v8027_v22, %v8027_v22  ;;  %v3493_v52 = vmul.f32 %v8042_v15, %v8042_v15  ;;  %v3494_v46 = vmul.f32 %v8045_v23, %v8045_v23  ;;  %v3495_v33 = vmul.f32 %v8054_v8, %v8054_v8  ;;  %v9152_v22 = vld [vmem:[#allocation23_spill] sm:$0xff] }
 0x3d4   : > { %v3670_v7 = vrot.slane %v3491_v25, %v7169_v59  ;;  %v3674_v63 = vrot.slane %v3492_v41, %v7169_v59  ;;  %v8079_v1 = vsub.f32 %v9150_v30, %v3326_v55  ;;  %v3496_v16 = vmul.f32 %v8057_v13, %v8057_v13 }
 0x3d5   : > { %v3525_v11 = vmul.f32 %v8030_v9, %v8030_v9  ;;  %v3526_v61 = vmul.f32 %v8048_v19, %v8048_v19  ;;  %v3678_v62 = vrot.slane %v3493_v52, %v7169_v59  ;;  %v3497_v36 = vmul.f32 %v8062_v35, %v8062_v35 }
 0x3d6   : > { %9151 = vst [vmem:[#allocation17_spill] sm:$0xff] %v8079_v1  ;;  %v3802_v25 = vrot.slane %v3524_v26, %v7169_v59  ;;  %v3498_v55 = vmul.f32 %v8079_v1, %v8079_v1  ;;  %v3682_v41 = vrot.slane %v3494_v46, %v7169_v59  ;;  %v3873_v30 = vsel %vm2979_vm13, %v3674_v63, %v3670_v7  ;;  %v9196_v1 = vld [vmem:[#allocation14_spill] sm:$0xff] }
 0x3d7   : > { %v3527_v9 = vmul.f32 %v8036_v12, %v8036_v12  ;;  %v3798_v23 = vrot.slane %v3523_v50, %v7169_v59  ;;  %v3686_v19 = vrot.slane %v3495_v33, %v7169_v59  ;;  %v3874_v52 = vsel %vm2981_vm14, %v3678_v62, %v3873_v30 }
 0x3d8   : > { %v3690_v28 = vrot.slane %v3496_v16, %v7169_v59  ;;  %v3875_v26 = vsel %vm2983_vm15, %v3682_v41, %v3874_v52  ;;  %v8103_v24 = vsub.f32 %v9152_v22, %v3342_v5  ;;  %v3528_v46 = vmul.f32 %v8051_v34, %v8051_v34 }
 0x3d9   : > { %v3806_v7 = vrot.slane %v3525_v11, %v7169_v59  ;;  %v3694_v63 = vrot.slane %v3497_v36, %v7169_v59  ;;  %v3876_v50 = vsel %vm2985_vm1, %v3686_v19, %v3875_v26  ;;  %v3529_v33 = vmul.f32 %v8039_v54, %v8039_v54  ;;  %v9192_v54 = vld [vmem:[#allocation11_spill] sm:$0xff] }
 0x3da   : > { %9153 = vst [vmem:[#allocation16_spill] sm:$0xff] %v8103_v24  ;;  %v3698_v62 = vrot.slane %v3498_v55, %v7169_v59  ;;  %v3877_v16 = vsel %vm2987_vm2, %v3690_v28, %v3876_v50  ;;  %v3810_v41 = vrot.slane %v3526_v61, %v7169_v59  ;;  %v3901_v5 = vsel %vm2979_vm13, %v3802_v25, %v3798_v23 }
 0x3db   : > { %v3878_v22 = vsel %vm2989_vm3, %v3694_v63, %v3877_v16  ;;  %v3892_v30 = vsel %vm2989_vm3, %v3758_v32, %v3891_v18  ;;  %v3814_v11 = vrot.slane %v3527_v9, %v7169_v59  ;;  %v3902_v36 = vsel %vm2981_vm14, %v3806_v7, %v3901_v5 }
 0x3dc   : > { %v3879_v19 = vsel %vm2991_vm4, %v3698_v62, %v3878_v22  ;;  %v3530_v52 = vmul.f32 %v8103_v24, %v8103_v24  ;;  %v3818_v55 = vrot.slane %v3528_v46, %v7169_v59  ;;  %v3903_v28 = vsel %vm2983_vm15, %v3810_v41, %v3902_v36 }
 0x3dd   : > { %v3929_v61 = vsel %vm1632_vm11, %v3879_v19, 0.0  ;;  %v3822_v23 = vrot.slane %v3529_v33, %v7169_v59  ;;  %v3904_v25 = vsel %vm2985_vm1, %v3814_v11, %v3903_v28  ;;  %v9154_v32 = vrot.slane %v8006_v57, %v7169_v59 }
 0x3de   : > { %3930 = vadd.xlane.f32.xlu1 %v3929_v61  ;;  %v3905_v9 = vsel %vm2987_vm2, %v3818_v55, %v3904_v25  ;;  %v3826_v46 = vrot.slane %v3530_v52, %v7169_v59 }
 0x3df   : > { %v3893_v18 = vsel %vm2991_vm4, %v9154_v32, %v3892_v30  ;;  %v3906_v26 = vsel %vm2989_vm3, %v3822_v23, %v3905_v9 }
 0x3e0   : > { %v3935_v7 = vsel %vm1632_vm11, %v3893_v18, 0.0  ;;  %v3907_v63 = vsel %vm2991_vm4, %v3826_v46, %v3906_v26  ;;  %v9161_v46 = vld [vmem:[#allocation26_spill] sm:$0xff] }
 0x3e1   : > { %v3941_v50 = vsel %vm1632_vm11, %v3907_v63, 0.0 }
 0x3e2   : > { %3936 = vadd.xlane.f32.xlu1 %v3935_v7 }
 0x3e6   : > { %3942 = vadd.xlane.f32.xlu1 %v3941_v50 }
 0x41f   : > { %v3061_v33 = vpop.xlane.xlu0 %3060 }
 0x420   : > { %v3078_v62 = vmul.f32 0.03125, %v3061_v33 }
 0x422   : > { %v3181_v57 = vrot.slane %v3078_v62, %v7529_v45  ;;  %v3188_v16 = vrot.slane %v3078_v62, %v7533_v4  ;;  %v3195_v41 = vrot.slane %v3078_v62, %v7540_v21  ;;  %v3202_v5 = vrot.slane %v3078_v62, %v7554_v51 }
 0x423   : > { %v3067_v22 = vpop.xlane.xlu0 %3066 }
 0x424   : > { %v3327_v30 = vrot.slane %v3181_v57, 1  ;;  %v3328_v11 = vrot.slane %v3188_v16, 1  ;;  %v8143_v36 = vsub.f32 %v7842_v43, %v3181_v57  ;;  %v8146_v19 = vsub.f32 %v7844_v38, %v3188_v16 }
 0x425   : > { %v3080_v55 = vmul.f32 0.03125, %v3067_v22  ;;  %v3329_v28 = vrot.slane %v3195_v41, 1  ;;  %v3330_v61 = vrot.slane %v3202_v5, 1  ;;  %v8152_v23 = vsub.f32 %v7837_v0, %v3195_v41  ;;  %v9165_v41 = vld [vmem:[#allocation25_spill] sm:$0xff]  ;;  %v9167_v22 = vld [vmem:[#allocation27_spill] sm:$0xff] }
 0x426   : > { %9155 = vst [vmem:[#allocation20_spill] sm:$0xff] %v8143_v36  ;;  %9156 = vst [vmem:[#allocation21_spill] sm:$0xff] %v8146_v19  ;;  %v8149_v52 = vsub.f32 %v7846_v58, %v3327_v30  ;;  %v8155_v25 = vsub.f32 %v7852_v37, %v3328_v11  ;;  %v8158_v32 = vsub.f32 %v7864_v53, %v3202_v5  ;;  %v9169_v11 = vld [vmem:[#allocation29_spill] sm:$0xff] }
 0x427   : > { %9158 = vst [vmem:[#allocation23_spill] sm:$0xff] %v8152_v23  ;;  %v3237_v43 = vrot.slane %v3080_v55, %v7529_v45  ;;  %v3244_v38 = vrot.slane %v3080_v55, %v7533_v4  ;;  %v3499_v58 = vmul.f32 %v8143_v36, %v8143_v36  ;;  %v3501_v0 = vmul.f32 %v8146_v19, %v8146_v19  ;;  %v3073_v63 = vpop.xlane.xlu0 %3072  ;;  %v9191_v36 = vld [vmem:[#allocation34_spill] sm:$0xff] }
 0x428   : > { %9157 = vst [vmem:[#allocation24_spill] sm:$0xff] %v8149_v52  ;;  %9159 = vst [vmem:[#allocation46_spill] sm:$0xff] %v8155_v25  ;;  %v3500_v18 = vmul.f32 %v8149_v52, %v8149_v52  ;;  %v3251_v9 = vrot.slane %v3080_v55, %v7540_v21  ;;  %v3258_v37 = vrot.slane %v3080_v55, %v7554_v51 }
 0x429   : > { %9160 = vst [vmem:[#allocation47_spill] sm:$0xff] %v8158_v32  ;;  %v3335_v26 = vrot.slane %v3237_v43, 1  ;;  %v3336_v53 = vrot.slane %v3244_v38, 1  ;;  %v8171_v7 = vsub.f32 %v9161_v46, %v3237_v43  ;;  %v8174_v50 = vsub.f32 %v7850_v49, %v3329_v28  ;;  %v9171_v46 = vld [vmem:[#allocation28_spill] sm:$0xff] }
 0x42a   : > { %v3503_v33 = vmul.f32 %v8152_v23, %v8152_v23  ;;  %v3337_v62 = vrot.slane %v3251_v9, 1  ;;  %v8179_v57 = vsub.f32 %v7877_v10, %v3330_v61  ;;  %v3502_v16 = vmul.f32 %v8155_v25, %v8155_v25 }
 0x42b   : > { %9162 = vst [vmem:[#allocation26_spill] sm:$0xff] %v8171_v7  ;;  %9163 = vst [vmem:[#allocation48_spill] sm:$0xff] %v8174_v50  ;;  %v8184_v5 = vsub.f32 %v9165_v41, %v3335_v26  ;;  %v8187_v30 = vsub.f32 %v9167_v22, %v3244_v38  ;;  %v8190_v55 = vsub.f32 %v9169_v11, %v3251_v9  ;;  %v3082_v10 = vmul.f32 0.03125, %v3073_v63  ;;  %v9174_v41 = vld [vmem:[#allocation31_spill] sm:$0xff] }
 0x42c   : > { %9164 = vst [vmem:[#allocation49_spill] sm:$0xff] %v8179_v57  ;;  %v3702_v49 = vrot.slane %v3499_v58, %v7169_v59  ;;  %v3706_v28 = vrot.slane %v3500_v18, %v7169_v59  ;;  %v3710_v43 = vrot.slane %v3501_v0, %v7169_v59  ;;  %v3338_v61 = vrot.slane %v3258_v37, 1 }
 0x42d   : > { %9166 = vst [vmem:[#allocation25_spill] sm:$0xff] %v8184_v5  ;;  %9168 = vst [vmem:[#allocation27_spill] sm:$0xff] %v8187_v30  ;;  %v8196_v52 = vsub.f32 %v9171_v46, %v3336_v53  ;;  %v8199_v26 = vsub.f32 %v7759_v39, %v3258_v37  ;;  %v3515_v38 = vmul.f32 %v8171_v7, %v8171_v7 }
 0x42e   : > { %9170 = vst [vmem:[#allocation29_spill] sm:$0xff] %v8190_v55  ;;  %v8204_v9 = vsub.f32 %v9174_v41, %v3337_v62  ;;  %v3293_v58 = vrot.slane %v3082_v10, %v7529_v45  ;;  %v3300_v18 = vrot.slane %v3082_v10, %v7533_v4  ;;  %v3307_v0 = vrot.slane %v3082_v10, %v7540_v21 }
 0x42f   : > { %9172 = vst [vmem:[#allocation28_spill] sm:$0xff] %v8196_v52  ;;  %9173 = vst [vmem:[#allocation50_spill] sm:$0xff] %v8199_v26  ;;  %v3516_v63 = vmul.f32 %v8184_v5, %v8184_v5  ;;  %v3517_v53 = vmul.f32 %v8187_v30, %v8187_v30  ;;  %v3519_v39 = vmul.f32 %v8190_v55, %v8190_v55 }
 0x430   : > { %9175 = vst [vmem:[#allocation31_spill] sm:$0xff] %v8204_v9  ;;  %v3314_v37 = vrot.slane %v3082_v10, %v7554_v51  ;;  %v3343_v22 = vrot.slane %v3293_v58, 1  ;;  %v3344_v62 = vrot.slane %v3300_v18, 1  ;;  %v3345_v11 = vrot.slane %v3307_v0, 1 }
 0x431   : > { %v8217_v46 = vsub.f32 %v7848_v27, %v3293_v58  ;;  %v3518_v41 = vmul.f32 %v8196_v52, %v8196_v52  ;;  %v3766_v7 = vrot.slane %v3515_v38, %v7169_v59  ;;  %v8223_v5 = vsub.f32 %v7862_v3, %v3300_v18 }
 0x432   : > { %v8226_v30 = vsub.f32 %v7834_v29, %v3307_v0  ;;  %v8229_v55 = vsub.f32 %v7860_v31, %v3343_v22  ;;  %v8232_v10 = vsub.f32 %v7868_v60, %v3344_v62  ;;  %v3504_v58 = vmul.f32 %v8174_v50, %v8174_v50 }
 0x433   : > { %9176 = vst [vmem:[#allocation51_spill] sm:$0xff] %v8217_v46  ;;  %9177 = vst [vmem:[#allocation52_spill] sm:$0xff] %v8223_v5  ;;  %v3531_v27 = vmul.f32 %v8217_v46, %v8217_v46  ;;  %v3770_v38 = vrot.slane %v3516_v63, %v7169_v59  ;;  %v3774_v3 = vrot.slane %v3517_v53, %v7169_v59  ;;  %v3346_v18 = vrot.slane %v3314_v37, 1  ;;  %v9188_v46 = vld [vmem:[#allocation8_spill] sm:$0xff] }
 0x434   : > { %9178 = vst [vmem:[#allocation53_spill] sm:$0xff] %v8226_v30  ;;  %9179 = vst [vmem:[#allocation54_spill] sm:$0xff] %v8229_v55  ;;  %v8241_v29 = vsub.f32 %v7881_v48, %v3314_v37  ;;  %v8244_v31 = vsub.f32 %v7839_v56, %v3345_v11  ;;  %v3532_v60 = vmul.f32 %v8229_v55, %v8229_v55 }
 0x435   : > { %9180 = vst [vmem:[#allocation55_spill] sm:$0xff] %v8232_v10  ;;  %v3533_v0 = vmul.f32 %v8223_v5, %v8223_v5  ;;  %v3505_v22 = vmul.f32 %v8158_v32, %v8158_v32  ;;  %v3534_v63 = vmul.f32 %v8232_v10, %v8232_v10  ;;  %v3535_v53 = vmul.f32 %v8226_v30, %v8226_v30  ;;  %v9190_v32 = vld [vmem:[#allocation12_spill] sm:$0xff] }
 0x436   : > { %9181 = vst [vmem:[#allocation56_spill] sm:$0xff] %v8241_v29  ;;  %9182 = vst [vmem:[#allocation57_spill] sm:$0xff] %v8244_v31  ;;  %v3830_v48 = vrot.slane %v3531_v27, %v7169_v59  ;;  %v3506_v56 = vmul.f32 %v8179_v57, %v8179_v57  ;;  %v3714_v37 = vrot.slane %v3502_v16, %v7169_v59 }
 0x437   : > { %v3718_v62 = vrot.slane %v3503_v33, %v7169_v59  ;;  %v3722_v11 = vrot.slane %v3504_v58, %v7169_v59  ;;  %v3880_v52 = vsel %vm2979_vm13, %v3706_v28, %v3702_v49  ;;  %v3834_v5 = vrot.slane %v3532_v60, %v7169_v59 }
 0x438   : > { %v3881_v10 = vsel %vm2981_vm14, %v3710_v43, %v3880_v52  ;;  %v8266_v55 = vsub.f32 %v7763_v42, %v3338_v61  ;;  %v3520_v27 = vmul.f32 %v8204_v9, %v8204_v9  ;;  %v3726_v57 = vrot.slane %v3505_v22, %v7169_v59  ;;  %v9189_v9 = vld [vmem:[#allocation30_spill] sm:$0xff] }
 0x439   : > { %v3882_v16 = vsel %vm2983_vm15, %v3714_v37, %v3881_v10  ;;  %v3521_v33 = vmul.f32 %v8199_v26, %v8199_v26  ;;  %v3894_v58 = vsel %vm2979_vm13, %v3770_v38, %v3766_v7  ;;  %v3730_v49 = vrot.slane %v3506_v56, %v7169_v59 }
 0x43a   : > { %9183 = vst [vmem:[#allocation58_spill] sm:$0xff] %v8266_v55  ;;  %v3883_v28 = vsel %vm2985_vm1, %v3718_v62, %v3882_v16  ;;  %v3522_v42 = vmul.f32 %v8266_v55, %v8266_v55  ;;  %v3778_v52 = vrot.slane %v3518_v41, %v7169_v59  ;;  %v3782_v61 = vrot.slane %v3519_v39, %v7169_v59 }
 0x43b   : > { %v3884_v43 = vsel %vm2987_vm2, %v3722_v11, %v3883_v28  ;;  %v3895_v10 = vsel %vm2981_vm14, %v3774_v3, %v3894_v58  ;;  %v8284_v60 = vsub.f32 %v7914_v6, %v3346_v18  ;;  %v3838_v7 = vrot.slane %v3533_v0, %v7169_v59 }
 0x43c   : > { %v3885_v38 = vsel %vm2989_vm3, %v3726_v57, %v3884_v43  ;;  %v3786_v22 = vrot.slane %v3520_v27, %v7169_v59  ;;  %v3896_v56 = vsel %vm2983_vm15, %v3778_v52, %v3895_v10  ;;  %v3790_v41 = vrot.slane %v3521_v33, %v7169_v59 }
 0x43d   : > { %9184 = vst [vmem:[#allocation59_spill] sm:$0xff] %v8284_v60  ;;  %v3886_v37 = vsel %vm2991_vm4, %v3730_v49, %v3885_v38  ;;  %v3897_v62 = vsel %vm2985_vm1, %v3782_v61, %v3896_v56  ;;  %v3536_v39 = vmul.f32 %v8244_v31, %v8244_v31  ;;  %v3794_v3 = vrot.slane %v3522_v42, %v7169_v59  ;;  %v3928_v38 = vpop.xlane.xlu0 %3927 }
 0x43e   : > { %v3932_v6 = vsel %vm1632_vm11, %v3886_v37, 0.0  ;;  %v3898_v18 = vsel %vm2987_vm2, %v3786_v22, %v3897_v62  ;;  %v3537_v57 = vmul.f32 %v8241_v29, %v8241_v29  ;;  %v3538_v11 = vmul.f32 %v8284_v60, %v8284_v60  ;;  %v9186_v29 = vld [vmem:[#allocation13_spill] sm:$0xff] }
 0x43f   : > { %3933 = vadd.xlane.f32.xlu0 %v3932_v6  ;;  %v3899_v0 = vsel %vm2989_vm3, %v3790_v41, %v3898_v18  ;;  %v3842_v27 = vrot.slane %v3534_v63, %v7169_v59  ;;  %v3908_v16 = vsel %vm2979_vm13, %v3834_v5, %v3830_v48  ;;  %v3846_v58 = vrot.slane %v3535_v53, %v7169_v59 }
 0x440   : > { %v3900_v33 = vsel %vm2991_vm4, %v3794_v3, %v3899_v0  ;;  %v3909_v49 = vsel %vm2981_vm14, %v3838_v7, %v3908_v16  ;;  %v3850_v42 = vrot.slane %v3536_v39, %v7169_v59  ;;  %v3854_v43 = vrot.slane %v3537_v57, %v7169_v59  ;;  %v3925_v7 = vpop.xlane.xlu1 %3924  ;;  %v5403_v39 = vld [vmem:[%s8988_s4] ss:$0 sm:$0xff]  ;;  %v9185_v0 = vld [vmem:[#allocation7_spill] sm:$0xff] }
 0x441   : > { %v3938_v28 = vsel %vm1632_vm11, %v3900_v33, 0.0  ;;  %v3910_v52 = vsel %vm2983_vm15, %v3842_v27, %v3909_v49  ;;  %v3858_v63 = vrot.slane %v3538_v11, %v7169_v59  ;;  %v3947_v22 = vmul.f32 0.03125, %v3925_v7  ;;  %v5402_v59 = vld [vmem:[%s8987_s3] ss:$0 sm:$0xff] }
 0x442   : > { %v3911_v61 = vsel %vm2985_vm1, %v3846_v58, %v3910_v52  ;;  %v3948_v56 = vmul.f32 0.03125, %v3928_v38  ;;  %v4369_v62 = vcombine.high %v5402_v59, %v5402_v59  ;;  %v4468_v18 = vcombine.high %v5403_v39, %v5403_v39 }
 0x443   : > { %3939 = vadd.xlane.f32.xlu0 %v3938_v28  ;;  %v3912_v5 = vsel %vm2987_vm2, %v3850_v42, %v3911_v61  ;;  %v3955_v37 = vadd.f32 1e-05, %v3947_v22  ;;  %v8329_v27 = vrot.slane %v5402_v59, %v9185_v0  ;;  %v8335_v28 = vrot.slane %v5403_v39, %v9185_v0 }
 0x444   : > { %v3913_v48 = vsel %vm2989_vm3, %v3854_v43, %v3912_v5  ;;  %v3956_v41 = vadd.f32 1e-05, %v3948_v56  ;;  %v8326_v11 = vrot.slane %v4369_v62, %v9185_v0  ;;  %v8342_v43 = vrot.slane %v4468_v18, %v9185_v0  ;;  %v9187_v0 = vld [vmem:[#allocation36_spill] sm:$0xff] }
 0x445   : > { %v3914_v53 = vsel %vm2991_vm4, %v3858_v63, %v3913_v48  ;;  %5584 = vrsqrt.f32 %v3955_v37  ;;  %v8347_v48 = vcombine.high %v8329_v27, %v8329_v27  ;;  %v8352_v22 = vcombine.high %v8335_v28, %v8335_v28 }
 0x446   : > { %v3944_v10 = vsel %vm1632_vm11, %v3914_v53, 0.0  ;;  %5586 = vrsqrt.f32 %v3956_v41  ;;  %v8339_v52 = vrot.slane %v8326_v11, 1  ;;  %v8355_v56 = vrot.slane %v8329_v27, 1 }
 0x447   : > { %3945 = vadd.xlane.f32.xlu0 %v3944_v10  ;;  %v8360_v59 = vcombine.high %v8326_v11, %v8326_v11  ;;  %v8363_v62 = vrot.slane %v8342_v43, 1  ;;  %v8366_v39 = vrot.slane %v8335_v28, 1  ;;  %v8370_v18 = vcombine.high %v8342_v43, %v8342_v43 }
 0x448   : > { %v8380_v50 = vrot.slane %v8352_v22, 1 }
 0x44f   : > { %v5585_v6 = vpop.eup %5584 }
 0x450   : > { %v5587_v3 = vpop.eup %5586  ;;  %v3999_v57 = vrot.slane %v5585_v6, %v7540_v21  ;;  %v3985_v58 = vrot.slane %v5585_v6, %v7529_v45  ;;  %v3992_v61 = vrot.slane %v5585_v6, %v7533_v4  ;;  %v4006_v53 = vrot.slane %v5585_v6, %v7554_v51 }
 0x451   : > { %v4027_v33 = vrot.slane %v5587_v3, %v7540_v21  ;;  %v4013_v49 = vrot.slane %v5587_v3, %v7529_v45  ;;  %v4020_v42 = vrot.slane %v5587_v3, %v7533_v4  ;;  %v4034_v41 = vrot.slane %v5587_v3, %v7554_v51 }
 0x452   : > { %v4205_v5 = vrot.slane %v3999_v57, 1  ;;  %v4203_v7 = vrot.slane %v3985_v58, 1  ;;  %v4204_v6 = vrot.slane %v3992_v61, 1  ;;  %v8374_v3 = vrot.slane %v8347_v48, 1 }
 0x453   : > { %v4209_v10 = vrot.slane %v4027_v33, 1  ;;  %v4207_v38 = vrot.slane %v4013_v49, 1  ;;  %v4208_v37 = vrot.slane %v4020_v42, 1  ;;  %v4206_v26 = vrot.slane %v4006_v53, 1 }
 0x454   : > { %v4304_v55 = vmul.f32 %v4205_v5, %v9186_v29  ;;  %v4300_v30 = vmul.f32 %v4203_v7, %v9188_v46  ;;  %v4303_v19 = vmul.f32 %v3999_v57, %v9190_v32  ;;  %v4210_v23 = vrot.slane %v4034_v41, 1  ;;  %v9193_v46 = vld [vmem:[#allocation9_spill] sm:$0xff]  ;;  %v9194_v7 = vld [vmem:[#allocation15_spill] sm:$0xff] }
 0x455   : > { %v4312_v31 = vmul.f32 %v4209_v10, %v9187_v0  ;;  %v4308_v25 = vmul.f32 %v4207_v38, %v9189_v9  ;;  %v8385_v29 = vrot.slane %v8360_v59, 1  ;;  %v4302_v24 = vmul.f32 %v4204_v6, %v9192_v54 }
 0x456   : > { %v8389_v0 = vrot.slane %v8370_v18, 1  ;;  %v4403_v9 = vmul.f32 %v8339_v52, %v4304_v55  ;;  %v4299_v10 = vmul.f32 %v3985_v58, %v9193_v46  ;;  %v4306_v38 = vmul.f32 %v4206_v26, %v9194_v7  ;;  %v9197_v46 = vld [vmem:[#allocation35_spill] sm:$0xff]  ;;  %v9198_v7 = vld [vmem:[#allocation32_spill] sm:$0xff] }
 0x457   : > { %v4411_v32 = vmul.f32 %v8339_v52, %v4312_v31  ;;  %v4407_v57 = vmul.f32 %v8355_v56, %v4308_v25  ;;  %v4402_v54 = vmul.f32 %v8326_v11, %v4303_v19  ;;  %v4314_v55 = vmul.f32 %v4210_v23, %v7920_v40 }
 0x458   : > { %v4311_v26 = vmul.f32 %v4027_v33, %v9197_v46  ;;  %v4307_v31 = vmul.f32 %v4013_v49, %v9198_v7  ;;  %v4502_v25 = vadd.f32 %v8363_v62, %v4403_v9 }
 0x459   : > { %v4506_v23 = vadd.f32 %v8366_v39, %v4407_v57 }
 0x45a   : > { %v4406_v9 = vmul.f32 %v8329_v27, %v4307_v31 }
 0x46b   : > { %v3931_v16 = vpop.xlane.xlu1 %3930 }
 0x46c   : > { %v3949_v63 = vmul.f32 0.03125, %v3931_v16 }
 0x46e   : > { %v3957_v16 = vadd.f32 1e-05, %v3949_v63  ;;  %v4310_v63 = vmul.f32 %v4208_v37, %v9191_v36  ;;  %v4399_v36 = vmul.f32 %v8355_v56, %v4300_v30  ;;  %v9195_v37 = vld [vmem:[#allocation10_spill] sm:$0xff]  ;;  %v4401_v30 = vmul.f32 %v8374_v3, %v4302_v24 }
 0x46f   : > { %v3937_v60 = vpop.xlane.xlu1 %3936 }
 0x470   : > { %v3951_v5 = vmul.f32 0.03125, %v3937_v60  ;;  %5588 = vrsqrt.f32 %v3957_v16  ;;  %v4301_v60 = vmul.f32 %v3992_v61, %v9195_v37  ;;  %v4409_v6 = vmul.f32 %v8374_v3, %v4310_v63  ;;  %v9199_v37 = vld [vmem:[#allocation33_spill] sm:$0xff] }
 0x471   : > { %v4305_v16 = vmul.f32 %v4006_v53, %v9196_v1  ;;  %v4398_v61 = vmul.f32 %v8329_v27, %v4299_v10  ;;  %v4309_v19 = vmul.f32 %v4020_v42, %v9199_v37  ;;  %v4405_v63 = vmul.f32 %v8385_v29, %v4306_v38 }
 0x472   : > { %v3959_v34 = vadd.f32 1e-05, %v3951_v5  ;;  %v4510_v1 = vadd.f32 %v8363_v62, %v4411_v32  ;;  %v4498_v40 = vadd.f32 %v8366_v39, %v4399_v36  ;;  %v4400_v33 = vmul.f32 %v8347_v48, %v4301_v60 }
 0x473   : > { %v3943_v58 = vpop.xlane.xlu1 %3942  ;;  %v4508_v49 = vadd.f32 %v8380_v50, %v4409_v6  ;;  %v4404_v24 = vmul.f32 %v8360_v59, %v4305_v16  ;;  %v4413_v5 = vmul.f32 %v8385_v29, %v4314_v55  ;;  %v4410_v42 = vmul.f32 %v8326_v11, %v4311_v26 }
 0x474   : > { %v3953_v53 = vmul.f32 0.03125, %v3943_v58  ;;  %5590 = vrsqrt.f32 %v3959_v34  ;;  %v4500_v10 = vadd.f32 %v8380_v50, %v4401_v30  ;;  %v4641_v38 = vrot.slane %v4502_v25, 7 }
 0x475   : > { %v4408_v32 = vmul.f32 %v8347_v48, %v4309_v19  ;;  %v4313_v36 = vmul.f32 %v4034_v41, %v7807_v14  ;;  %v4504_v57 = vadd.f32 %v8389_v0, %v4405_v63  ;;  %v4501_v60 = vadd.f32 %v8342_v43, %v4402_v54 }
 0x476   : > { %v4669_v6 = vrot.slane %v4510_v1, 7  ;;  %v4627_v16 = vrot.slane %v4498_v40, 7  ;;  %v4655_v58 = vrot.slane %v4506_v23, 7  ;;  %v3961_v34 = vadd.f32 1e-05, %v3953_v53 }
 0x477   : > { %v4497_v46 = vadd.f32 %v8335_v28, %v4398_v61  ;;  %v4662_v26 = vrot.slane %v4508_v49, 7  ;;  %v4512_v7 = vadd.f32 %v8389_v0, %v4413_v5  ;;  %v4509_v31 = vadd.f32 %v8342_v43, %v4410_v42 }
 0x478   : > { %v4505_v30 = vadd.f32 %v8335_v28, %v4406_v9  ;;  %v4499_v14 = vadd.f32 %v8352_v22, %v4400_v33  ;;  %v4634_v41 = vrot.slane %v4500_v10, 7  ;;  %v4642_v54 = vsel %vm2979_vm13, %v4641_v38, %v4501_v60 }
 0x479   : > { %v4507_v25 = vadd.f32 %v8352_v22, %v4408_v32  ;;  %v4412_v37 = vmul.f32 %v8360_v59, %v4313_v36  ;;  %v4648_v19 = vrot.slane %v4504_v57, 7  ;;  %v4670_v63 = vsel %vm2979_vm13, %v4669_v6, %v4509_v31 }
 0x47a   : > { %v8423_v55 = vpop.eup %5588  ;;  %v4628_v1 = vsel %vm2979_vm13, %v4627_v16, %v4497_v46  ;;  %v4656_v40 = vsel %vm2979_vm13, %v4655_v58, %v4505_v30  ;;  %5592 = vrsqrt.f32 %v3961_v34  ;;  %v5697_v23 = vmov 1934713408  }
 0x47b   : > { %v4055_v61 = vrot.slane %v8423_v55, %v7540_v21  ;;  %v4883_v33 = vunpack.c.l.s4 %v5697_v23  ;;  %v4663_v53 = vsel %vm2979_vm13, %v4662_v26, %v4507_v25  ;;  %v4676_v49 = vrot.slane %v4512_v7, 7 }
 0x47c   : > { %v4643_v5 = vsel %vm2983_vm15, %v4641_v38, %v4642_v54  ;;  %v4635_v42 = vsel %vm2979_vm13, %v4634_v41, %v4499_v14  ;;  %v4503_v9 = vadd.f32 %v8370_v18, %v4404_v24  ;;  %v4671_v10 = vsel %vm2983_vm15, %v4669_v6, %v4670_v63 }
 0x47d   : > { %v4629_v32 = vsel %vm2983_vm15, %v4627_v16, %v4628_v1  ;;  %v4657_v36 = vsel %vm2983_vm15, %v4655_v58, %v4656_v40  ;;  %v4511_v57 = vadd.f32 %v8370_v18, %v4412_v37  ;;  %v4213_v34 = vrot.slane %v4055_v61, 1 }
 0x47e   : > { %v8446_v60 = vpop.eup %5590  ;;  %v4664_v46 = vsel %vm2983_vm15, %v4662_v26, %v4663_v53  ;;  %v4649_v7 = vsel %vm2979_vm13, %v4648_v19, %v4503_v9  ;;  %v4884_v31 = vunpack.c.0.s8 %v4883_v33  ;;  %v4636_v30 = vsel %vm2983_vm15, %v4634_v41, %v4635_v42  ;;  %v9200_v9 = vld [vmem:[#allocation6_spill] sm:$0xff] }
 0x47f   : > { %v4677_v24 = vsel %vm2979_vm13, %v4676_v49, %v4511_v57  ;;  %v4644_v14 = vsel %vm2987_vm2, %v4641_v38, %v4643_v5  ;;  %v4672_v54 = vsel %vm2987_vm2, %v4669_v6, %v4671_v10  ;;  %v4630_v25 = vsel %vm2987_vm2, %v4627_v16, %v4629_v32 }
 0x480   : > { %v4658_v37 = vsel %vm2987_vm2, %v4655_v58, %v4657_v36  ;;  %v4111_v63 = vrot.slane %v8446_v60, %v7540_v21  ;;  %v4041_v1 = vrot.slane %v8423_v55, %v7529_v45  ;;  %v4665_v40 = vsel %vm2987_vm2, %v4662_v26, %v4664_v46 }
 0x481   : > { %v4650_v23 = vsel %vm2983_vm15, %v4648_v19, %v4649_v7  ;;  %v4320_v33 = vmul.f32 %v4213_v34, %v8057_v13  ;;  %v4637_v53 = vsel %vm2987_vm2, %v4634_v41, %v4636_v30  ;;  %v4678_v5 = vsel %vm2983_vm15, %v4676_v49, %v4677_v24 }
 0x482   : > { %v4673_v42 = vsel %vm2991_vm4, %v4669_v6, %v4672_v54  ;;  %v8467_v10 = vsub.s32 %v4884_v31, %v9200_v9  ;;  %v4659_v32 = vsel %vm2991_vm4, %v4655_v58, %v4658_v37  ;;  %v4645_v36 = vsel %vm2991_vm4, %v4641_v38, %v4644_v14 }
 0x483   : > { %v4631_v57 = vsel %vm2991_vm4, %v4627_v16, %v4630_v25  ;;  %v4666_v46 = vsel %vm2991_vm4, %v4662_v26, %v4665_v40  ;;  %v4651_v7 = vsel %vm2987_vm2, %v4648_v19, %v4650_v23  ;;  %v4221_v34 = vrot.slane %v4111_v63, 1 }
 0x484   : > { %v5593_v13 = vpop.eup %5592  ;;  %v4211_v30 = vrot.slane %v4041_v1, 1  ;;  %v4638_v24 = vsel %vm2991_vm4, %v4634_v41, %v4637_v53  ;;  %v4679_v6 = vsel %vm2987_vm2, %v4676_v49, %v4678_v5  ;;  %v4419_v31 = vmul.f32 %v8339_v52, %v4320_v33 }
 0x485   : > { %v4953_v54 = vcombine.low %v4645_v36, %v4673_v42  ;;  %v4097_v58 = vrot.slane %v8446_v60, %v7529_v45  ;;  %v4881_v38 = vcombine.low %v4631_v57, %v4659_v32  ;;  %v4048_v16 = vrot.slane %v8423_v55, %v7533_v4 }
 0x486   : > { %v4917_v26 = vcombine.low %v4638_v24, %v4666_v46  ;;  %v4167_v14 = vrot.slane %v5593_v13, %v7540_v21  ;;  %v4319_v25 = vmul.f32 %v4055_v61, %v8054_v8  ;;  %v4062_v41 = vrot.slane %v8423_v55, %v7554_v51 }
 0x487   : > { %v8486_v37 = vsel %vm2991_vm4, %v4676_v49, %v4679_v6  ;;  %v4336_v40 = vmul.f32 %v4221_v34, %v7980_v2  ;;  %v4153_v23 = vrot.slane %v5593_v13, %v7529_v45  ;;  %v4316_v33 = vmul.f32 %v4211_v30, %v8033_v44  ;;  %v9203_v6 = vld [vmem:[#allocation37_spill] sm:$0xff] }
 0x488   : > { %9201 = vst [vmem:[#allocation13_spill] sm:$0xff] %v8486_v37  ;;  %v8492_v53 = vsel %vm2991_vm4, %v4648_v19, %v4651_v7  ;;  %v4518_v5 = vadd.f32 %v8363_v62, %v4419_v31  ;;  %v8496_v42 = vrot.slane %v4953_v54, %v8467_v10  ;;  %v4219_v8 = vrot.slane %v4097_v58, 1 }
 0x489   : > { %9202 = vst [vmem:[#allocation36_spill] sm:$0xff] %v8492_v53  ;;  %v8499_v55 = vrot.slane %v4881_v38, %v8467_v10  ;;  %v4315_v61 = vmul.f32 %v4041_v1, %v8023_v47  ;;  %v4212_v49 = vrot.slane %v4048_v16, 1  ;;  %v8503_v2 = vrot.slane %v4917_v26, %v8467_v10  ;;  %v9204_v26 = vld [vmem:[#allocation22_spill] sm:$0xff] }
 0x48a   : > { %v4229_v19 = vrot.slane %v4167_v14, 1  ;;  %v4418_v9 = vmul.f32 %v8326_v11, %v4319_v25  ;;  %v8509_v32 = vmul.f32 %v4048_v16, %v8042_v15  ;;  %v4214_v36 = vrot.slane %v4062_v41, 1 }
 0x48b   : > { %v4435_v57 = vmul.f32 %v8339_v52, %v4336_v40  ;;  %v4227_v46 = vrot.slane %v4153_v23, 1  ;;  %v4415_v7 = vmul.f32 %v8355_v56, %v4316_v33  ;;  %v4104_v47 = vrot.slane %v8446_v60, %v7533_v4  ;;  %v9205_v40 = vld [vmem:[#allocation43_spill] sm:$0xff] }
 0x48c   : > { %v4697_v1 = vrot.slane %v4518_v5, 7  ;;  %v4332_v34 = vmul.f32 %v4219_v8, %v7952_v17  ;;  %v4160_v30 = vrot.slane %v5593_v13, %v7533_v4  ;;  %v8518_v24 = vmul.f32 %v4062_v41, %v8062_v35  ;;  %v9206_v41 = vld [vmem:[#allocation42_spill] sm:$0xff] }
 0x48d   : > { %v4335_v15 = vmul.f32 %v4111_v63, %v7973_v20  ;;  %v4331_v31 = vmul.f32 %v4097_v58, %v9203_v6  ;;  %v4414_v54 = vmul.f32 %v8329_v27, %v4315_v61  ;;  %v4118_v38 = vrot.slane %v8446_v60, %v7554_v51 }
 0x48e   : > { %v4351_v16 = vmul.f32 %v4167_v14, %v8036_v12  ;;  %v4352_v25 = vmul.f32 %v4229_v19, %v9204_v26  ;;  %v4517_v17 = vadd.f32 %v8342_v43, %v4418_v9  ;;  %v4347_v33 = vmul.f32 %v4153_v23, %v9205_v40  ;;  %v9207_v19 = vld [vmem:[#allocation18_spill] sm:$0xff]  ;;  %v9209_v40 = vld [vmem:[#allocation19_spill] sm:$0xff] }
 0x48f   : > { %v4534_v35 = vadd.f32 %v8363_v62, %v4435_v57  ;;  %v4348_v5 = vmul.f32 %v4227_v46, %v9206_v41  ;;  %v4514_v20 = vadd.f32 %v8366_v39, %v4415_v7  ;;  %v4220_v63 = vrot.slane %v4104_v47, 1 }
 0x490   : > { %v4698_v58 = vsel %vm2979_vm13, %v4697_v1, %v4517_v17  ;;  %v4431_v8 = vmul.f32 %v8355_v56, %v4332_v34  ;;  %v4228_v60 = vrot.slane %v4160_v30, 1  ;;  %v4174_v12 = vrot.slane %v5593_v13, %v7554_v51 }
 0x491   : > { %v4434_v14 = vmul.f32 %v8326_v11, %v4335_v15  ;;  %v4430_v61 = vmul.f32 %v8329_v27, %v4331_v31  ;;  %v4318_v23 = vmul.f32 %v4212_v49, %v9207_v19  ;;  %v4222_v9 = vrot.slane %v4118_v38, 1  ;;  %v9208_v15 = vld [vmem:[#allocation39_spill] sm:$0xff] }
 0x492   : > { %v4450_v57 = vmul.f32 %v8326_v11, %v4351_v16  ;;  %v4451_v46 = vmul.f32 %v8339_v52, %v4352_v25  ;;  %v4446_v7 = vmul.f32 %v8329_v27, %v4347_v33  ;;  %v4513_v6 = vadd.f32 %v8335_v28, %v4414_v54  ;;  %v9210_v54 = vld [vmem:[#allocation17_spill] sm:$0xff] }
 0x493   : > { %v4699_v34 = vsel %vm2983_vm15, %v4697_v1, %v4698_v58  ;;  %v8543_v26 = vrot.slane %v4534_v35, 7  ;;  %v4447_v13 = vmul.f32 %v8355_v56, %v4348_v5  ;;  %v4334_v17 = vmul.f32 %v4220_v63, %v9208_v15  ;;  %v9211_v58 = vld [vmem:[#allocation41_spill] sm:$0xff]  ;;  %v9213_v15 = vld [vmem:[#allocation38_spill] sm:$0xff] }
 0x494   : > { %v4530_v31 = vadd.f32 %v8366_v39, %v4431_v8  ;;  %v8548_v49 = vrot.slane %v4514_v20, 7  ;;  %v4350_v16 = vmul.f32 %v4228_v60, %v9209_v40  ;;  %v4230_v41 = vrot.slane %v4174_v12, 1  ;;  %v9214_v40 = vld [vmem:[#allocation44_spill] sm:$0xff] }
 0x495   : > { %v4533_v25 = vadd.f32 %v8342_v43, %v4434_v14  ;;  %v4529_v33 = vadd.f32 %v8335_v28, %v4430_v61  ;;  %v4322_v19 = vmul.f32 %v4214_v36, %v9210_v54  ;;  %v4338_v35 = vmul.f32 %v4222_v9, %v9211_v58 }
 0x496   : > { %v4549_v44 = vadd.f32 %v8342_v43, %v4450_v57  ;;  %v4550_v5 = vadd.f32 %v8363_v62, %v4451_v46  ;;  %v4700_v63 = vsel %vm2987_vm2, %v4697_v1, %v4699_v34  ;;  %v4417_v20 = vmul.f32 %v8374_v3, %v4318_v23  ;;  %v9212_v46 = vld [vmem:[#allocation16_spill] sm:$0xff] }
 0x497   : > { %v4754_v8 = vsel %vm2979_vm13, %v8543_v26, %v4533_v25  ;;  %v4545_v60 = vadd.f32 %v8335_v28, %v4446_v7  ;;  %v4546_v14 = vadd.f32 %v8366_v39, %v4447_v13  ;;  %v4433_v61 = vmul.f32 %v8374_v3, %v4334_v17 }
 0x498   : > { %v4684_v36 = vsel %vm2979_vm13, %v8548_v49, %v4513_v6  ;;  %v8566_v9 = vrot.slane %v4530_v31, 7  ;;  %v4449_v57 = vmul.f32 %v8374_v3, %v4350_v16  ;;  %v4354_v34 = vmul.f32 %v4230_v41, %v9212_v46  ;;  %v9215_v41 = vld [vmem:[#allocation40_spill] sm:$0xff]  ;;  %v9216_v46 = vld [vmem:[#allocation45_spill] sm:$0xff] }
 0x499   : > { %v4333_v23 = vmul.f32 %v4104_v47, %v9213_v15  ;;  %v4349_v54 = vmul.f32 %v4160_v30, %v9214_v40  ;;  %v4421_v25 = vmul.f32 %v8385_v29, %v4322_v19  ;;  %v4437_v7 = vmul.f32 %v8385_v29, %v4338_v35 }
 0x49a   : > { %v8575_v13 = vsel %vm2991_vm4, %v4697_v1, %v4700_v63  ;;  %v4755_v6 = vsel %vm2983_vm15, %v8543_v26, %v4754_v8  ;;  %v8579_v17 = vrot.slane %v4550_v5, 7  ;;  %v4516_v31 = vadd.f32 %v8380_v50, %v4417_v20 }
 0x49b   : > { %v4685_v16 = vsel %vm2983_vm15, %v8548_v49, %v4684_v36  ;;  %v8584_v47 = vrot.slane %v4546_v14, 7  ;;  %v4532_v30 = vadd.f32 %v8380_v50, %v4433_v61  ;;  %v4337_v19 = vmul.f32 %v4118_v38, %v9215_v41 }
 0x49c   : > { %v4740_v1 = vsel %vm2979_vm13, %v8566_v9, %v4529_v33  ;;  %v4416_v58 = vmul.f32 %v8347_v48, %v8509_v32  ;;  %v4548_v35 = vadd.f32 %v8380_v50, %v4449_v57  ;;  %v4453_v5 = vmul.f32 %v8385_v29, %v4354_v34 }
 0x49d   : > { %v4432_v20 = vmul.f32 %v8347_v48, %v4333_v23  ;;  %v4448_v8 = vmul.f32 %v8347_v48, %v4349_v54  ;;  %v4520_v14 = vadd.f32 %v8389_v0, %v4421_v25  ;;  %v4536_v61 = vadd.f32 %v8389_v0, %v4437_v7 }
 0x49e   : > { %v4810_v33 = vsel %vm2979_vm13, %v8579_v17, %v4549_v44  ;;  %v4690_v36 = vrot.slane %v4516_v31, 7  ;;  %v4353_v32 = vmul.f32 %v4174_v12, %v9216_v46  ;;  %v4796_v57 = vsel %vm2979_vm13, %v8584_v47, %v4545_v60 }
 0x49f   : > { %v4746_v34 = vrot.slane %v4532_v30, 7  ;;  %v4420_v15 = vmul.f32 %v8360_v59, %v8518_v24  ;;  %v4436_v23 = vmul.f32 %v8360_v59, %v4337_v19  ;;  %v4515_v54 = vadd.f32 %v8352_v22, %v4416_v58 }
 0x4a0   : > { %v4802_v25 = vrot.slane %v4548_v35, 7  ;;  %v4552_v7 = vadd.f32 %v8389_v0, %v4453_v5  ;;  %v4531_v44 = vadd.f32 %v8352_v22, %v4432_v20  ;;  %v4547_v12 = vadd.f32 %v8352_v22, %v4448_v8 }
 0x4a1   : > { %v4704_v31 = vrot.slane %v4520_v14, 7  ;;  %v4691_v30 = vsel %vm2979_vm13, %v4690_v36, %v4515_v54  ;;  %v4452_v24 = vmul.f32 %v8360_v59, %v4353_v32  ;;  %v4741_v19 = vsel %vm2983_vm15, %v8566_v9, %v4740_v1 }
 0x4a2   : > { %v4747_v58 = vsel %vm2979_vm13, %v4746_v34, %v4531_v44  ;;  %v4519_v35 = vadd.f32 %v8370_v18, %v4420_v15  ;;  %v4535_v5 = vadd.f32 %v8370_v18, %v4436_v23  ;;  %v4811_v8 = vsel %vm2983_vm15, %v8579_v17, %v4810_v33 }
 0x4a3   : > { %v4803_v14 = vsel %vm2979_vm13, %v4802_v25, %v4547_v12  ;;  %v4797_v46 = vsel %vm2983_vm15, %v8584_v47, %v4796_v57  ;;  %v4692_v1 = vsel %vm2983_vm15, %v4690_v36, %v4691_v30  ;;  %v4551_v33 = vadd.f32 %v8370_v18, %v4452_v24 }
 0x4a4   : > { %v4705_v32 = vsel %vm2979_vm13, %v4704_v31, %v4519_v35  ;;  %v4756_v54 = vsel %vm2987_vm2, %v8543_v26, %v4755_v6  ;;  %v4742_v57 = vsel %vm2987_vm2, %v8566_v9, %v4741_v19  ;;  %v4812_v24 = vsel %vm2987_vm2, %v8579_v17, %v4811_v8 }
 0x4a5   : > { %v4706_v12 = vsel %vm2983_vm15, %v4704_v31, %v4705_v32  ;;  %v4798_v6 = vsel %vm2987_vm2, %v8584_v47, %v4797_v46 }
 0x4a6   : > { %v4707_v8 = vsel %vm2987_vm2, %v4704_v31, %v4706_v12 }
 0x4cc   : > { %v3934_v63 = vpop.xlane.xlu0 %3933 }
 0x4cd   : > { %v3950_v38 = vmul.f32 0.03125, %v3934_v63  ;;  %v4760_v63 = vrot.slane %v4536_v61, 7  ;;  %v8620_v61 = vrot.slane %v4552_v7, 7  ;;  %v4686_v7 = vsel %vm2987_vm2, %v8548_v49, %v4685_v16 }
 0x4ce   : > { %v4693_v16 = vsel %vm2987_vm2, %v4690_v36, %v4692_v1  ;;  %v8652_v35 = vsel %vm2991_vm4, %v8548_v49, %v4686_v7  ;;  %v8669_v49 = vsel %vm2991_vm4, %v8584_v47, %v4798_v6  ;;  %v8687_v47 = vsel %vm2991_vm4, %v4704_v31, %v4707_v8 }
 0x4cf   : > { %v3958_v40 = vadd.f32 1e-05, %v3950_v38  ;;  %9217 = vst [vmem:[#allocation8_spill] sm:$0xff] %v8620_v61  ;;  %v4761_v15 = vsel %vm2979_vm13, %v4760_v63, %v4535_v5  ;;  %v4817_v30 = vsel %vm2979_vm13, %v8620_v61, %v4551_v33  ;;  %v8656_v5 = vsel %vm2991_vm4, %v8566_v9, %v4742_v57  ;;  %9218 = vst [vmem:[#allocation30_spill] sm:$0xff] %v8687_v47 }
 0x4d0   : > { %v3940_v41 = vpop.xlane.xlu0 %3939  ;;  %v8672_v9 = vsel %vm2991_vm4, %v4690_v36, %v4693_v16  ;;  %v9225_v16 = vld [vmem:[#allocation48_spill] sm:$0xff] }
 0x4d1   : > { %5594 = vrsqrt.f32 %v3958_v40  ;;  %v3952_v60 = vmul.f32 0.03125, %v3940_v41  ;;  %v4748_v40 = vsel %vm2983_vm15, %v4746_v34, %v4747_v58  ;;  %v4804_v41 = vsel %vm2983_vm15, %v4802_v25, %v4803_v14 }
 0x4d2   : > { %v4749_v19 = vsel %vm2987_vm2, %v4746_v34, %v4748_v40  ;;  %v8648_v58 = vsel %vm2991_vm4, %v8543_v26, %v4756_v54  ;;  %v8665_v26 = vsel %vm2991_vm4, %v8579_v17, %v4812_v24  ;;  %v9221_v54 = vld [vmem:[#allocation23_spill] sm:$0xff] }
 0x4d3   : > { %v3960_v20 = vadd.f32 1e-05, %v3952_v60  ;;  %v4762_v60 = vsel %vm2983_vm15, %v4760_v63, %v4761_v15  ;;  %v8675_v1 = vsel %vm2991_vm4, %v4746_v34, %v4749_v19 }
 0x4d4   : > { %v3946_v38 = vpop.xlane.xlu0 %3945  ;;  %v4763_v14 = vsel %vm2987_vm2, %v4760_v63, %v4762_v60  ;;  %v9223_v60 = vld [vmem:[#allocation21_spill] sm:$0xff] }
 0x4d5   : > { %5596 = vrsqrt.f32 %v3960_v20  ;;  %v3954_v23 = vmul.f32 0.03125, %v3946_v38  ;;  %v4805_v20 = vsel %vm2987_vm2, %v4802_v25, %v4804_v41  ;;  %v4818_v38 = vsel %vm2983_vm15, %v8620_v61, %v4817_v30  ;;  %v9222_v41 = vld [vmem:[#allocation20_spill] sm:$0xff] }
 0x4d6   : > { %v8684_v17 = vsel %vm2991_vm4, %v4802_v25, %v4805_v20  ;;  %v8690_v36 = vsel %vm2991_vm4, %v4760_v63, %v4763_v14  ;;  %v8694_v34 = vsel %vm2987_vm2, %v8620_v61, %v4818_v38  ;;  %v9224_v63 = vld [vmem:[#allocation47_spill] sm:$0xff]  ;;  %v9226_v14 = vld [vmem:[#allocation24_spill] sm:$0xff] }
 0x4d7   : > { %v3962_v44 = vadd.f32 1e-05, %v3954_v23  ;;  %9219 = vst [vmem:[#allocation12_spill] sm:$0xff] %v8690_v36  ;;  %9220 = vst [vmem:[#allocation34_spill] sm:$0xff] %v8694_v34  ;;  %v9233_v61 = vld [vmem:[#allocation51_spill] sm:$0xff] }
 0x4d9   : > { %5598 = vrsqrt.f32 %v3962_v44 }
 0x4db   : > { %v5595_v46 = vpop.eup %5594 }
 0x4dc   : > { %v4083_v32 = vrot.slane %v5595_v46, %v7540_v21  ;;  %v4069_v15 = vrot.slane %v5595_v46, %v7529_v45  ;;  %v4076_v23 = vrot.slane %v5595_v46, %v7533_v4  ;;  %v8681_v40 = vrot.slane %v5595_v46, %v7554_v51 }
 0x4de   : > { %v4217_v33 = vrot.slane %v4083_v32, 1  ;;  %v4327_v7 = vmul.f32 %v4083_v32, %v9221_v54  ;;  %v4215_v57 = vrot.slane %v4069_v15, 1  ;;  %v4323_v44 = vmul.f32 %v4069_v15, %v9222_v41  ;;  %v9227_v15 = vld [vmem:[#allocation46_spill] sm:$0xff]  ;;  %v9228_v41 = vld [vmem:[#allocation29_spill] sm:$0xff] }
 0x4df   : > { %v8698_v12 = vpop.eup %5596  ;;  %v4216_v25 = vrot.slane %v4076_v23, 1  ;;  %v8701_v30 = vmul.f32 %v4076_v23, %v9223_v60  ;;  %v8706_v24 = vmul.f32 %v8681_v40, %v9224_v63 }
 0x4e0   : > { %v4139_v6 = vrot.slane %v8698_v12, %v7540_v21  ;;  %v4328_v19 = vmul.f32 %v4217_v33, %v9225_v16  ;;  %v4426_v20 = vmul.f32 %v8326_v11, %v4327_v7  ;;  %v4125_v8 = vrot.slane %v8698_v12, %v7529_v45 }
 0x4e1   : > { %v4324_v38 = vmul.f32 %v4215_v57, %v9226_v14  ;;  %v4422_v46 = vmul.f32 %v8329_v27, %v4323_v44  ;;  %v8718_v32 = vrot.slane %v8698_v12, %v7533_v4  ;;  %v8721_v23 = vmul.f32 %v4216_v25, %v9227_v15  ;;  %v9229_v57 = vld [vmem:[#allocation26_spill] sm:$0xff]  ;;  %v9230_v15 = vld [vmem:[#allocation31_spill] sm:$0xff] }
 0x4e2   : > { %v4225_v54 = vrot.slane %v4139_v6, 1  ;;  %v4343_v60 = vmul.f32 %v4139_v6, %v9228_v41  ;;  %v4427_v33 = vmul.f32 %v8339_v52, %v4328_v19  ;;  %v4525_v7 = vadd.f32 %v8342_v43, %v4426_v20  ;;  %v9231_v41 = vld [vmem:[#allocation25_spill] sm:$0xff] }
 0x4e3   : > { %v8726_v63 = vpop.eup %5598  ;;  %v4223_v16 = vrot.slane %v4125_v8, 1  ;;  %v4339_v14 = vmul.f32 %v4125_v8, %v9229_v57  ;;  %v4423_v44 = vmul.f32 %v8355_v56, %v4324_v38  ;;  %v4521_v31 = vadd.f32 %v8335_v28, %v4422_v46  ;;  %v9232_v46 = vld [vmem:[#allocation53_spill] sm:$0xff] }
 0x4e4   : > { %v4195_v25 = vrot.slane %v8726_v63, %v7540_v21  ;;  %v4344_v37 = vmul.f32 %v4225_v54, %v9230_v15  ;;  %v4442_v6 = vmul.f32 %v8326_v11, %v4343_v60  ;;  %v4526_v19 = vadd.f32 %v8363_v62, %v4427_v33 }
 0x4e5   : > { %v4181_v20 = vrot.slane %v8726_v63, %v7529_v45  ;;  %v4340_v53 = vmul.f32 %v4223_v16, %v9231_v41  ;;  %v4438_v8 = vmul.f32 %v8329_v27, %v4339_v14  ;;  %v4522_v38 = vadd.f32 %v8366_v39, %v4423_v44  ;;  %v9234_v45 = vld [vmem:[#allocation57_spill] sm:$0xff]  ;;  %v9235_v41 = vld [vmem:[#allocation54_spill] sm:$0xff] }
 0x4e6   : > { %v4233_v57 = vrot.slane %v4195_v25, 1  ;;  %v4359_v36 = vmul.f32 %v4195_v25, %v9232_v46  ;;  %v4443_v21 = vmul.f32 %v8339_v52, %v4344_v37  ;;  %v4541_v54 = vadd.f32 %v8342_v43, %v4442_v6 }
 0x4e7   : > { %v4725_v15 = vrot.slane %v4526_v19, 7  ;;  %v4231_v60 = vrot.slane %v4181_v20, 1  ;;  %v4355_v33 = vmul.f32 %v4181_v20, %v9233_v61  ;;  %v4439_v34 = vmul.f32 %v8355_v56, %v4340_v53 }
 0x4e8   : > { %v4360_v47 = vmul.f32 %v4233_v57, %v9234_v45  ;;  %v4458_v16 = vmul.f32 %v8326_v11, %v4359_v36  ;;  %v4542_v14 = vadd.f32 %v8363_v62, %v4443_v21  ;;  %v4537_v44 = vadd.f32 %v8335_v28, %v4438_v8 }
 0x4e9   : > { %v4726_v25 = vsel %vm2979_vm13, %v4725_v15, %v4525_v7  ;;  %v4356_v37 = vmul.f32 %v4231_v60, %v9235_v41  ;;  %v4454_v6 = vmul.f32 %v8329_v27, %v4355_v33  ;;  %v4538_v19 = vadd.f32 %v8366_v39, %v4439_v34 }
 0x4ea   : > { %v4459_v61 = vmul.f32 %v8339_v52, %v4360_v47  ;;  %v4557_v53 = vadd.f32 %v8342_v43, %v4458_v16  ;;  %v4727_v20 = vsel %vm2983_vm15, %v4725_v15, %v4726_v25  ;;  %v4781_v57 = vrot.slane %v4542_v14, 7 }
 0x4eb   : > { %v4728_v11 = vsel %vm2987_vm2, %v4725_v15, %v4727_v20  ;;  %v4455_v36 = vmul.f32 %v8355_v56, %v4356_v37  ;;  %v4553_v8 = vadd.f32 %v8335_v28, %v4454_v6  ;;  %v4711_v7 = vrot.slane %v4522_v38, 7 }
 0x4ec   : > { %v4558_v46 = vadd.f32 %v8363_v62, %v4459_v61  ;;  %v4729_v27 = vsel %vm2991_vm4, %v4725_v15, %v4728_v11  ;;  %v4782_v34 = vsel %vm2979_vm13, %v4781_v57, %v4541_v54  ;;  %v4767_v21 = vrot.slane %v4538_v19, 7 }
 0x4ed   : > { %v4783_v52 = vsel %vm2983_vm15, %v4781_v57, %v4782_v34  ;;  %v4962_v43 = vcombine.low %v8575_v13, %v4729_v27  ;;  %v4554_v47 = vadd.f32 %v8366_v39, %v4455_v36  ;;  %v4712_v60 = vsel %vm2979_vm13, %v4711_v7, %v4521_v31 }
 0x4ee   : > { %v4784_v56 = vsel %vm2987_vm2, %v4781_v57, %v4783_v52  ;;  %v4837_v33 = vrot.slane %v4558_v46, 7  ;;  %v4713_v28 = vsel %vm2983_vm15, %v4711_v7, %v4712_v60  ;;  %v4768_v62 = vsel %vm2979_vm13, %v4767_v21, %v4537_v44 }
 0x4ef   : > { %v4785_v38 = vsel %vm2991_vm4, %v4781_v57, %v4784_v56  ;;  %v8772_v54 = vrot.slane %v4962_v43, %v8467_v10  ;;  %v4714_v15 = vsel %vm2987_vm2, %v4711_v7, %v4713_v28  ;;  %v4769_v13 = vsel %vm2983_vm15, %v4767_v21, %v4768_v62  ;;  %v9238_v43 = vld [vmem:[#allocation52_spill] sm:$0xff]  ;;  %v9240_v28 = vld [vmem:[#allocation55_spill] sm:$0xff] }
 0x4f0   : > { %v4838_v39 = vsel %vm2979_vm13, %v4837_v33, %v4557_v53  ;;  %v4971_v31 = vcombine.low %v8648_v58, %v4785_v38  ;;  %v4715_v45 = vsel %vm2991_vm4, %v4711_v7, %v4714_v15  ;;  %v4770_v16 = vsel %vm2987_vm2, %v4767_v21, %v4769_v13  ;;  %v9236_v53 = vld [vmem:[#allocation7_spill] sm:$0xff]  ;;  %v9239_v56 = vld [vmem:[#allocation28_spill] sm:$0xff] }
 0x4f1   : > { %v4839_v14 = vsel %vm2983_vm15, %v4837_v33, %v4838_v39  ;;  %v5408_v44 = vcombine.high %v8496_v42, %v8772_v54  ;;  %v4771_v25 = vsel %vm2991_vm4, %v4767_v21, %v4770_v16  ;;  %v4823_v41 = vrot.slane %v4554_v47, 7  ;;  %v9237_v21 = vld [vmem:[#allocation27_spill] sm:$0xff] }
 0x4f2   : > { %v4840_v37 = vsel %vm2987_vm2, %v4837_v33, %v4839_v14  ;;  %v8786_v6 = vrot.slane %v4971_v31, %v8467_v10  ;;  %v4890_v19 = vcombine.low %v8652_v35, %v4715_v45  ;;  %v4899_v58 = vcombine.low %v8656_v5, %v4771_v25 }
 0x4f3   : > { %v4841_v61 = vsel %vm2991_vm4, %v4837_v33, %v4840_v37  ;;  %v5153_v20 = vrot.slane %v5408_v44, %v9236_v53  ;;  %v4824_v57 = vsel %vm2979_vm13, %v4823_v41, %v4553_v8  ;;  %v4188_v11 = vrot.slane %v8726_v63, %v7533_v4 }
 0x4f4   : > { %v4980_v36 = vcombine.low %v8665_v26, %v4841_v61  ;;  %v4825_v7 = vsel %vm2983_vm15, %v4823_v41, %v4824_v57  ;;  %v8798_v46 = vrot.slane %v4890_v19, %v8467_v10  ;;  %v8801_v35 = vrot.slane %v4899_v58, %v8467_v10 }
 0x4f5   : > { %v4826_v5 = vsel %vm2987_vm2, %v4823_v41, %v4825_v7  ;;  %v4224_v27 = vrot.slane %v8718_v32, 1  ;;  %v4232_v34 = vrot.slane %v4188_v11, 1  ;;  %v4341_v8 = vmul.f32 %v8718_v32, %v9237_v21  ;;  %v9241_v7 = vld [vmem:[#allocation49_spill] sm:$0xff] }
 0x4f6   : > { %v8808_v4 = vrot.slane %v4980_v36, %v8467_v10  ;;  %v4827_v26 = vsel %vm2991_vm4, %v4823_v41, %v4826_v5  ;;  %v5404_v52 = vcombine.high %v8499_v55, %v8798_v46  ;;  %v4357_v47 = vmul.f32 %v4188_v11, %v9238_v43  ;;  %v9244_v43 = vld [vmem:[#allocation58_spill] sm:$0xff] }
 0x4f7   : > { %v4908_v60 = vcombine.low %v8669_v49, %v4827_v26  ;;  %v4342_v33 = vmul.f32 %v4224_v27, %v9239_v56  ;;  %v4358_v62 = vmul.f32 %v4232_v34, %v9240_v28  ;;  %v4424_v38 = vmul.f32 %v8347_v48, %v8701_v30  ;;  %v9243_v34 = vld [vmem:[#allocation50_spill] sm:$0xff]  ;;  %v9245_v28 = vld [vmem:[#allocation56_spill] sm:$0xff] }
 0x4f8   : > { %v5409_v32 = vcombine.high %v8786_v6, %v8808_v4  ;;  %v5059_v15 = vrot.slane %v5404_v52, %v9236_v53  ;;  %v4425_v13 = vmul.f32 %v8374_v3, %v8721_v23  ;;  %v4440_v39 = vmul.f32 %v8347_v48, %v4341_v8 }
 0x4f9   : > { %v8826_v31 = vrot.slane %v4908_v60, %v8467_v10  ;;  %v4441_v49 = vmul.f32 %v8374_v3, %v4342_v33  ;;  %v4456_v45 = vmul.f32 %v8347_v48, %v4357_v47  ;;  %v4457_v16 = vmul.f32 %v8374_v3, %v4358_v62 }
 0x4fa   : > { %v5160_v30 = vrot.slane %v5409_v32, %v9236_v53  ;;  %v4523_v14 = vadd.f32 %v8352_v22, %v4424_v38  ;;  %v4524_v44 = vadd.f32 %v8380_v50, %v4425_v13  ;;  %v4539_v25 = vadd.f32 %v8352_v22, %v4440_v39  ;;  %v9246_v13 = vld [vmem:[#allocation59_spill] sm:$0xff] }
 0x4fb   : > { %v5405_v23 = vcombine.high %v8801_v35, %v8826_v31  ;;  %v4540_v41 = vadd.f32 %v8380_v50, %v4441_v49  ;;  %v4555_v37 = vadd.f32 %v8352_v22, %v4456_v45  ;;  %v4556_v19 = vadd.f32 %v8380_v50, %v4457_v16 }
 0x4fc   : > { %v5161_v48 = vcombine.low %v5153_v20, %v5160_v30  ;;  %v4718_v58 = vrot.slane %v4524_v44, 7  ;;  %v4146_v3 = vrot.slane %v8698_v12, %v7554_v51  ;;  %v4202_v61 = vrot.slane %v8726_v63, %v7554_v51 }
 0x4fd   : > { %v5066_v57 = vrot.slane %v5405_v23, %v9236_v53  ;;  %v4774_v11 = vrot.slane %v4540_v41, 7  ;;  %v4830_v36 = vrot.slane %v4556_v19, 7  ;;  %v9242_v5 = vrot.slane %v8681_v40, 1 }
 0x4fe   : > { %5162 = vrot.lane.b32.xlu0 %v5161_v48, %s5691_s17  ;;  %v4719_v50 = vsel %vm2979_vm13, %v4718_v58, %v4523_v14  ;;  %v4226_v22 = vrot.slane %v4146_v3, 1  ;;  %v4234_v20 = vrot.slane %v4202_v61, 1  ;;  %v4345_v21 = vmul.f32 %v4146_v3, %v9243_v34 }
 0x4ff   : > { %v4330_v27 = vmul.f32 %v9242_v5, %v9241_v7  ;;  %v5067_v12 = vcombine.low %v5059_v15, %v5066_v57  ;;  %v4720_v8 = vsel %vm2983_vm15, %v4718_v58, %v4719_v50  ;;  %v4775_v51 = vsel %vm2979_vm13, %v4774_v11, %v4539_v25 }
 0x500   : > { %v4831_v63 = vsel %vm2979_vm13, %v4830_v36, %v4555_v37  ;;  %v4721_v26 = vsel %vm2987_vm2, %v4718_v58, %v4720_v8  ;;  %v4776_v40 = vsel %vm2983_vm15, %v4774_v11, %v4775_v51  ;;  %v4346_v47 = vmul.f32 %v4226_v22, %v9244_v43  ;;  %v9248_v43 = vld [vmem:[#allocation34_spill] sm:$0xff] }
 0x501   : > { %v4832_v52 = vsel %vm2983_vm15, %v4830_v36, %v4831_v63  ;;  %5068 = vrot.lane.b32.xlu1 %v5067_v12, %s5691_s17  ;;  %v4722_v60 = vsel %vm2991_vm4, %v4718_v58, %v4721_v26  ;;  %v4777_v56 = vsel %vm2987_vm2, %v4774_v11, %v4776_v40  ;;  %v4361_v62 = vmul.f32 %v4202_v61, %v9245_v28  ;;  %v9247_v26 = vld [vmem:[#allocation30_spill] sm:$0xff]  ;;  %s5418_s17 = sshll.u32 %s5752_s22, 8  ;;  %s5619_s22 = scalar_lea.vmem %s8943_s23, 256 }
 0x502   : > { %v4833_v33 = vsel %vm2987_vm2, %v4830_v36, %v4832_v52  ;;  %v4778_v38 = vsel %vm2991_vm4, %v4774_v11, %v4777_v56  ;;  %v4926_v15 = vcombine.low %v8672_v9, %v4722_v60  ;;  %v4362_v39 = vmul.f32 %v4234_v20, %v9246_v13  ;;  %s8941_s10 = scalar_lea.hbm %s8989_s5, %s5418_s17  ;;  %p5620_p11 = scmp.ne.s32.totalorder %s8943_s23, %s5619_s22 }
 0x503   : > { %v4834_v32 = vsel %vm2991_vm4, %v4830_v36, %v4833_v33  ;;  %v4935_v49 = vcombine.low %v8675_v1, %v4778_v38  ;;  %v4428_v16 = vmul.f32 %v8360_v59, %v8706_v24  ;;  %v4429_v30 = vmul.f32 %v8385_v29, %v4330_v27  ;;  %v9250_v33 = vld [vmem:[#allocation12_spill] sm:$0xff]  ;;  %p5627_p1 = scmp.lt.s32.totalorder %s5625_s14, %s5619_s22 }
 0x504   : > { %v4944_v45 = vcombine.low %v8684_v17, %v4834_v32  ;;  %v4933_v14 = vrot.slane %v4926_v15, %v8467_v10  ;;  %v4444_v44 = vmul.f32 %v8360_v59, %v4345_v21  ;;  %v4445_v25 = vmul.f32 %v8385_v29, %v4346_v47  ;;  %v9249_v47 = vld [vmem:[#allocation8_spill] sm:$0xff]  ;;  %v9252_v32 = vld [vmem:[#allocation13_spill] sm:$0xff]  ;;  %p5621_p12 = pnand %p5620_p11, %p5769_p5 }
 0x505   : > { %v4460_v23 = vmul.f32 %v8360_v59, %v4361_v62  ;;  %v4942_v9 = vrot.slane %v4935_v49, %v8467_v10  ;;  %v4461_v1 = vmul.f32 %v8385_v29, %v4362_v39  ;;  %v4527_v17 = vadd.f32 %v8370_v18, %v4428_v16  ;;  %v9251_v38 = vld [vmem:[#allocation36_spill] sm:$0xff]  ;;  %p5628_p2 = por %p5627_p1, %p5626_p0 }
 0x506   : > { %v4951_v41 = vrot.slane %v4944_v45, %v8467_v10  ;;  %v5406_v24 = vcombine.high %v8503_v2, %v4933_v14  ;;  %v5075_v37 = vcombine.low %v8503_v2, %v4933_v14  ;;  %v4528_v19 = vadd.f32 %v8389_v0, %v4429_v30  ;;  %p5622_p13 = pneg %p5621_p12 }
 0x507   : > { %v4543_v48 = vadd.f32 %v8370_v18, %v4444_v44  ;;  %v4544_v59 = vadd.f32 %v8389_v0, %v4445_v25  ;;  %v4559_v61 = vadd.f32 %v8370_v18, %v4460_v23  ;;  %v4560_v11 = vadd.f32 %v8389_v0, %v4461_v1 }
 0x508   : > { %v5407_v58 = vcombine.high %v4942_v9, %v4951_v41  ;;  %v5076_v3 = vcombine.low %v4942_v9, %v4951_v41  ;;  %v5107_v57 = vrot.slane %v5406_v24, %v9236_v53  ;;  %v5083_v29 = vrot.slane %v5075_v37, %v9236_v53  ;;  %p5629_p3 = pnand %p5628_p2, %p5622_p13 }
 0x509   : > { %v4732_v36 = vrot.slane %v4528_v19, 7  ;;  %v4788_v5 = vrot.slane %v4544_v59, 7  ;;  %v5123_v27 = vcombine.low %v8496_v42, %v8772_v54  ;;  %v4844_v22 = vrot.slane %v4560_v11, 7 }
 0x50a   : > { %v5114_v7 = vrot.slane %v5407_v58, %v9236_v53  ;;  %v5090_v2 = vrot.slane %v5076_v3, %v9236_v53  ;;  %v5124_v18 = vcombine.low %v8786_v6, %v8808_v4  ;;  %v5029_v20 = vcombine.low %v8499_v55, %v8798_v46 }
 0x50b   : > { %v4733_v50 = vsel %vm2979_vm13, %v4732_v36, %v4527_v17  ;;  %v4789_v12 = vsel %vm2979_vm13, %v4788_v5, %v4543_v48  ;;  %v4845_v42 = vsel %vm2979_vm13, %v4844_v22, %v4559_v61  ;;  %v5131_v54 = vrot.slane %v5123_v27, %v9236_v53 }
 0x50c   : > { %v5115_v34 = vcombine.low %v5107_v57, %v5114_v7  ;;  %v5091_v0 = vcombine.low %v5083_v29, %v5090_v2  ;;  %v4734_v21 = vsel %vm2983_vm15, %v4732_v36, %v4733_v50  ;;  %v4790_v51 = vsel %vm2983_vm15, %v4788_v5, %v4789_v12 }
 0x50d   : > { %v4735_v8 = vsel %vm2987_vm2, %v4732_v36, %v4734_v21  ;;  %v4791_v6 = vsel %vm2987_vm2, %v4788_v5, %v4790_v51  ;;  %v4846_v46 = vsel %vm2983_vm15, %v4844_v22, %v4845_v42  ;;  %v5138_v52 = vrot.slane %v5124_v18, %v9236_v53 }
 0x50e   : > { %5116 = vrot.lane.b32.xlu0 %v5115_v34, %s5698_s26  ;;  %5092 = vrot.lane.b32.xlu1 %v5091_v0, %s5699_s30  ;;  %v4736_v55 = vsel %vm2991_vm4, %v4732_v36, %v4735_v8  ;;  %v4792_v4 = vsel %vm2991_vm4, %v4788_v5, %v4791_v6  ;;  %v4847_v63 = vsel %vm2987_vm2, %v4844_v22, %v4846_v46 }
 0x50f   : > { %v4998_v40 = vcombine.low %v9247_v26, %v4736_v55  ;;  %v4820_v60 = vsel %vm2991_vm4, %v9249_v47, %v9248_v43  ;;  %v4848_v56 = vsel %vm2991_vm4, %v4844_v22, %v4847_v63  ;;  %v5007_v28 = vcombine.low %v9250_v33, %v4792_v4 }
 0x510   : > { %v5030_v62 = vcombine.low %v8801_v35, %v8826_v31  ;;  %v9253_v15 = vcombine.low %v9251_v38, %v9252_v32  ;;  %v5016_v49 = vcombine.low %v4820_v60, %v4848_v56  ;;  %v5139_v45 = vcombine.low %v5131_v54, %v5138_v52 }
 0x511   : > { %v5005_v39 = vrot.slane %v4998_v40, %v8467_v10  ;;  %v5037_v16 = vrot.slane %v5029_v20, %v9236_v53  ;;  %v5014_v14 = vrot.slane %v5007_v28, %v8467_v10 }
 0x512   : > { %v4996_v13 = vrot.slane %v9253_v15, %v8467_v10  ;;  %v5044_v30 = vrot.slane %v5030_v62, %v9236_v53  ;;  %v5023_v44 = vrot.slane %v5016_v49, %v8467_v10 }
 0x514   : > { %v5169_v25 = vcombine.low %v4996_v13, %v5005_v39  ;;  %v5045_v35 = vcombine.low %v5037_v16, %v5044_v30  ;;  %v5170_v31 = vcombine.low %v5014_v14, %v5023_v44  ;;  %v5411_v23 = vcombine.high %v5014_v14, %v5023_v44 }
 0x515   : > { %v5410_v1 = vcombine.high %v4996_v13, %v5005_v39 }
 0x516   : > { %v5177_v9 = vrot.slane %v5169_v25, %v9236_v53  ;;  %v5184_v41 = vrot.slane %v5170_v31, %v9236_v53  ;;  %v5208_v24 = vrot.slane %v5411_v23, %v9236_v53 }
 0x517   : > { %v5201_v37 = vrot.slane %v5410_v1, %v9236_v53 }
 0x518   : > { %v5185_v17 = vcombine.low %v5177_v9, %v5184_v41 }
 0x519   : > { %v5209_v19 = vcombine.low %v5201_v37, %v5208_v24 }
 0x51a   : > { %5186 = vrot.lane.b32.xlu1 %v5185_v17, %s5699_s30 }
 0x51e   : > { %5210 = vrot.lane.b32.xlu1 %v5209_v19, %s5698_s26 }
 0x570   : > { %v5163_v10 = vpop.permute.xlu0 %5162 }
 0x571   : > { %v5218_v29 = vsel %vm1632_vm11, %v5139_v45, %v5163_v10 }
 0x573   : > { %v5069_v48 = vpop.permute.xlu1 %5068 }
 0x574   : > { %v5213_v58 = vsel %vm1632_vm11, %v5045_v35, %v5069_v48 }
 0x580   : > { %v5117_v3 = vpop.permute.xlu0 %5116  ;;  %v5093_v59 = vpop.permute.xlu1 %5092 }
 0x581   : > { %v5215_v61 = vsel %vm5214_vm0, %v5213_v58, %v5093_v59 }
 0x582   : > { %v5217_v57 = vsel %vm5216_vm5, %v5215_v61, %v5117_v3 }
 0x583   : > { %5221 = vst [vmem:[%s217_s8] sm:$0xff] %v5217_v57 }
 0x58c   : > { %v5187_v53 = vpop.permute.xlu1 %5186 }
 0x58d   : > { %v5219_v11 = vsel %vm5214_vm0, %v5218_v29, %v5187_v53 }
 0x590   : > { %v5211_v36 = vpop.permute.xlu1 %5210 }
 0x591   : > { %v5220_v7 = vsel %vm5216_vm5, %v5219_v11, %v5211_v36 }
 0x592   : > { %5222 = vst [vmem:[%s217_s8 + $0x8] sm:$0xff] %v5220_v7 }
 0x593   : > { %5632 = shalt.err (!%p5629_p3)
}
 0x594   : > { %s5633_s15 = scalar_lea.hbm %s8941_s10, 256  ;;  %s5637_s30 = scalar_lea.hbm %s8989_s5, 512 }
 0x595   : > { %p5634_p4 = scmp.ne.s32.totalorder %s8941_s10, %s5633_s15  ;;  %p5638_p9 = scmp.lt.u32.totalorder %s8941_s10, %s8989_s5 }
 0x596   : > { %p5639_p10 = scmp.lt.u32.totalorder %s5637_s30, %s5633_s15  ;;  %p5641_p12 = scmp.lt.u32.totalorder %s5633_s15, %s8941_s10 }
 0x597   : > { %p5635_p7 = pnand %p5634_p4, %p5769_p5 }
 0x598   : > { %p5640_p11 = por %p5639_p10, %p5638_p9 }
 0x599   : > { %p5636_p8 = pneg %p5635_p7 }
 0x59a   : > { %p5642_p13 = por %p5641_p12, %p5640_p11 }
 0x59c   : > { %p5643_p0 = pnand %p5642_p13, %p5636_p8 }
 0x59e   : > { %5646 = shalt.err (!%p5643_p0)
}
 0x59f   : > { %5528 = dma.vmem_to_hbm [thread:$0]  (%p5769_p5), %s8943_s23, 256, %s8941_s10, %s5224_s11  }
 0x5a0 PF: > { %p5534_p1 = scmp.ge.s32.totalorder %s5681_s21, 2  ;;  %s5250_s8 = sand.u32 1, %s5669_s18  }
 0x5a1   : > { %s5251_s17 = scalar_lea.sflag [#allocation4], %s5250_s8 }
 0x5a2   : > { %p5531_p2 = pnand %p5534_p1, %p5773_p6 }
 0x5a4   : > { %5664 = dma.done.wait (!%p5531_p2), %s5251_s17, 256  }
 0x5a5   : > { %5666 = vsyncadd (!%p5531_p2), %s5251_s17, 4294967040  ;;  %p15_p3 = scmp.ge.s32.totalorder %s5756_s24, 4   ;;  %s9254_s18 = smov %s5673_s19 }
 0x5a6   : > { %s9255_s19 = smov %s5677_s20  ;;  %s9256_s20 = smov %s5767_s27 }
 0x5a7   : > { %s9257_s21 = smov %s5756_s24  ;;  %17 = sbr.rel (!%p15_p3) target bundleno = 3 (0x3), region = 76 }
 0x5ae   :  { %5256 = vsyncpa [#allocation4], 1 }
 0x5af   :  { %5258 = vsyncpa [#allocation4 + $0x1], 1 }

</bundles_post_ra>
